<compile_context>
chip_gen: v5e
topology: v5e:2x2
jax: 0.10.0
libtpu: 0.0.40
codegen_flags: <defaults>
</compile_context>

<pallas_src>
import functools
import math

import jax
import jax.numpy as jnp
from jax.experimental import pallas as pl
from jax.experimental.pallas import tpu as pltpu

_LANE = 128


def _padded_vmem_bytes(shape, dtype) -> int:
    """VMEM footprint of one buffer with (8,128)-tile padding on the last two dims."""
    shape = tuple(int(s) for s in shape)
    itemsize = jnp.dtype(dtype).itemsize
    if len(shape) == 0:
        return itemsize
    if len(shape) == 1:
        shape = (1,) + shape
    sub = 8 * max(1, 4 // itemsize)            # sub-32-bit dtypes pack along sublanes
    lead = math.prod(shape[:-2]) if len(shape) > 2 else 1
    s2 = -(-shape[-2] // sub) * sub
    s1 = -(-shape[-1] // _LANE) * _LANE
    return lead * s2 * s1 * itemsize


def _conv2d_same_lane_dense_kernel(x_ref, w_ref, m_ref, o_ref, *, k, padding, width):
    """'Same'-size conv (2*padding == k-1) with H*W folded onto the lane axis.

    x_ref: (NB, Cin, H*W)   flattened NCHW input block (lanes carry H*W -> dense loads)
    w_ref: (Cout*Cin*k*k,)  flat f32 weights in SMEM (scalar reads + vsplat)
    m_ref: (k, 1, H*W)      f32 column-validity mask per kw (kills row wrap / left-right halo)
    o_ref: (NB, Cout, H*W)  flattened NCHW output block
    """
    nb, cin, hw = x_ref.shape
    cout = o_ref.shape[1]
    p = padding

    for n in range(nb):                                    # tiny static unroll (nb <= N)
        xn = x_ref[n].astype(jnp.float32)                  # (Cin, HW), register-resident
        acc = [jnp.zeros((1, hw), dtype=jnp.float32) for _ in range(cout)]
        for kh in range(k):
            dy = kh - p
            for kw in range(k):
                dx = kw - p
                delta = dy * width + dx
                # shifted[:, f] = xn[:, f + delta], zero-filled outside [0, HW): one
                # lane-axis shift (slice + zero-strip concat) shared by every (co, ci).
                if delta == 0:
                    shifted = xn
                elif delta > 0:
                    shifted = jnp.concatenate(
                        [xn[:, delta:], jnp.zeros((cin, delta), jnp.float32)], axis=1)
                else:
                    shifted = jnp.concatenate(
                        [jnp.zeros((cin, -delta), jnp.float32), xn[:, :hw + delta]],
                        axis=1)
                # Column mask removes left/right halo columns and row-boundary wrap;
                # top/bottom halo rows already fell outside [0, HW) (zero-filled above).
                win = shifted if dx == 0 else shifted * m_ref[kw]      # (Cin, HW)
                for co in range(cout):
                    for ci in range(cin):
                        w_s = w_ref[((co * cin + ci) * k + kh) * k + kw]   # SMEM scalar
                        acc[co] = acc[co] + w_s * win[ci:ci + 1, :]
        # Lane-dense (HW-wide) output rows: no 16-lane masked vst.msk stores.
        # TODO(synk): fold Cin onto sublanes of the MAC (per-sublane weight column +
        #             cross-sublane reduce) for full vreg fill once C grows; moot at C=4.
        for co in range(cout):
            o_ref[n, co:co + 1, :] = acc[co].astype(o_ref.dtype)


def _conv2d_general_vpu_kernel(x_ref, w_ref, o_ref, *, k, padding):
    """General k/padding fallback: per-tap zero-extended windows, pure-VPU MACs, no scratch.

    x_ref: (NB, Cin, H, W)    NCHW input block (VMEM)
    w_ref: (Cout*Cin*k*k,)    flat f32 weights in SMEM
    o_ref: (NB, Cout, Ho, Wo) NCHW output block (VMEM)
    """
    nb, cout, ho, wo = o_ref.shape
    _, cin, h, w = x_ref.shape
    p = padding

    acc = [[jnp.zeros((ho, wo), dtype=jnp.float32) for _ in range(cout)]
           for _ in range(nb)]

    for kh in range(k):
        dy = kh - p
        i0, i1 = max(0, -dy), min(ho, h - dy)
        if i1 <= i0:
            continue
        for kw in range(k):
            dx = kw - p
            j0, j1 = max(0, -dx), min(wo, w - dx)
            if j1 <= j0:
                continue
            # Valid sub-window straight from VMEM (no padded scratch slab), zero-extended
            # to (NB, Cin, Ho, Wo) with register-level concats (only traced when halos exist).
            core = x_ref[:, :, i0 + dy:i1 + dy, j0 + dx:j1 + dx].astype(jnp.float32)
            parts = []
            if j0 > 0:
                parts.append(jnp.zeros((nb, cin, i1 - i0, j0), jnp.float32))
            parts.append(core)
            if j1 < wo:
                parts.append(jnp.zeros((nb, cin, i1 - i0, wo - j1), jnp.float32))
            row = parts[0] if len(parts) == 1 else jnp.concatenate(parts, axis=3)
            parts = []
            if i0 > 0:
                parts.append(jnp.zeros((nb, cin, i0, wo), jnp.float32))
            parts.append(row)
            if i1 < ho:
                parts.append(jnp.zeros((nb, cin, ho - i1, wo), jnp.float32))
            win = parts[0] if len(parts) == 1 else jnp.concatenate(parts, axis=2)

            for n in range(nb):
                for co in range(cout):
                    for ci in range(cin):
                        w_s = w_ref[((co * cin + ci) * k + kh) * k + kw]   # SMEM scalar
                        acc[n][co] = acc[n][co] + w_s * win[n, ci]

    # One stacked (NB, Cout, Ho, Wo) store instead of per-channel masked stores.
    out = jnp.stack([jnp.stack(acc[n], axis=0) for n in range(nb)], axis=0)
    o_ref[...] = out.astype(o_ref.dtype)


def dynamic_size_conv2d(x_nchw, weight_oikk, *, padding=0):
    """F.conv2d(x, weight, padding=padding): stride 1, no bias, NCHW / OIHW layouts."""
    n, c, h, w = x_nchw.shape
    cout, cin, k, k2 = weight_oikk.shape
    assert k == k2 and cin == c, "weight must be (C, C, k, k) matching x channels"

    ho = h + 2 * padding - k + 1
    wo = w + 2 * padding - k + 1
    assert ho >= 1 and wo >= 1, "kernel larger than padded input"

    out_dtype = x_nchw.dtype
    same_size = (ho == h) and (wo == w)        # 2*padding == k-1 ("same" conv)

    # --- grid choice ---------------------------------------------------------------
    # At a few KiB/image the kernel is fixed-overhead / DMA-latency bound: one grid step
    # for the whole batch on single-TC generations.  Split per image (-> v7x's two
    # TensorCores via "parallel") only once per-image traffic is worth a few us.
    per_image_bytes = (_padded_vmem_bytes((1, c, h, w), out_dtype)
                       + _padded_vmem_bytes((1, cout, ho, wo), out_dtype))
    split_batch = n > 1 and per_image_bytes >= (1 << 20)
    steps = n if split_batch else 1
    nb = 1 if split_batch else n
    dim_sem = ("parallel",) if split_batch else ("arbitrary",)

    # --- VMEM budget: real (8,128)-tile-padded layout, double-buffered blocks -------
    if same_size:
        block_bytes = (2 * _padded_vmem_bytes((nb, c, h * w), out_dtype)
                       + 2 * _padded_vmem_bytes((nb, cout, ho * wo), out_dtype)
                       + _padded_vmem_bytes((k, 1, h * w), jnp.float32))
    else:
        block_bytes = (2 * _padded_vmem_bytes((nb, c, h, w), out_dtype)
                       + 2 * _padded_vmem_bytes((nb, cout, ho, wo), out_dtype))
    budget = 48 << 20                      # v7x-safe (64 MiB physical); v5e/v6e have 128 MiB
    assert block_bytes <= budget, (
        f"block VMEM footprint {block_bytes / 2**20:.1f} MiB exceeds the v7x-safe budget; "
        "needs halo-aware Ho tiling")
    vmem_limit = None
    if block_bytes > (12 << 20):           # above the smallest (v5e) scoped default
        vmem_limit = int(min(block_bytes + (8 << 20), budget))

    compiler_params = pltpu.CompilerParams(
        dimension_semantics=dim_sem, vmem_limit_bytes=vmem_limit)

    w_flat = weight_oikk.astype(jnp.float32).reshape(-1)   # (Cout*Cin*k*k,) SMEM table

    if same_size:
        hw = h * w
        x_flat = x_nchw.reshape(n, c, hw)                   # free: contiguous reshape
        # Column-validity mask per kw: 1.0 where 0 <= j + (kw - p) < W, else 0.0.
        col = jnp.arange(w, dtype=jnp.int32)
        masks = []
        for kw_i in range(k):
            dx = kw_i - padding
            mrow = ((col + dx >= 0) & (col + dx < w)).astype(jnp.float32)   # (W,)
            masks.append(jnp.tile(mrow, h))                                 # (H*W,)
        col_masks = jnp.stack(masks, axis=0).reshape(k, 1, hw)

        out_flat = pl.pallas_call(
            functools.partial(_conv2d_same_lane_dense_kernel,
                              k=k, padding=padding, width=w),
            out_shape=jax.ShapeDtypeStruct((n, cout, hw), out_dtype),
            grid=(steps,),
            in_specs=[
                pl.BlockSpec((nb, c, hw), lambda b: (b, 0, 0)),
                pl.BlockSpec(memory_space=pltpu.MemorySpace.SMEM),
                pl.BlockSpec((k, 1, hw), lambda b: (0, 0, 0)),
            ],
            out_specs=pl.BlockSpec((nb, cout, hw), lambda b: (b, 0, 0)),
            compiler_params=compiler_params,
        )(x_flat, w_flat, col_masks)
        return out_flat.reshape(n, cout, ho, wo)            # free: contiguous reshape

    out = pl.pallas_call(
        functools.partial(_conv2d_general_vpu_kernel, k=k, padding=padding),
        out_shape=jax.ShapeDtypeStruct((n, cout, ho, wo), out_dtype),
        grid=(steps,),
        in_specs=[
            pl.BlockSpec((nb, c, h, w), lambda b: (b, 0, 0, 0)),
            pl.BlockSpec(memory_space=pltpu.MemorySpace.SMEM),
        ],
        out_specs=pl.BlockSpec((nb, cout, ho, wo), lambda b: (b, 0, 0, 0)),
        compiler_params=compiler_params,
    )(x_nchw, w_flat)
    return out


if __name__ == "__main__":
    kernel_size = 3
    padding = 1

    key = jax.random.PRNGKey(0)
    kx, kw = jax.random.split(key)

    # Small shapes consistent with the module's forward: NCHW input.
    N, C, H, W = 2, 4, 16, 16
    x = jax.random.normal(kx, (N, C, H, W), dtype=jnp.float32)
    # PyTorch forward draws weight = randn(C, C, k, k) each call; made deterministic here.
    weight = jax.random.normal(kw, (C, C, kernel_size, kernel_size), dtype=jnp.float32)

    # "Same" conv (lane-dense path).
    y = dynamic_size_conv2d(x, weight, padding=padding)
    y = jax.block_until_ready(y)
    y_ref = jax.lax.conv_general_dilated(
        x, weight, window_strides=(1, 1),
        padding=((padding, padding), (padding, padding)),
        dimension_numbers=("NCHW", "OIHW", "NCHW"))
    assert y.shape == y_ref.shape
    assert jnp.allclose(y, y_ref, atol=1e-4, rtol=1e-4)

    # Valid conv (general path).
    y0 = jax.block_until_ready(dynamic_size_conv2d(x, weight, padding=0))
    y0_ref = jax.lax.conv_general_dilated(
        x, weight, window_strides=(1, 1), padding=((0, 0), (0, 0)),
        dimension_numbers=("NCHW", "OIHW", "NCHW"))
    assert y0.shape == y0_ref.shape
    assert jnp.allclose(y0, y0_ref, atol=1e-4, rtol=1e-4)

    print("KERNEL_OK")
</pallas_src>

<mosaic_0001>
module attributes {stable_mosaic.version = 11 : i64} {
  func.func @_conv2d_same_lane_dense_kernel(%arg0: i32, %arg1: memref<2x4x256xf32, #tpu.memory_space<vmem>>, %arg2: memref<144xf32, #tpu.memory_space<smem>>, %arg3: memref<3x1x256xf32, #tpu.memory_space<vmem>>, %arg4: memref<2x4x256xf32, #tpu.memory_space<vmem>>) attributes {dimension_semantics = [#tpu.dimension_semantics<arbitrary>], iteration_bounds = array<i64: 1>, scalar_prefetch = 0 : i64, scratch_operands = 0 : i64, tpu.core_type = #tpu.core_type<tc>, window_params = [{transform_indices = @transform_0, window_bounds = array<i64: 2, 4, 256>}, {transform_indices = @transform_1, window_bounds = array<i64: 144>}, {pipeline_mode = #tpu.pipeline_mode<synchronous>, transform_indices = @transform_2, window_bounds = array<i64: 3, 1, 256>}, {transform_indices = @transform_3, window_bounds = array<i64: 2, 4, 256>}]} {
    %c0 = arith.constant 0 : index
    %c0_0 = arith.constant 0 : index
    %c0_1 = arith.constant 0 : index
    %0 = vector.load %arg1[%c0, %c0_0, %c0_1] : memref<2x4x256xf32, #tpu.memory_space<vmem>>, vector<1x4x256xf32>
    %1 = vector.shape_cast %0 : vector<1x4x256xf32> to vector<4x256xf32>
    %cst = arith.constant 0.000000e+00 : f32
    %2 = vector.broadcast %cst : f32 to vector<1x256xf32>
    %cst_2 = arith.constant 0.000000e+00 : f32
    %3 = vector.broadcast %cst_2 : f32 to vector<1x256xf32>
    %cst_3 = arith.constant 0.000000e+00 : f32
    %4 = vector.broadcast %cst_3 : f32 to vector<1x256xf32>
    %cst_4 = arith.constant 0.000000e+00 : f32
    %5 = vector.broadcast %cst_4 : f32 to vector<1x256xf32>
    %cst_5 = arith.constant 0.000000e+00 : f32
    %6 = vector.broadcast %cst_5 : f32 to vector<4x17xf32>
    %7 = vector.extract_strided_slice %1 {offsets = [0, 0], sizes = [4, 239], strides = [1, 1]} : vector<4x256xf32> to vector<4x239xf32>
    %8 = tpu.concatenate %6, %7 in 1 : vector<4x17xf32>, vector<4x239xf32> -> vector<4x256xf32>
    %c0_6 = arith.constant 0 : index
    %c0_7 = arith.constant 0 : index
    %c0_8 = arith.constant 0 : index
    %9 = vector.load %arg3[%c0_6, %c0_7, %c0_8] : memref<3x1x256xf32, #tpu.memory_space<vmem>>, vector<1x1x256xf32>
    %10 = vector.shape_cast %9 : vector<1x1x256xf32> to vector<1x256xf32>
    %11 = vector.broadcast %10 : vector<1x256xf32> to vector<4x256xf32>
    %12 = arith.mulf %8, %11 : vector<4x256xf32>
    %c0_9 = arith.constant 0 : index
    %13 = memref.load %arg2[%c0_9] : memref<144xf32, #tpu.memory_space<smem>>
    %14 = vector.extract_strided_slice %12 {offsets = [0, 0], sizes = [1, 256], strides = [1, 1]} : vector<4x256xf32> to vector<1x256xf32>
    %15 = vector.broadcast %13 : f32 to vector<1x256xf32>
    %16 = arith.mulf %15, %14 : vector<1x256xf32>
    %17 = arith.addf %2, %16 : vector<1x256xf32>
    %c9 = arith.constant 9 : index
    %18 = memref.load %arg2[%c9] : memref<144xf32, #tpu.memory_space<smem>>
    %19 = vector.extract_strided_slice %12 {offsets = [1, 0], sizes = [1, 256], strides = [1, 1]} : vector<4x256xf32> to vector<1x256xf32>
    %20 = vector.broadcast %18 : f32 to vector<1x256xf32>
    %21 = arith.mulf %20, %19 : vector<1x256xf32>
    %22 = arith.addf %17, %21 : vector<1x256xf32>
    %c18 = arith.constant 18 : index
    %23 = memref.load %arg2[%c18] : memref<144xf32, #tpu.memory_space<smem>>
    %24 = vector.extract_strided_slice %12 {offsets = [2, 0], sizes = [1, 256], strides = [1, 1]} : vector<4x256xf32> to vector<1x256xf32>
    %25 = vector.broadcast %23 : f32 to vector<1x256xf32>
    %26 = arith.mulf %25, %24 : vector<1x256xf32>
    %27 = arith.addf %22, %26 : vector<1x256xf32>
    %c27 = arith.constant 27 : index
    %28 = memref.load %arg2[%c27] : memref<144xf32, #tpu.memory_space<smem>>
    %29 = vector.extract_strided_slice %12 {offsets = [3, 0], sizes = [1, 256], strides = [1, 1]} : vector<4x256xf32> to vector<1x256xf32>
    %30 = vector.broadcast %28 : f32 to vector<1x256xf32>
    %31 = arith.mulf %30, %29 : vector<1x256xf32>
    %32 = arith.addf %27, %31 : vector<1x256xf32>
    %c36 = arith.constant 36 : index
    %33 = memref.load %arg2[%c36] : memref<144xf32, #tpu.memory_space<smem>>
    %34 = vector.extract_strided_slice %12 {offsets = [0, 0], sizes = [1, 256], strides = [1, 1]} : vector<4x256xf32> to vector<1x256xf32>
    %35 = vector.broadcast %33 : f32 to vector<1x256xf32>
    %36 = arith.mulf %35, %34 : vector<1x256xf32>
    %37 = arith.addf %3, %36 : vector<1x256xf32>
    %c45 = arith.constant 45 : index
    %38 = memref.load %arg2[%c45] : memref<144xf32, #tpu.memory_space<smem>>
    %39 = vector.extract_strided_slice %12 {offsets = [1, 0], sizes = [1, 256], strides = [1, 1]} : vector<4x256xf32> to vector<1x256xf32>
    %40 = vector.broadcast %38 : f32 to vector<1x256xf32>
    %41 = arith.mulf %40, %39 : vector<1x256xf32>
    %42 = arith.addf %37, %41 : vector<1x256xf32>
    %c54 = arith.constant 54 : index
    %43 = memref.load %arg2[%c54] : memref<144xf32, #tpu.memory_space<smem>>
    %44 = vector.extract_strided_slice %12 {offsets = [2, 0], sizes = [1, 256], strides = [1, 1]} : vector<4x256xf32> to vector<1x256xf32>
    %45 = vector.broadcast %43 : f32 to vector<1x256xf32>
    %46 = arith.mulf %45, %44 : vector<1x256xf32>
    %47 = arith.addf %42, %46 : vector<1x256xf32>
    %c63 = arith.constant 63 : index
    %48 = memref.load %arg2[%c63] : memref<144xf32, #tpu.memory_space<smem>>
    %49 = vector.extract_strided_slice %12 {offsets = [3, 0], sizes = [1, 256], strides = [1, 1]} : vector<4x256xf32> to vector<1x256xf32>
    %50 = vector.broadcast %48 : f32 to vector<1x256xf32>
    %51 = arith.mulf %50, %49 : vector<1x256xf32>
    %52 = arith.addf %47, %51 : vector<1x256xf32>
    %c72 = arith.constant 72 : index
    %53 = memref.load %arg2[%c72] : memref<144xf32, #tpu.memory_space<smem>>
    %54 = vector.extract_strided_slice %12 {offsets = [0, 0], sizes = [1, 256], strides = [1, 1]} : vector<4x256xf32> to vector<1x256xf32>
    %55 = vector.broadcast %53 : f32 to vector<1x256xf32>
    %56 = arith.mulf %55, %54 : vector<1x256xf32>
    %57 = arith.addf %4, %56 : vector<1x256xf32>
    %c81 = arith.constant 81 : index
    %58 = memref.load %arg2[%c81] : memref<144xf32, #tpu.memory_space<smem>>
    %59 = vector.extract_strided_slice %12 {offsets = [1, 0], sizes = [1, 256], strides = [1, 1]} : vector<4x256xf32> to vector<1x256xf32>
    %60 = vector.broadcast %58 : f32 to vector<1x256xf32>
    %61 = arith.mulf %60, %59 : vector<1x256xf32>
    %62 = arith.addf %57, %61 : vector<1x256xf32>
    %c90 = arith.constant 90 : index
    %63 = memref.load %arg2[%c90] : memref<144xf32, #tpu.memory_space<smem>>
    %64 = vector.extract_strided_slice %12 {offsets = [2, 0], sizes = [1, 256], strides = [1, 1]} : vector<4x256xf32> to vector<1x256xf32>
    %65 = vector.broadcast %63 : f32 to vector<1x256xf32>
    %66 = arith.mulf %65, %64 : vector<1x256xf32>
    %67 = arith.addf %62, %66 : vector<1x256xf32>
    %c99 = arith.constant 99 : index
    %68 = memref.load %arg2[%c99] : memref<144xf32, #tpu.memory_space<smem>>
    %69 = vector.extract_strided_slice %12 {offsets = [3, 0], sizes = [1, 256], strides = [1, 1]} : vector<4x256xf32> to vector<1x256xf32>
    %70 = vector.broadcast %68 : f32 to vector<1x256xf32>
    %71 = arith.mulf %70, %69 : vector<1x256xf32>
    %72 = arith.addf %67, %71 : vector<1x256xf32>
    %c108 = arith.constant 108 : index
    %73 = memref.load %arg2[%c108] : memref<144xf32, #tpu.memory_space<smem>>
    %74 = vector.extract_strided_slice %12 {offsets = [0, 0], sizes = [1, 256], strides = [1, 1]} : vector<4x256xf32> to vector<1x256xf32>
    %75 = vector.broadcast %73 : f32 to vector<1x256xf32>
    %76 = arith.mulf %75, %74 : vector<1x256xf32>
    %77 = arith.addf %5, %76 : vector<1x256xf32>
    %c117 = arith.constant 117 : index
    %78 = memref.load %arg2[%c117] : memref<144xf32, #tpu.memory_space<smem>>
    %79 = vector.extract_strided_slice %12 {offsets = [1, 0], sizes = [1, 256], strides = [1, 1]} : vector<4x256xf32> to vector<1x256xf32>
    %80 = vector.broadcast %78 : f32 to vector<1x256xf32>
    %81 = arith.mulf %80, %79 : vector<1x256xf32>
    %82 = arith.addf %77, %81 : vector<1x256xf32>
    %c126 = arith.constant 126 : index
    %83 = memref.load %arg2[%c126] : memref<144xf32, #tpu.memory_space<smem>>
    %84 = vector.extract_strided_slice %12 {offsets = [2, 0], sizes = [1, 256], strides = [1, 1]} : vector<4x256xf32> to vector<1x256xf32>
    %85 = vector.broadcast %83 : f32 to vector<1x256xf32>
    %86 = arith.mulf %85, %84 : vector<1x256xf32>
    %87 = arith.addf %82, %86 : vector<1x256xf32>
    %c135 = arith.constant 135 : index
    %88 = memref.load %arg2[%c135] : memref<144xf32, #tpu.memory_space<smem>>
    %89 = vector.extract_strided_slice %12 {offsets = [3, 0], sizes = [1, 256], strides = [1, 1]} : vector<4x256xf32> to vector<1x256xf32>
    %90 = vector.broadcast %88 : f32 to vector<1x256xf32>
    %91 = arith.mulf %90, %89 : vector<1x256xf32>
    %92 = arith.addf %87, %91 : vector<1x256xf32>
    %cst_10 = arith.constant 0.000000e+00 : f32
    %93 = vector.broadcast %cst_10 : f32 to vector<4x16xf32>
    %94 = vector.extract_strided_slice %1 {offsets = [0, 0], sizes = [4, 240], strides = [1, 1]} : vector<4x256xf32> to vector<4x240xf32>
    %95 = tpu.concatenate %93, %94 in 1 : vector<4x16xf32>, vector<4x240xf32> -> vector<4x256xf32>
    %c1 = arith.constant 1 : index
    %96 = memref.load %arg2[%c1] : memref<144xf32, #tpu.memory_space<smem>>
    %97 = vector.extract_strided_slice %95 {offsets = [0, 0], sizes = [1, 256], strides = [1, 1]} : vector<4x256xf32> to vector<1x256xf32>
    %98 = vector.broadcast %96 : f32 to vector<1x256xf32>
    %99 = arith.mulf %98, %97 : vector<1x256xf32>
    %100 = arith.addf %32, %99 : vector<1x256xf32>
    %c10 = arith.constant 10 : index
    %101 = memref.load %arg2[%c10] : memref<144xf32, #tpu.memory_space<smem>>
    %102 = vector.extract_strided_slice %95 {offsets = [1, 0], sizes = [1, 256], strides = [1, 1]} : vector<4x256xf32> to vector<1x256xf32>
    %103 = vector.broadcast %101 : f32 to vector<1x256xf32>
    %104 = arith.mulf %103, %102 : vector<1x256xf32>
    %105 = arith.addf %100, %104 : vector<1x256xf32>
    %c19 = arith.constant 19 : index
    %106 = memref.load %arg2[%c19] : memref<144xf32, #tpu.memory_space<smem>>
    %107 = vector.extract_strided_slice %95 {offsets = [2, 0], sizes = [1, 256], strides = [1, 1]} : vector<4x256xf32> to vector<1x256xf32>
    %108 = vector.broadcast %106 : f32 to vector<1x256xf32>
    %109 = arith.mulf %108, %107 : vector<1x256xf32>
    %110 = arith.addf %105, %109 : vector<1x256xf32>
    %c28 = arith.constant 28 : index
    %111 = memref.load %arg2[%c28] : memref<144xf32, #tpu.memory_space<smem>>
    %112 = vector.extract_strided_slice %95 {offsets = [3, 0], sizes = [1, 256], strides = [1, 1]} : vector<4x256xf32> to vector<1x256xf32>
    %113 = vector.broadcast %111 : f32 to vector<1x256xf32>
    %114 = arith.mulf %113, %112 : vector<1x256xf32>
    %115 = arith.addf %110, %114 : vector<1x256xf32>
    %c37 = arith.constant 37 : index
    %116 = memref.load %arg2[%c37] : memref<144xf32, #tpu.memory_space<smem>>
    %117 = vector.extract_strided_slice %95 {offsets = [0, 0], sizes = [1, 256], strides = [1, 1]} : vector<4x256xf32> to vector<1x256xf32>
    %118 = vector.broadcast %116 : f32 to vector<1x256xf32>
    %119 = arith.mulf %118, %117 : vector<1x256xf32>
    %120 = arith.addf %52, %119 : vector<1x256xf32>
    %c46 = arith.constant 46 : index
    %121 = memref.load %arg2[%c46] : memref<144xf32, #tpu.memory_space<smem>>
    %122 = vector.extract_strided_slice %95 {offsets = [1, 0], sizes = [1, 256], strides = [1, 1]} : vector<4x256xf32> to vector<1x256xf32>
    %123 = vector.broadcast %121 : f32 to vector<1x256xf32>
    %124 = arith.mulf %123, %122 : vector<1x256xf32>
    %125 = arith.addf %120, %124 : vector<1x256xf32>
    %c55 = arith.constant 55 : index
    %126 = memref.load %arg2[%c55] : memref<144xf32, #tpu.memory_space<smem>>
    %127 = vector.extract_strided_slice %95 {offsets = [2, 0], sizes = [1, 256], strides = [1, 1]} : vector<4x256xf32> to vector<1x256xf32>
    %128 = vector.broadcast %126 : f32 to vector<1x256xf32>
    %129 = arith.mulf %128, %127 : vector<1x256xf32>
    %130 = arith.addf %125, %129 : vector<1x256xf32>
    %c64 = arith.constant 64 : index
    %131 = memref.load %arg2[%c64] : memref<144xf32, #tpu.memory_space<smem>>
    %132 = vector.extract_strided_slice %95 {offsets = [3, 0], sizes = [1, 256], strides = [1, 1]} : vector<4x256xf32> to vector<1x256xf32>
    %133 = vector.broadcast %131 : f32 to vector<1x256xf32>
    %134 = arith.mulf %133, %132 : vector<1x256xf32>
    %135 = arith.addf %130, %134 : vector<1x256xf32>
    %c73 = arith.constant 73 : index
    %136 = memref.load %arg2[%c73] : memref<144xf32, #tpu.memory_space<smem>>
    %137 = vector.extract_strided_slice %95 {offsets = [0, 0], sizes = [1, 256], strides = [1, 1]} : vector<4x256xf32> to vector<1x256xf32>
    %138 = vector.broadcast %136 : f32 to vector<1x256xf32>
    %139 = arith.mulf %138, %137 : vector<1x256xf32>
    %140 = arith.addf %72, %139 : vector<1x256xf32>
    %c82 = arith.constant 82 : index
    %141 = memref.load %arg2[%c82] : memref<144xf32, #tpu.memory_space<smem>>
    %142 = vector.extract_strided_slice %95 {offsets = [1, 0], sizes = [1, 256], strides = [1, 1]} : vector<4x256xf32> to vector<1x256xf32>
    %143 = vector.broadcast %141 : f32 to vector<1x256xf32>
    %144 = arith.mulf %143, %142 : vector<1x256xf32>
    %145 = arith.addf %140, %144 : vector<1x256xf32>
    %c91 = arith.constant 91 : index
    %146 = memref.load %arg2[%c91] : memref<144xf32, #tpu.memory_space<smem>>
    %147 = vector.extract_strided_slice %95 {offsets = [2, 0], sizes = [1, 256], strides = [1, 1]} : vector<4x256xf32> to vector<1x256xf32>
    %148 = vector.broadcast %146 : f32 to vector<1x256xf32>
    %149 = arith.mulf %148, %147 : vector<1x256xf32>
    %150 = arith.addf %145, %149 : vector<1x256xf32>
    %c100 = arith.constant 100 : index
    %151 = memref.load %arg2[%c100] : memref<144xf32, #tpu.memory_space<smem>>
    %152 = vector.extract_strided_slice %95 {offsets = [3, 0], sizes = [1, 256], strides = [1, 1]} : vector<4x256xf32> to vector<1x256xf32>
    %153 = vector.broadcast %151 : f32 to vector<1x256xf32>
    %154 = arith.mulf %153, %152 : vector<1x256xf32>
    %155 = arith.addf %150, %154 : vector<1x256xf32>
    %c109 = arith.constant 109 : index
    %156 = memref.load %arg2[%c109] : memref<144xf32, #tpu.memory_space<smem>>
    %157 = vector.extract_strided_slice %95 {offsets = [0, 0], sizes = [1, 256], strides = [1, 1]} : vector<4x256xf32> to vector<1x256xf32>
    %158 = vector.broadcast %156 : f32 to vector<1x256xf32>
    %159 = arith.mulf %158, %157 : vector<1x256xf32>
    %160 = arith.addf %92, %159 : vector<1x256xf32>
    %c118 = arith.constant 118 : index
    %161 = memref.load %arg2[%c118] : memref<144xf32, #tpu.memory_space<smem>>
    %162 = vector.extract_strided_slice %95 {offsets = [1, 0], sizes = [1, 256], strides = [1, 1]} : vector<4x256xf32> to vector<1x256xf32>
    %163 = vector.broadcast %161 : f32 to vector<1x256xf32>
    %164 = arith.mulf %163, %162 : vector<1x256xf32>
    %165 = arith.addf %160, %164 : vector<1x256xf32>
    %c127 = arith.constant 127 : index
    %166 = memref.load %arg2[%c127] : memref<144xf32, #tpu.memory_space<smem>>
    %167 = vector.extract_strided_slice %95 {offsets = [2, 0], sizes = [1, 256], strides = [1, 1]} : vector<4x256xf32> to vector<1x256xf32>
    %168 = vector.broadcast %166 : f32 to vector<1x256xf32>
    %169 = arith.mulf %168, %167 : vector<1x256xf32>
    %170 = arith.addf %165, %169 : vector<1x256xf32>
    %c136 = arith.constant 136 : index
    %171 = memref.load %arg2[%c136] : memref<144xf32, #tpu.memory_space<smem>>
    %172 = vector.extract_strided_slice %95 {offsets = [3, 0], sizes = [1, 256], strides = [1, 1]} : vector<4x256xf32> to vector<1x256xf32>
    %173 = vector.broadcast %171 : f32 to vector<1x256xf32>
    %174 = arith.mulf %173, %172 : vector<1x256xf32>
    %175 = arith.addf %170, %174 : vector<1x256xf32>
    %cst_11 = arith.constant 0.000000e+00 : f32
    %176 = vector.broadcast %cst_11 : f32 to vector<4x15xf32>
    %177 = vector.extract_strided_slice %1 {offsets = [0, 0], sizes = [4, 241], strides = [1, 1]} : vector<4x256xf32> to vector<4x241xf32>
    %178 = tpu.concatenate %176, %177 in 1 : vector<4x15xf32>, vector<4x241xf32> -> vector<4x256xf32>
    %c2 = arith.constant 2 : index
    %c0_12 = arith.constant 0 : index
    %c0_13 = arith.constant 0 : index
    %179 = vector.load %arg3[%c2, %c0_12, %c0_13] : memref<3x1x256xf32, #tpu.memory_space<vmem>>, vector<1x1x256xf32>
    %180 = vector.shape_cast %179 : vector<1x1x256xf32> to vector<1x256xf32>
    %181 = vector.broadcast %180 : vector<1x256xf32> to vector<4x256xf32>
    %182 = arith.mulf %178, %181 : vector<4x256xf32>
    %c2_14 = arith.constant 2 : index
    %183 = memref.load %arg2[%c2_14] : memref<144xf32, #tpu.memory_space<smem>>
    %184 = vector.extract_strided_slice %182 {offsets = [0, 0], sizes = [1, 256], strides = [1, 1]} : vector<4x256xf32> to vector<1x256xf32>
    %185 = vector.broadcast %183 : f32 to vector<1x256xf32>
    %186 = arith.mulf %185, %184 : vector<1x256xf32>
    %187 = arith.addf %115, %186 : vector<1x256xf32>
    %c11 = arith.constant 11 : index
    %188 = memref.load %arg2[%c11] : memref<144xf32, #tpu.memory_space<smem>>
    %189 = vector.extract_strided_slice %182 {offsets = [1, 0], sizes = [1, 256], strides = [1, 1]} : vector<4x256xf32> to vector<1x256xf32>
    %190 = vector.broadcast %188 : f32 to vector<1x256xf32>
    %191 = arith.mulf %190, %189 : vector<1x256xf32>
    %192 = arith.addf %187, %191 : vector<1x256xf32>
    %c20 = arith.constant 20 : index
    %193 = memref.load %arg2[%c20] : memref<144xf32, #tpu.memory_space<smem>>
    %194 = vector.extract_strided_slice %182 {offsets = [2, 0], sizes = [1, 256], strides = [1, 1]} : vector<4x256xf32> to vector<1x256xf32>
    %195 = vector.broadcast %193 : f32 to vector<1x256xf32>
    %196 = arith.mulf %195, %194 : vector<1x256xf32>
    %197 = arith.addf %192, %196 : vector<1x256xf32>
    %c29 = arith.constant 29 : index
    %198 = memref.load %arg2[%c29] : memref<144xf32, #tpu.memory_space<smem>>
    %199 = vector.extract_strided_slice %182 {offsets = [3, 0], sizes = [1, 256], strides = [1, 1]} : vector<4x256xf32> to vector<1x256xf32>
    %200 = vector.broadcast %198 : f32 to vector<1x256xf32>
    %201 = arith.mulf %200, %199 : vector<1x256xf32>
    %202 = arith.addf %197, %201 : vector<1x256xf32>
    %c38 = arith.constant 38 : index
    %203 = memref.load %arg2[%c38] : memref<144xf32, #tpu.memory_space<smem>>
    %204 = vector.extract_strided_slice %182 {offsets = [0, 0], sizes = [1, 256], strides = [1, 1]} : vector<4x256xf32> to vector<1x256xf32>
    %205 = vector.broadcast %203 : f32 to vector<1x256xf32>
    %206 = arith.mulf %205, %204 : vector<1x256xf32>
    %207 = arith.addf %135, %206 : vector<1x256xf32>
    %c47 = arith.constant 47 : index
    %208 = memref.load %arg2[%c47] : memref<144xf32, #tpu.memory_space<smem>>
    %209 = vector.extract_strided_slice %182 {offsets = [1, 0], sizes = [1, 256], strides = [1, 1]} : vector<4x256xf32> to vector<1x256xf32>
    %210 = vector.broadcast %208 : f32 to vector<1x256xf32>
    %211 = arith.mulf %210, %209 : vector<1x256xf32>
    %212 = arith.addf %207, %211 : vector<1x256xf32>
    %c56 = arith.constant 56 : index
    %213 = memref.load %arg2[%c56] : memref<144xf32, #tpu.memory_space<smem>>
    %214 = vector.extract_strided_slice %182 {offsets = [2, 0], sizes = [1, 256], strides = [1, 1]} : vector<4x256xf32> to vector<1x256xf32>
    %215 = vector.broadcast %213 : f32 to vector<1x256xf32>
    %216 = arith.mulf %215, %214 : vector<1x256xf32>
    %217 = arith.addf %212, %216 : vector<1x256xf32>
    %c65 = arith.constant 65 : index
    %218 = memref.load %arg2[%c65] : memref<144xf32, #tpu.memory_space<smem>>
    %219 = vector.extract_strided_slice %182 {offsets = [3, 0], sizes = [1, 256], strides = [1, 1]} : vector<4x256xf32> to vector<1x256xf32>
    %220 = vector.broadcast %218 : f32 to vector<1x256xf32>
    %221 = arith.mulf %220, %219 : vector<1x256xf32>
    %222 = arith.addf %217, %221 : vector<1x256xf32>
    %c74 = arith.constant 74 : index
    %223 = memref.load %arg2[%c74] : memref<144xf32, #tpu.memory_space<smem>>
    %224 = vector.extract_strided_slice %182 {offsets = [0, 0], sizes = [1, 256], strides = [1, 1]} : vector<4x256xf32> to vector<1x256xf32>
    %225 = vector.broadcast %223 : f32 to vector<1x256xf32>
    %226 = arith.mulf %225, %224 : vector<1x256xf32>
    %227 = arith.addf %155, %226 : vector<1x256xf32>
    %c83 = arith.constant 83 : index
    %228 = memref.load %arg2[%c83] : memref<144xf32, #tpu.memory_space<smem>>
    %229 = vector.extract_strided_slice %182 {offsets = [1, 0], sizes = [1, 256], strides = [1, 1]} : vector<4x256xf32> to vector<1x256xf32>
    %230 = vector.broadcast %228 : f32 to vector<1x256xf32>
    %231 = arith.mulf %230, %229 : vector<1x256xf32>
    %232 = arith.addf %227, %231 : vector<1x256xf32>
    %c92 = arith.constant 92 : index
    %233 = memref.load %arg2[%c92] : memref<144xf32, #tpu.memory_space<smem>>
    %234 = vector.extract_strided_slice %182 {offsets = [2, 0], sizes = [1, 256], strides = [1, 1]} : vector<4x256xf32> to vector<1x256xf32>
    %235 = vector.broadcast %233 : f32 to vector<1x256xf32>
    %236 = arith.mulf %235, %234 : vector<1x256xf32>
    %237 = arith.addf %232, %236 : vector<1x256xf32>
    %c101 = arith.constant 101 : index
    %238 = memref.load %arg2[%c101] : memref<144xf32, #tpu.memory_space<smem>>
    %239 = vector.extract_strided_slice %182 {offsets = [3, 0], sizes = [1, 256], strides = [1, 1]} : vector<4x256xf32> to vector<1x256xf32>
    %240 = vector.broadcast %238 : f32 to vector<1x256xf32>
    %241 = arith.mulf %240, %239 : vector<1x256xf32>
    %242 = arith.addf %237, %241 : vector<1x256xf32>
    %c110 = arith.constant 110 : index
    %243 = memref.load %arg2[%c110] : memref<144xf32, #tpu.memory_space<smem>>
    %244 = vector.extract_strided_slice %182 {offsets = [0, 0], sizes = [1, 256], strides = [1, 1]} : vector<4x256xf32> to vector<1x256xf32>
    %245 = vector.broadcast %243 : f32 to vector<1x256xf32>
    %246 = arith.mulf %245, %244 : vector<1x256xf32>
    %247 = arith.addf %175, %246 : vector<1x256xf32>
    %c119 = arith.constant 119 : index
    %248 = memref.load %arg2[%c119] : memref<144xf32, #tpu.memory_space<smem>>
    %249 = vector.extract_strided_slice %182 {offsets = [1, 0], sizes = [1, 256], strides = [1, 1]} : vector<4x256xf32> to vector<1x256xf32>
    %250 = vector.broadcast %248 : f32 to vector<1x256xf32>
    %251 = arith.mulf %250, %249 : vector<1x256xf32>
    %252 = arith.addf %247, %251 : vector<1x256xf32>
    %c128 = arith.constant 128 : index
    %253 = memref.load %arg2[%c128] : memref<144xf32, #tpu.memory_space<smem>>
    %254 = vector.extract_strided_slice %182 {offsets = [2, 0], sizes = [1, 256], strides = [1, 1]} : vector<4x256xf32> to vector<1x256xf32>
    %255 = vector.broadcast %253 : f32 to vector<1x256xf32>
    %256 = arith.mulf %255, %254 : vector<1x256xf32>
    %257 = arith.addf %252, %256 : vector<1x256xf32>
    %c137 = arith.constant 137 : index
    %258 = memref.load %arg2[%c137] : memref<144xf32, #tpu.memory_space<smem>>
    %259 = vector.extract_strided_slice %182 {offsets = [3, 0], sizes = [1, 256], strides = [1, 1]} : vector<4x256xf32> to vector<1x256xf32>
    %260 = vector.broadcast %258 : f32 to vector<1x256xf32>
    %261 = arith.mulf %260, %259 : vector<1x256xf32>
    %262 = arith.addf %257, %261 : vector<1x256xf32>
    %cst_15 = arith.constant 0.000000e+00 : f32
    %263 = vector.broadcast %cst_15 : f32 to vector<4x1xf32>
    %264 = vector.extract_strided_slice %1 {offsets = [0, 0], sizes = [4, 255], strides = [1, 1]} : vector<4x256xf32> to vector<4x255xf32>
    %265 = tpu.concatenate %263, %264 in 1 : vector<4x1xf32>, vector<4x255xf32> -> vector<4x256xf32>
    %c0_16 = arith.constant 0 : index
    %c0_17 = arith.constant 0 : index
    %c0_18 = arith.constant 0 : index
    %266 = vector.load %arg3[%c0_16, %c0_17, %c0_18] : memref<3x1x256xf32, #tpu.memory_space<vmem>>, vector<1x1x256xf32>
    %267 = vector.shape_cast %266 : vector<1x1x256xf32> to vector<1x256xf32>
    %268 = vector.broadcast %267 : vector<1x256xf32> to vector<4x256xf32>
    %269 = arith.mulf %265, %268 : vector<4x256xf32>
    %c3 = arith.constant 3 : index
    %270 = memref.load %arg2[%c3] : memref<144xf32, #tpu.memory_space<smem>>
    %271 = vector.extract_strided_slice %269 {offsets = [0, 0], sizes = [1, 256], strides = [1, 1]} : vector<4x256xf32> to vector<1x256xf32>
    %272 = vector.broadcast %270 : f32 to vector<1x256xf32>
    %273 = arith.mulf %272, %271 : vector<1x256xf32>
    %274 = arith.addf %202, %273 : vector<1x256xf32>
    %c12 = arith.constant 12 : index
    %275 = memref.load %arg2[%c12] : memref<144xf32, #tpu.memory_space<smem>>
    %276 = vector.extract_strided_slice %269 {offsets = [1, 0], sizes = [1, 256], strides = [1, 1]} : vector<4x256xf32> to vector<1x256xf32>
    %277 = vector.broadcast %275 : f32 to vector<1x256xf32>
    %278 = arith.mulf %277, %276 : vector<1x256xf32>
    %279 = arith.addf %274, %278 : vector<1x256xf32>
    %c21 = arith.constant 21 : index
    %280 = memref.load %arg2[%c21] : memref<144xf32, #tpu.memory_space<smem>>
    %281 = vector.extract_strided_slice %269 {offsets = [2, 0], sizes = [1, 256], strides = [1, 1]} : vector<4x256xf32> to vector<1x256xf32>
    %282 = vector.broadcast %280 : f32 to vector<1x256xf32>
    %283 = arith.mulf %282, %281 : vector<1x256xf32>
    %284 = arith.addf %279, %283 : vector<1x256xf32>
    %c30 = arith.constant 30 : index
    %285 = memref.load %arg2[%c30] : memref<144xf32, #tpu.memory_space<smem>>
    %286 = vector.extract_strided_slice %269 {offsets = [3, 0], sizes = [1, 256], strides = [1, 1]} : vector<4x256xf32> to vector<1x256xf32>
    %287 = vector.broadcast %285 : f32 to vector<1x256xf32>
    %288 = arith.mulf %287, %286 : vector<1x256xf32>
    %289 = arith.addf %284, %288 : vector<1x256xf32>
    %c39 = arith.constant 39 : index
    %290 = memref.load %arg2[%c39] : memref<144xf32, #tpu.memory_space<smem>>
    %291 = vector.extract_strided_slice %269 {offsets = [0, 0], sizes = [1, 256], strides = [1, 1]} : vector<4x256xf32> to vector<1x256xf32>
    %292 = vector.broadcast %290 : f32 to vector<1x256xf32>
    %293 = arith.mulf %292, %291 : vector<1x256xf32>
    %294 = arith.addf %222, %293 : vector<1x256xf32>
    %c48 = arith.constant 48 : index
    %295 = memref.load %arg2[%c48] : memref<144xf32, #tpu.memory_space<smem>>
    %296 = vector.extract_strided_slice %269 {offsets = [1, 0], sizes = [1, 256], strides = [1, 1]} : vector<4x256xf32> to vector<1x256xf32>
    %297 = vector.broadcast %295 : f32 to vector<1x256xf32>
    %298 = arith.mulf %297, %296 : vector<1x256xf32>
    %299 = arith.addf %294, %298 : vector<1x256xf32>
    %c57 = arith.constant 57 : index
    %300 = memref.load %arg2[%c57] : memref<144xf32, #tpu.memory_space<smem>>
    %301 = vector.extract_strided_slice %269 {offsets = [2, 0], sizes = [1, 256], strides = [1, 1]} : vector<4x256xf32> to vector<1x256xf32>
    %302 = vector.broadcast %300 : f32 to vector<1x256xf32>
    %303 = arith.mulf %302, %301 : vector<1x256xf32>
    %304 = arith.addf %299, %303 : vector<1x256xf32>
    %c66 = arith.constant 66 : index
    %305 = memref.load %arg2[%c66] : memref<144xf32, #tpu.memory_space<smem>>
    %306 = vector.extract_strided_slice %269 {offsets = [3, 0], sizes = [1, 256], strides = [1, 1]} : vector<4x256xf32> to vector<1x256xf32>
    %307 = vector.broadcast %305 : f32 to vector<1x256xf32>
    %308 = arith.mulf %307, %306 : vector<1x256xf32>
    %309 = arith.addf %304, %308 : vector<1x256xf32>
    %c75 = arith.constant 75 : index
    %310 = memref.load %arg2[%c75] : memref<144xf32, #tpu.memory_space<smem>>
    %311 = vector.extract_strided_slice %269 {offsets = [0, 0], sizes = [1, 256], strides = [1, 1]} : vector<4x256xf32> to vector<1x256xf32>
    %312 = vector.broadcast %310 : f32 to vector<1x256xf32>
    %313 = arith.mulf %312, %311 : vector<1x256xf32>
    %314 = arith.addf %242, %313 : vector<1x256xf32>
    %c84 = arith.constant 84 : index
    %315 = memref.load %arg2[%c84] : memref<144xf32, #tpu.memory_space<smem>>
    %316 = vector.extract_strided_slice %269 {offsets = [1, 0], sizes = [1, 256], strides = [1, 1]} : vector<4x256xf32> to vector<1x256xf32>
    %317 = vector.broadcast %315 : f32 to vector<1x256xf32>
    %318 = arith.mulf %317, %316 : vector<1x256xf32>
    %319 = arith.addf %314, %318 : vector<1x256xf32>
    %c93 = arith.constant 93 : index
    %320 = memref.load %arg2[%c93] : memref<144xf32, #tpu.memory_space<smem>>
    %321 = vector.extract_strided_slice %269 {offsets = [2, 0], sizes = [1, 256], strides = [1, 1]} : vector<4x256xf32> to vector<1x256xf32>
    %322 = vector.broadcast %320 : f32 to vector<1x256xf32>
    %323 = arith.mulf %322, %321 : vector<1x256xf32>
    %324 = arith.addf %319, %323 : vector<1x256xf32>
    %c102 = arith.constant 102 : index
    %325 = memref.load %arg2[%c102] : memref<144xf32, #tpu.memory_space<smem>>
    %326 = vector.extract_strided_slice %269 {offsets = [3, 0], sizes = [1, 256], strides = [1, 1]} : vector<4x256xf32> to vector<1x256xf32>
    %327 = vector.broadcast %325 : f32 to vector<1x256xf32>
    %328 = arith.mulf %327, %326 : vector<1x256xf32>
    %329 = arith.addf %324, %328 : vector<1x256xf32>
    %c111 = arith.constant 111 : index
    %330 = memref.load %arg2[%c111] : memref<144xf32, #tpu.memory_space<smem>>
    %331 = vector.extract_strided_slice %269 {offsets = [0, 0], sizes = [1, 256], strides = [1, 1]} : vector<4x256xf32> to vector<1x256xf32>
    %332 = vector.broadcast %330 : f32 to vector<1x256xf32>
    %333 = arith.mulf %332, %331 : vector<1x256xf32>
    %334 = arith.addf %262, %333 : vector<1x256xf32>
    %c120 = arith.constant 120 : index
    %335 = memref.load %arg2[%c120] : memref<144xf32, #tpu.memory_space<smem>>
    %336 = vector.extract_strided_slice %269 {offsets = [1, 0], sizes = [1, 256], strides = [1, 1]} : vector<4x256xf32> to vector<1x256xf32>
    %337 = vector.broadcast %335 : f32 to vector<1x256xf32>
    %338 = arith.mulf %337, %336 : vector<1x256xf32>
    %339 = arith.addf %334, %338 : vector<1x256xf32>
    %c129 = arith.constant 129 : index
    %340 = memref.load %arg2[%c129] : memref<144xf32, #tpu.memory_space<smem>>
    %341 = vector.extract_strided_slice %269 {offsets = [2, 0], sizes = [1, 256], strides = [1, 1]} : vector<4x256xf32> to vector<1x256xf32>
    %342 = vector.broadcast %340 : f32 to vector<1x256xf32>
    %343 = arith.mulf %342, %341 : vector<1x256xf32>
    %344 = arith.addf %339, %343 : vector<1x256xf32>
    %c138 = arith.constant 138 : index
    %345 = memref.load %arg2[%c138] : memref<144xf32, #tpu.memory_space<smem>>
    %346 = vector.extract_strided_slice %269 {offsets = [3, 0], sizes = [1, 256], strides = [1, 1]} : vector<4x256xf32> to vector<1x256xf32>
    %347 = vector.broadcast %345 : f32 to vector<1x256xf32>
    %348 = arith.mulf %347, %346 : vector<1x256xf32>
    %349 = arith.addf %344, %348 : vector<1x256xf32>
    %c4 = arith.constant 4 : index
    %350 = memref.load %arg2[%c4] : memref<144xf32, #tpu.memory_space<smem>>
    %351 = vector.extract_strided_slice %1 {offsets = [0, 0], sizes = [1, 256], strides = [1, 1]} : vector<4x256xf32> to vector<1x256xf32>
    %352 = vector.broadcast %350 : f32 to vector<1x256xf32>
    %353 = arith.mulf %352, %351 : vector<1x256xf32>
    %354 = arith.addf %289, %353 : vector<1x256xf32>
    %c13 = arith.constant 13 : index
    %355 = memref.load %arg2[%c13] : memref<144xf32, #tpu.memory_space<smem>>
    %356 = vector.extract_strided_slice %1 {offsets = [1, 0], sizes = [1, 256], strides = [1, 1]} : vector<4x256xf32> to vector<1x256xf32>
    %357 = vector.broadcast %355 : f32 to vector<1x256xf32>
    %358 = arith.mulf %357, %356 : vector<1x256xf32>
    %359 = arith.addf %354, %358 : vector<1x256xf32>
    %c22 = arith.constant 22 : index
    %360 = memref.load %arg2[%c22] : memref<144xf32, #tpu.memory_space<smem>>
    %361 = vector.extract_strided_slice %1 {offsets = [2, 0], sizes = [1, 256], strides = [1, 1]} : vector<4x256xf32> to vector<1x256xf32>
    %362 = vector.broadcast %360 : f32 to vector<1x256xf32>
    %363 = arith.mulf %362, %361 : vector<1x256xf32>
    %364 = arith.addf %359, %363 : vector<1x256xf32>
    %c31 = arith.constant 31 : index
    %365 = memref.load %arg2[%c31] : memref<144xf32, #tpu.memory_space<smem>>
    %366 = vector.extract_strided_slice %1 {offsets = [3, 0], sizes = [1, 256], strides = [1, 1]} : vector<4x256xf32> to vector<1x256xf32>
    %367 = vector.broadcast %365 : f32 to vector<1x256xf32>
    %368 = arith.mulf %367, %366 : vector<1x256xf32>
    %369 = arith.addf %364, %368 : vector<1x256xf32>
    %c40 = arith.constant 40 : index
    %370 = memref.load %arg2[%c40] : memref<144xf32, #tpu.memory_space<smem>>
    %371 = vector.extract_strided_slice %1 {offsets = [0, 0], sizes = [1, 256], strides = [1, 1]} : vector<4x256xf32> to vector<1x256xf32>
    %372 = vector.broadcast %370 : f32 to vector<1x256xf32>
    %373 = arith.mulf %372, %371 : vector<1x256xf32>
    %374 = arith.addf %309, %373 : vector<1x256xf32>
    %c49 = arith.constant 49 : index
    %375 = memref.load %arg2[%c49] : memref<144xf32, #tpu.memory_space<smem>>
    %376 = vector.extract_strided_slice %1 {offsets = [1, 0], sizes = [1, 256], strides = [1, 1]} : vector<4x256xf32> to vector<1x256xf32>
    %377 = vector.broadcast %375 : f32 to vector<1x256xf32>
    %378 = arith.mulf %377, %376 : vector<1x256xf32>
    %379 = arith.addf %374, %378 : vector<1x256xf32>
    %c58 = arith.constant 58 : index
    %380 = memref.load %arg2[%c58] : memref<144xf32, #tpu.memory_space<smem>>
    %381 = vector.extract_strided_slice %1 {offsets = [2, 0], sizes = [1, 256], strides = [1, 1]} : vector<4x256xf32> to vector<1x256xf32>
    %382 = vector.broadcast %380 : f32 to vector<1x256xf32>
    %383 = arith.mulf %382, %381 : vector<1x256xf32>
    %384 = arith.addf %379, %383 : vector<1x256xf32>
    %c67 = arith.constant 67 : index
    %385 = memref.load %arg2[%c67] : memref<144xf32, #tpu.memory_space<smem>>
    %386 = vector.extract_strided_slice %1 {offsets = [3, 0], sizes = [1, 256], strides = [1, 1]} : vector<4x256xf32> to vector<1x256xf32>
    %387 = vector.broadcast %385 : f32 to vector<1x256xf32>
    %388 = arith.mulf %387, %386 : vector<1x256xf32>
    %389 = arith.addf %384, %388 : vector<1x256xf32>
    %c76 = arith.constant 76 : index
    %390 = memref.load %arg2[%c76] : memref<144xf32, #tpu.memory_space<smem>>
    %391 = vector.extract_strided_slice %1 {offsets = [0, 0], sizes = [1, 256], strides = [1, 1]} : vector<4x256xf32> to vector<1x256xf32>
    %392 = vector.broadcast %390 : f32 to vector<1x256xf32>
    %393 = arith.mulf %392, %391 : vector<1x256xf32>
    %394 = arith.addf %329, %393 : vector<1x256xf32>
    %c85 = arith.constant 85 : index
    %395 = memref.load %arg2[%c85] : memref<144xf32, #tpu.memory_space<smem>>
    %396 = vector.extract_strided_slice %1 {offsets = [1, 0], sizes = [1, 256], strides = [1, 1]} : vector<4x256xf32> to vector<1x256xf32>
    %397 = vector.broadcast %395 : f32 to vector<1x256xf32>
    %398 = arith.mulf %397, %396 : vector<1x256xf32>
    %399 = arith.addf %394, %398 : vector<1x256xf32>
    %c94 = arith.constant 94 : index
    %400 = memref.load %arg2[%c94] : memref<144xf32, #tpu.memory_space<smem>>
    %401 = vector.extract_strided_slice %1 {offsets = [2, 0], sizes = [1, 256], strides = [1, 1]} : vector<4x256xf32> to vector<1x256xf32>
    %402 = vector.broadcast %400 : f32 to vector<1x256xf32>
    %403 = arith.mulf %402, %401 : vector<1x256xf32>
    %404 = arith.addf %399, %403 : vector<1x256xf32>
    %c103 = arith.constant 103 : index
    %405 = memref.load %arg2[%c103] : memref<144xf32, #tpu.memory_space<smem>>
    %406 = vector.extract_strided_slice %1 {offsets = [3, 0], sizes = [1, 256], strides = [1, 1]} : vector<4x256xf32> to vector<1x256xf32>
    %407 = vector.broadcast %405 : f32 to vector<1x256xf32>
    %408 = arith.mulf %407, %406 : vector<1x256xf32>
    %409 = arith.addf %404, %408 : vector<1x256xf32>
    %c112 = arith.constant 112 : index
    %410 = memref.load %arg2[%c112] : memref<144xf32, #tpu.memory_space<smem>>
    %411 = vector.extract_strided_slice %1 {offsets = [0, 0], sizes = [1, 256], strides = [1, 1]} : vector<4x256xf32> to vector<1x256xf32>
    %412 = vector.broadcast %410 : f32 to vector<1x256xf32>
    %413 = arith.mulf %412, %411 : vector<1x256xf32>
    %414 = arith.addf %349, %413 : vector<1x256xf32>
    %c121 = arith.constant 121 : index
    %415 = memref.load %arg2[%c121] : memref<144xf32, #tpu.memory_space<smem>>
    %416 = vector.extract_strided_slice %1 {offsets = [1, 0], sizes = [1, 256], strides = [1, 1]} : vector<4x256xf32> to vector<1x256xf32>
    %417 = vector.broadcast %415 : f32 to vector<1x256xf32>
    %418 = arith.mulf %417, %416 : vector<1x256xf32>
    %419 = arith.addf %414, %418 : vector<1x256xf32>
    %c130 = arith.constant 130 : index
    %420 = memref.load %arg2[%c130] : memref<144xf32, #tpu.memory_space<smem>>
    %421 = vector.extract_strided_slice %1 {offsets = [2, 0], sizes = [1, 256], strides = [1, 1]} : vector<4x256xf32> to vector<1x256xf32>
    %422 = vector.broadcast %420 : f32 to vector<1x256xf32>
    %423 = arith.mulf %422, %421 : vector<1x256xf32>
    %424 = arith.addf %419, %423 : vector<1x256xf32>
    %c139 = arith.constant 139 : index
    %425 = memref.load %arg2[%c139] : memref<144xf32, #tpu.memory_space<smem>>
    %426 = vector.extract_strided_slice %1 {offsets = [3, 0], sizes = [1, 256], strides = [1, 1]} : vector<4x256xf32> to vector<1x256xf32>
    %427 = vector.broadcast %425 : f32 to vector<1x256xf32>
    %428 = arith.mulf %427, %426 : vector<1x256xf32>
    %429 = arith.addf %424, %428 : vector<1x256xf32>
    %430 = vector.extract_strided_slice %1 {offsets = [0, 1], sizes = [4, 255], strides = [1, 1]} : vector<4x256xf32> to vector<4x255xf32>
    %cst_19 = arith.constant 0.000000e+00 : f32
    %431 = vector.broadcast %cst_19 : f32 to vector<4x1xf32>
    %432 = tpu.concatenate %430, %431 in 1 : vector<4x255xf32>, vector<4x1xf32> -> vector<4x256xf32>
    %c2_20 = arith.constant 2 : index
    %c0_21 = arith.constant 0 : index
    %c0_22 = arith.constant 0 : index
    %433 = vector.load %arg3[%c2_20, %c0_21, %c0_22] : memref<3x1x256xf32, #tpu.memory_space<vmem>>, vector<1x1x256xf32>
    %434 = vector.shape_cast %433 : vector<1x1x256xf32> to vector<1x256xf32>
    %435 = vector.broadcast %434 : vector<1x256xf32> to vector<4x256xf32>
    %436 = arith.mulf %432, %435 : vector<4x256xf32>
    %c5 = arith.constant 5 : index
    %437 = memref.load %arg2[%c5] : memref<144xf32, #tpu.memory_space<smem>>
    %438 = vector.extract_strided_slice %436 {offsets = [0, 0], sizes = [1, 256], strides = [1, 1]} : vector<4x256xf32> to vector<1x256xf32>
    %439 = vector.broadcast %437 : f32 to vector<1x256xf32>
    %440 = arith.mulf %439, %438 : vector<1x256xf32>
    %441 = arith.addf %369, %440 : vector<1x256xf32>
    %c14 = arith.constant 14 : index
    %442 = memref.load %arg2[%c14] : memref<144xf32, #tpu.memory_space<smem>>
    %443 = vector.extract_strided_slice %436 {offsets = [1, 0], sizes = [1, 256], strides = [1, 1]} : vector<4x256xf32> to vector<1x256xf32>
    %444 = vector.broadcast %442 : f32 to vector<1x256xf32>
    %445 = arith.mulf %444, %443 : vector<1x256xf32>
    %446 = arith.addf %441, %445 : vector<1x256xf32>
    %c23 = arith.constant 23 : index
    %447 = memref.load %arg2[%c23] : memref<144xf32, #tpu.memory_space<smem>>
    %448 = vector.extract_strided_slice %436 {offsets = [2, 0], sizes = [1, 256], strides = [1, 1]} : vector<4x256xf32> to vector<1x256xf32>
    %449 = vector.broadcast %447 : f32 to vector<1x256xf32>
    %450 = arith.mulf %449, %448 : vector<1x256xf32>
    %451 = arith.addf %446, %450 : vector<1x256xf32>
    %c32 = arith.constant 32 : index
    %452 = memref.load %arg2[%c32] : memref<144xf32, #tpu.memory_space<smem>>
    %453 = vector.extract_strided_slice %436 {offsets = [3, 0], sizes = [1, 256], strides = [1, 1]} : vector<4x256xf32> to vector<1x256xf32>
    %454 = vector.broadcast %452 : f32 to vector<1x256xf32>
    %455 = arith.mulf %454, %453 : vector<1x256xf32>
    %456 = arith.addf %451, %455 : vector<1x256xf32>
    %c41 = arith.constant 41 : index
    %457 = memref.load %arg2[%c41] : memref<144xf32, #tpu.memory_space<smem>>
    %458 = vector.extract_strided_slice %436 {offsets = [0, 0], sizes = [1, 256], strides = [1, 1]} : vector<4x256xf32> to vector<1x256xf32>
    %459 = vector.broadcast %457 : f32 to vector<1x256xf32>
    %460 = arith.mulf %459, %458 : vector<1x256xf32>
    %461 = arith.addf %389, %460 : vector<1x256xf32>
    %c50 = arith.constant 50 : index
    %462 = memref.load %arg2[%c50] : memref<144xf32, #tpu.memory_space<smem>>
    %463 = vector.extract_strided_slice %436 {offsets = [1, 0], sizes = [1, 256], strides = [1, 1]} : vector<4x256xf32> to vector<1x256xf32>
    %464 = vector.broadcast %462 : f32 to vector<1x256xf32>
    %465 = arith.mulf %464, %463 : vector<1x256xf32>
    %466 = arith.addf %461, %465 : vector<1x256xf32>
    %c59 = arith.constant 59 : index
    %467 = memref.load %arg2[%c59] : memref<144xf32, #tpu.memory_space<smem>>
    %468 = vector.extract_strided_slice %436 {offsets = [2, 0], sizes = [1, 256], strides = [1, 1]} : vector<4x256xf32> to vector<1x256xf32>
    %469 = vector.broadcast %467 : f32 to vector<1x256xf32>
    %470 = arith.mulf %469, %468 : vector<1x256xf32>
    %471 = arith.addf %466, %470 : vector<1x256xf32>
    %c68 = arith.constant 68 : index
    %472 = memref.load %arg2[%c68] : memref<144xf32, #tpu.memory_space<smem>>
    %473 = vector.extract_strided_slice %436 {offsets = [3, 0], sizes = [1, 256], strides = [1, 1]} : vector<4x256xf32> to vector<1x256xf32>
    %474 = vector.broadcast %472 : f32 to vector<1x256xf32>
    %475 = arith.mulf %474, %473 : vector<1x256xf32>
    %476 = arith.addf %471, %475 : vector<1x256xf32>
    %c77 = arith.constant 77 : index
    %477 = memref.load %arg2[%c77] : memref<144xf32, #tpu.memory_space<smem>>
    %478 = vector.extract_strided_slice %436 {offsets = [0, 0], sizes = [1, 256], strides = [1, 1]} : vector<4x256xf32> to vector<1x256xf32>
    %479 = vector.broadcast %477 : f32 to vector<1x256xf32>
    %480 = arith.mulf %479, %478 : vector<1x256xf32>
    %481 = arith.addf %409, %480 : vector<1x256xf32>
    %c86 = arith.constant 86 : index
    %482 = memref.load %arg2[%c86] : memref<144xf32, #tpu.memory_space<smem>>
    %483 = vector.extract_strided_slice %436 {offsets = [1, 0], sizes = [1, 256], strides = [1, 1]} : vector<4x256xf32> to vector<1x256xf32>
    %484 = vector.broadcast %482 : f32 to vector<1x256xf32>
    %485 = arith.mulf %484, %483 : vector<1x256xf32>
    %486 = arith.addf %481, %485 : vector<1x256xf32>
    %c95 = arith.constant 95 : index
    %487 = memref.load %arg2[%c95] : memref<144xf32, #tpu.memory_space<smem>>
    %488 = vector.extract_strided_slice %436 {offsets = [2, 0], sizes = [1, 256], strides = [1, 1]} : vector<4x256xf32> to vector<1x256xf32>
    %489 = vector.broadcast %487 : f32 to vector<1x256xf32>
    %490 = arith.mulf %489, %488 : vector<1x256xf32>
    %491 = arith.addf %486, %490 : vector<1x256xf32>
    %c104 = arith.constant 104 : index
    %492 = memref.load %arg2[%c104] : memref<144xf32, #tpu.memory_space<smem>>
    %493 = vector.extract_strided_slice %436 {offsets = [3, 0], sizes = [1, 256], strides = [1, 1]} : vector<4x256xf32> to vector<1x256xf32>
    %494 = vector.broadcast %492 : f32 to vector<1x256xf32>
    %495 = arith.mulf %494, %493 : vector<1x256xf32>
    %496 = arith.addf %491, %495 : vector<1x256xf32>
    %c113 = arith.constant 113 : index
    %497 = memref.load %arg2[%c113] : memref<144xf32, #tpu.memory_space<smem>>
    %498 = vector.extract_strided_slice %436 {offsets = [0, 0], sizes = [1, 256], strides = [1, 1]} : vector<4x256xf32> to vector<1x256xf32>
    %499 = vector.broadcast %497 : f32 to vector<1x256xf32>
    %500 = arith.mulf %499, %498 : vector<1x256xf32>
    %501 = arith.addf %429, %500 : vector<1x256xf32>
    %c122 = arith.constant 122 : index
    %502 = memref.load %arg2[%c122] : memref<144xf32, #tpu.memory_space<smem>>
    %503 = vector.extract_strided_slice %436 {offsets = [1, 0], sizes = [1, 256], strides = [1, 1]} : vector<4x256xf32> to vector<1x256xf32>
    %504 = vector.broadcast %502 : f32 to vector<1x256xf32>
    %505 = arith.mulf %504, %503 : vector<1x256xf32>
    %506 = arith.addf %501, %505 : vector<1x256xf32>
    %c131 = arith.constant 131 : index
    %507 = memref.load %arg2[%c131] : memref<144xf32, #tpu.memory_space<smem>>
    %508 = vector.extract_strided_slice %436 {offsets = [2, 0], sizes = [1, 256], strides = [1, 1]} : vector<4x256xf32> to vector<1x256xf32>
    %509 = vector.broadcast %507 : f32 to vector<1x256xf32>
    %510 = arith.mulf %509, %508 : vector<1x256xf32>
    %511 = arith.addf %506, %510 : vector<1x256xf32>
    %c140 = arith.constant 140 : index
    %512 = memref.load %arg2[%c140] : memref<144xf32, #tpu.memory_space<smem>>
    %513 = vector.extract_strided_slice %436 {offsets = [3, 0], sizes = [1, 256], strides = [1, 1]} : vector<4x256xf32> to vector<1x256xf32>
    %514 = vector.broadcast %512 : f32 to vector<1x256xf32>
    %515 = arith.mulf %514, %513 : vector<1x256xf32>
    %516 = arith.addf %511, %515 : vector<1x256xf32>
    %517 = vector.extract_strided_slice %1 {offsets = [0, 15], sizes = [4, 241], strides = [1, 1]} : vector<4x256xf32> to vector<4x241xf32>
    %cst_23 = arith.constant 0.000000e+00 : f32
    %518 = vector.broadcast %cst_23 : f32 to vector<4x15xf32>
    %519 = tpu.concatenate %517, %518 in 1 : vector<4x241xf32>, vector<4x15xf32> -> vector<4x256xf32>
    %c0_24 = arith.constant 0 : index
    %c0_25 = arith.constant 0 : index
    %c0_26 = arith.constant 0 : index
    %520 = vector.load %arg3[%c0_24, %c0_25, %c0_26] : memref<3x1x256xf32, #tpu.memory_space<vmem>>, vector<1x1x256xf32>
    %521 = vector.shape_cast %520 : vector<1x1x256xf32> to vector<1x256xf32>
    %522 = vector.broadcast %521 : vector<1x256xf32> to vector<4x256xf32>
    %523 = arith.mulf %519, %522 : vector<4x256xf32>
    %c6 = arith.constant 6 : index
    %524 = memref.load %arg2[%c6] : memref<144xf32, #tpu.memory_space<smem>>
    %525 = vector.extract_strided_slice %523 {offsets = [0, 0], sizes = [1, 256], strides = [1, 1]} : vector<4x256xf32> to vector<1x256xf32>
    %526 = vector.broadcast %524 : f32 to vector<1x256xf32>
    %527 = arith.mulf %526, %525 : vector<1x256xf32>
    %528 = arith.addf %456, %527 : vector<1x256xf32>
    %c15 = arith.constant 15 : index
    %529 = memref.load %arg2[%c15] : memref<144xf32, #tpu.memory_space<smem>>
    %530 = vector.extract_strided_slice %523 {offsets = [1, 0], sizes = [1, 256], strides = [1, 1]} : vector<4x256xf32> to vector<1x256xf32>
    %531 = vector.broadcast %529 : f32 to vector<1x256xf32>
    %532 = arith.mulf %531, %530 : vector<1x256xf32>
    %533 = arith.addf %528, %532 : vector<1x256xf32>
    %c24 = arith.constant 24 : index
    %534 = memref.load %arg2[%c24] : memref<144xf32, #tpu.memory_space<smem>>
    %535 = vector.extract_strided_slice %523 {offsets = [2, 0], sizes = [1, 256], strides = [1, 1]} : vector<4x256xf32> to vector<1x256xf32>
    %536 = vector.broadcast %534 : f32 to vector<1x256xf32>
    %537 = arith.mulf %536, %535 : vector<1x256xf32>
    %538 = arith.addf %533, %537 : vector<1x256xf32>
    %c33 = arith.constant 33 : index
    %539 = memref.load %arg2[%c33] : memref<144xf32, #tpu.memory_space<smem>>
    %540 = vector.extract_strided_slice %523 {offsets = [3, 0], sizes = [1, 256], strides = [1, 1]} : vector<4x256xf32> to vector<1x256xf32>
    %541 = vector.broadcast %539 : f32 to vector<1x256xf32>
    %542 = arith.mulf %541, %540 : vector<1x256xf32>
    %543 = arith.addf %538, %542 : vector<1x256xf32>
    %c42 = arith.constant 42 : index
    %544 = memref.load %arg2[%c42] : memref<144xf32, #tpu.memory_space<smem>>
    %545 = vector.extract_strided_slice %523 {offsets = [0, 0], sizes = [1, 256], strides = [1, 1]} : vector<4x256xf32> to vector<1x256xf32>
    %546 = vector.broadcast %544 : f32 to vector<1x256xf32>
    %547 = arith.mulf %546, %545 : vector<1x256xf32>
    %548 = arith.addf %476, %547 : vector<1x256xf32>
    %c51 = arith.constant 51 : index
    %549 = memref.load %arg2[%c51] : memref<144xf32, #tpu.memory_space<smem>>
    %550 = vector.extract_strided_slice %523 {offsets = [1, 0], sizes = [1, 256], strides = [1, 1]} : vector<4x256xf32> to vector<1x256xf32>
    %551 = vector.broadcast %549 : f32 to vector<1x256xf32>
    %552 = arith.mulf %551, %550 : vector<1x256xf32>
    %553 = arith.addf %548, %552 : vector<1x256xf32>
    %c60 = arith.constant 60 : index
    %554 = memref.load %arg2[%c60] : memref<144xf32, #tpu.memory_space<smem>>
    %555 = vector.extract_strided_slice %523 {offsets = [2, 0], sizes = [1, 256], strides = [1, 1]} : vector<4x256xf32> to vector<1x256xf32>
    %556 = vector.broadcast %554 : f32 to vector<1x256xf32>
    %557 = arith.mulf %556, %555 : vector<1x256xf32>
    %558 = arith.addf %553, %557 : vector<1x256xf32>
    %c69 = arith.constant 69 : index
    %559 = memref.load %arg2[%c69] : memref<144xf32, #tpu.memory_space<smem>>
    %560 = vector.extract_strided_slice %523 {offsets = [3, 0], sizes = [1, 256], strides = [1, 1]} : vector<4x256xf32> to vector<1x256xf32>
    %561 = vector.broadcast %559 : f32 to vector<1x256xf32>
    %562 = arith.mulf %561, %560 : vector<1x256xf32>
    %563 = arith.addf %558, %562 : vector<1x256xf32>
    %c78 = arith.constant 78 : index
    %564 = memref.load %arg2[%c78] : memref<144xf32, #tpu.memory_space<smem>>
    %565 = vector.extract_strided_slice %523 {offsets = [0, 0], sizes = [1, 256], strides = [1, 1]} : vector<4x256xf32> to vector<1x256xf32>
    %566 = vector.broadcast %564 : f32 to vector<1x256xf32>
    %567 = arith.mulf %566, %565 : vector<1x256xf32>
    %568 = arith.addf %496, %567 : vector<1x256xf32>
    %c87 = arith.constant 87 : index
    %569 = memref.load %arg2[%c87] : memref<144xf32, #tpu.memory_space<smem>>
    %570 = vector.extract_strided_slice %523 {offsets = [1, 0], sizes = [1, 256], strides = [1, 1]} : vector<4x256xf32> to vector<1x256xf32>
    %571 = vector.broadcast %569 : f32 to vector<1x256xf32>
    %572 = arith.mulf %571, %570 : vector<1x256xf32>
    %573 = arith.addf %568, %572 : vector<1x256xf32>
    %c96 = arith.constant 96 : index
    %574 = memref.load %arg2[%c96] : memref<144xf32, #tpu.memory_space<smem>>
    %575 = vector.extract_strided_slice %523 {offsets = [2, 0], sizes = [1, 256], strides = [1, 1]} : vector<4x256xf32> to vector<1x256xf32>
    %576 = vector.broadcast %574 : f32 to vector<1x256xf32>
    %577 = arith.mulf %576, %575 : vector<1x256xf32>
    %578 = arith.addf %573, %577 : vector<1x256xf32>
    %c105 = arith.constant 105 : index
    %579 = memref.load %arg2[%c105] : memref<144xf32, #tpu.memory_space<smem>>
    %580 = vector.extract_strided_slice %523 {offsets = [3, 0], sizes = [1, 256], strides = [1, 1]} : vector<4x256xf32> to vector<1x256xf32>
    %581 = vector.broadcast %579 : f32 to vector<1x256xf32>
    %582 = arith.mulf %581, %580 : vector<1x256xf32>
    %583 = arith.addf %578, %582 : vector<1x256xf32>
    %c114 = arith.constant 114 : index
    %584 = memref.load %arg2[%c114] : memref<144xf32, #tpu.memory_space<smem>>
    %585 = vector.extract_strided_slice %523 {offsets = [0, 0], sizes = [1, 256], strides = [1, 1]} : vector<4x256xf32> to vector<1x256xf32>
    %586 = vector.broadcast %584 : f32 to vector<1x256xf32>
    %587 = arith.mulf %586, %585 : vector<1x256xf32>
    %588 = arith.addf %516, %587 : vector<1x256xf32>
    %c123 = arith.constant 123 : index
    %589 = memref.load %arg2[%c123] : memref<144xf32, #tpu.memory_space<smem>>
    %590 = vector.extract_strided_slice %523 {offsets = [1, 0], sizes = [1, 256], strides = [1, 1]} : vector<4x256xf32> to vector<1x256xf32>
    %591 = vector.broadcast %589 : f32 to vector<1x256xf32>
    %592 = arith.mulf %591, %590 : vector<1x256xf32>
    %593 = arith.addf %588, %592 : vector<1x256xf32>
    %c132 = arith.constant 132 : index
    %594 = memref.load %arg2[%c132] : memref<144xf32, #tpu.memory_space<smem>>
    %595 = vector.extract_strided_slice %523 {offsets = [2, 0], sizes = [1, 256], strides = [1, 1]} : vector<4x256xf32> to vector<1x256xf32>
    %596 = vector.broadcast %594 : f32 to vector<1x256xf32>
    %597 = arith.mulf %596, %595 : vector<1x256xf32>
    %598 = arith.addf %593, %597 : vector<1x256xf32>
    %c141 = arith.constant 141 : index
    %599 = memref.load %arg2[%c141] : memref<144xf32, #tpu.memory_space<smem>>
    %600 = vector.extract_strided_slice %523 {offsets = [3, 0], sizes = [1, 256], strides = [1, 1]} : vector<4x256xf32> to vector<1x256xf32>
    %601 = vector.broadcast %599 : f32 to vector<1x256xf32>
    %602 = arith.mulf %601, %600 : vector<1x256xf32>
    %603 = arith.addf %598, %602 : vector<1x256xf32>
    %604 = vector.extract_strided_slice %1 {offsets = [0, 16], sizes = [4, 240], strides = [1, 1]} : vector<4x256xf32> to vector<4x240xf32>
    %cst_27 = arith.constant 0.000000e+00 : f32
    %605 = vector.broadcast %cst_27 : f32 to vector<4x16xf32>
    %606 = tpu.concatenate %604, %605 in 1 : vector<4x240xf32>, vector<4x16xf32> -> vector<4x256xf32>
    %c7 = arith.constant 7 : index
    %607 = memref.load %arg2[%c7] : memref<144xf32, #tpu.memory_space<smem>>
    %608 = vector.extract_strided_slice %606 {offsets = [0, 0], sizes = [1, 256], strides = [1, 1]} : vector<4x256xf32> to vector<1x256xf32>
    %609 = vector.broadcast %607 : f32 to vector<1x256xf32>
    %610 = arith.mulf %609, %608 : vector<1x256xf32>
    %611 = arith.addf %543, %610 : vector<1x256xf32>
    %c16 = arith.constant 16 : index
    %612 = memref.load %arg2[%c16] : memref<144xf32, #tpu.memory_space<smem>>
    %613 = vector.extract_strided_slice %606 {offsets = [1, 0], sizes = [1, 256], strides = [1, 1]} : vector<4x256xf32> to vector<1x256xf32>
    %614 = vector.broadcast %612 : f32 to vector<1x256xf32>
    %615 = arith.mulf %614, %613 : vector<1x256xf32>
    %616 = arith.addf %611, %615 : vector<1x256xf32>
    %c25 = arith.constant 25 : index
    %617 = memref.load %arg2[%c25] : memref<144xf32, #tpu.memory_space<smem>>
    %618 = vector.extract_strided_slice %606 {offsets = [2, 0], sizes = [1, 256], strides = [1, 1]} : vector<4x256xf32> to vector<1x256xf32>
    %619 = vector.broadcast %617 : f32 to vector<1x256xf32>
    %620 = arith.mulf %619, %618 : vector<1x256xf32>
    %621 = arith.addf %616, %620 : vector<1x256xf32>
    %c34 = arith.constant 34 : index
    %622 = memref.load %arg2[%c34] : memref<144xf32, #tpu.memory_space<smem>>
    %623 = vector.extract_strided_slice %606 {offsets = [3, 0], sizes = [1, 256], strides = [1, 1]} : vector<4x256xf32> to vector<1x256xf32>
    %624 = vector.broadcast %622 : f32 to vector<1x256xf32>
    %625 = arith.mulf %624, %623 : vector<1x256xf32>
    %626 = arith.addf %621, %625 : vector<1x256xf32>
    %c43 = arith.constant 43 : index
    %627 = memref.load %arg2[%c43] : memref<144xf32, #tpu.memory_space<smem>>
    %628 = vector.extract_strided_slice %606 {offsets = [0, 0], sizes = [1, 256], strides = [1, 1]} : vector<4x256xf32> to vector<1x256xf32>
    %629 = vector.broadcast %627 : f32 to vector<1x256xf32>
    %630 = arith.mulf %629, %628 : vector<1x256xf32>
    %631 = arith.addf %563, %630 : vector<1x256xf32>
    %c52 = arith.constant 52 : index
    %632 = memref.load %arg2[%c52] : memref<144xf32, #tpu.memory_space<smem>>
    %633 = vector.extract_strided_slice %606 {offsets = [1, 0], sizes = [1, 256], strides = [1, 1]} : vector<4x256xf32> to vector<1x256xf32>
    %634 = vector.broadcast %632 : f32 to vector<1x256xf32>
    %635 = arith.mulf %634, %633 : vector<1x256xf32>
    %636 = arith.addf %631, %635 : vector<1x256xf32>
    %c61 = arith.constant 61 : index
    %637 = memref.load %arg2[%c61] : memref<144xf32, #tpu.memory_space<smem>>
    %638 = vector.extract_strided_slice %606 {offsets = [2, 0], sizes = [1, 256], strides = [1, 1]} : vector<4x256xf32> to vector<1x256xf32>
    %639 = vector.broadcast %637 : f32 to vector<1x256xf32>
    %640 = arith.mulf %639, %638 : vector<1x256xf32>
    %641 = arith.addf %636, %640 : vector<1x256xf32>
    %c70 = arith.constant 70 : index
    %642 = memref.load %arg2[%c70] : memref<144xf32, #tpu.memory_space<smem>>
    %643 = vector.extract_strided_slice %606 {offsets = [3, 0], sizes = [1, 256], strides = [1, 1]} : vector<4x256xf32> to vector<1x256xf32>
    %644 = vector.broadcast %642 : f32 to vector<1x256xf32>
    %645 = arith.mulf %644, %643 : vector<1x256xf32>
    %646 = arith.addf %641, %645 : vector<1x256xf32>
    %c79 = arith.constant 79 : index
    %647 = memref.load %arg2[%c79] : memref<144xf32, #tpu.memory_space<smem>>
    %648 = vector.extract_strided_slice %606 {offsets = [0, 0], sizes = [1, 256], strides = [1, 1]} : vector<4x256xf32> to vector<1x256xf32>
    %649 = vector.broadcast %647 : f32 to vector<1x256xf32>
    %650 = arith.mulf %649, %648 : vector<1x256xf32>
    %651 = arith.addf %583, %650 : vector<1x256xf32>
    %c88 = arith.constant 88 : index
    %652 = memref.load %arg2[%c88] : memref<144xf32, #tpu.memory_space<smem>>
    %653 = vector.extract_strided_slice %606 {offsets = [1, 0], sizes = [1, 256], strides = [1, 1]} : vector<4x256xf32> to vector<1x256xf32>
    %654 = vector.broadcast %652 : f32 to vector<1x256xf32>
    %655 = arith.mulf %654, %653 : vector<1x256xf32>
    %656 = arith.addf %651, %655 : vector<1x256xf32>
    %c97 = arith.constant 97 : index
    %657 = memref.load %arg2[%c97] : memref<144xf32, #tpu.memory_space<smem>>
    %658 = vector.extract_strided_slice %606 {offsets = [2, 0], sizes = [1, 256], strides = [1, 1]} : vector<4x256xf32> to vector<1x256xf32>
    %659 = vector.broadcast %657 : f32 to vector<1x256xf32>
    %660 = arith.mulf %659, %658 : vector<1x256xf32>
    %661 = arith.addf %656, %660 : vector<1x256xf32>
    %c106 = arith.constant 106 : index
    %662 = memref.load %arg2[%c106] : memref<144xf32, #tpu.memory_space<smem>>
    %663 = vector.extract_strided_slice %606 {offsets = [3, 0], sizes = [1, 256], strides = [1, 1]} : vector<4x256xf32> to vector<1x256xf32>
    %664 = vector.broadcast %662 : f32 to vector<1x256xf32>
    %665 = arith.mulf %664, %663 : vector<1x256xf32>
    %666 = arith.addf %661, %665 : vector<1x256xf32>
    %c115 = arith.constant 115 : index
    %667 = memref.load %arg2[%c115] : memref<144xf32, #tpu.memory_space<smem>>
    %668 = vector.extract_strided_slice %606 {offsets = [0, 0], sizes = [1, 256], strides = [1, 1]} : vector<4x256xf32> to vector<1x256xf32>
    %669 = vector.broadcast %667 : f32 to vector<1x256xf32>
    %670 = arith.mulf %669, %668 : vector<1x256xf32>
    %671 = arith.addf %603, %670 : vector<1x256xf32>
    %c124 = arith.constant 124 : index
    %672 = memref.load %arg2[%c124] : memref<144xf32, #tpu.memory_space<smem>>
    %673 = vector.extract_strided_slice %606 {offsets = [1, 0], sizes = [1, 256], strides = [1, 1]} : vector<4x256xf32> to vector<1x256xf32>
    %674 = vector.broadcast %672 : f32 to vector<1x256xf32>
    %675 = arith.mulf %674, %673 : vector<1x256xf32>
    %676 = arith.addf %671, %675 : vector<1x256xf32>
    %c133 = arith.constant 133 : index
    %677 = memref.load %arg2[%c133] : memref<144xf32, #tpu.memory_space<smem>>
    %678 = vector.extract_strided_slice %606 {offsets = [2, 0], sizes = [1, 256], strides = [1, 1]} : vector<4x256xf32> to vector<1x256xf32>
    %679 = vector.broadcast %677 : f32 to vector<1x256xf32>
    %680 = arith.mulf %679, %678 : vector<1x256xf32>
    %681 = arith.addf %676, %680 : vector<1x256xf32>
    %c142 = arith.constant 142 : index
    %682 = memref.load %arg2[%c142] : memref<144xf32, #tpu.memory_space<smem>>
    %683 = vector.extract_strided_slice %606 {offsets = [3, 0], sizes = [1, 256], strides = [1, 1]} : vector<4x256xf32> to vector<1x256xf32>
    %684 = vector.broadcast %682 : f32 to vector<1x256xf32>
    %685 = arith.mulf %684, %683 : vector<1x256xf32>
    %686 = arith.addf %681, %685 : vector<1x256xf32>
    %687 = vector.extract_strided_slice %1 {offsets = [0, 17], sizes = [4, 239], strides = [1, 1]} : vector<4x256xf32> to vector<4x239xf32>
    %cst_28 = arith.constant 0.000000e+00 : f32
    %688 = vector.broadcast %cst_28 : f32 to vector<4x17xf32>
    %689 = tpu.concatenate %687, %688 in 1 : vector<4x239xf32>, vector<4x17xf32> -> vector<4x256xf32>
    %c2_29 = arith.constant 2 : index
    %c0_30 = arith.constant 0 : index
    %c0_31 = arith.constant 0 : index
    %690 = vector.load %arg3[%c2_29, %c0_30, %c0_31] : memref<3x1x256xf32, #tpu.memory_space<vmem>>, vector<1x1x256xf32>
    %691 = vector.shape_cast %690 : vector<1x1x256xf32> to vector<1x256xf32>
    %692 = vector.broadcast %691 : vector<1x256xf32> to vector<4x256xf32>
    %693 = arith.mulf %689, %692 : vector<4x256xf32>
    %c8 = arith.constant 8 : index
    %694 = memref.load %arg2[%c8] : memref<144xf32, #tpu.memory_space<smem>>
    %695 = vector.extract_strided_slice %693 {offsets = [0, 0], sizes = [1, 256], strides = [1, 1]} : vector<4x256xf32> to vector<1x256xf32>
    %696 = vector.broadcast %694 : f32 to vector<1x256xf32>
    %697 = arith.mulf %696, %695 : vector<1x256xf32>
    %698 = arith.addf %626, %697 : vector<1x256xf32>
    %c17 = arith.constant 17 : index
    %699 = memref.load %arg2[%c17] : memref<144xf32, #tpu.memory_space<smem>>
    %700 = vector.extract_strided_slice %693 {offsets = [1, 0], sizes = [1, 256], strides = [1, 1]} : vector<4x256xf32> to vector<1x256xf32>
    %701 = vector.broadcast %699 : f32 to vector<1x256xf32>
    %702 = arith.mulf %701, %700 : vector<1x256xf32>
    %703 = arith.addf %698, %702 : vector<1x256xf32>
    %c26 = arith.constant 26 : index
    %704 = memref.load %arg2[%c26] : memref<144xf32, #tpu.memory_space<smem>>
    %705 = vector.extract_strided_slice %693 {offsets = [2, 0], sizes = [1, 256], strides = [1, 1]} : vector<4x256xf32> to vector<1x256xf32>
    %706 = vector.broadcast %704 : f32 to vector<1x256xf32>
    %707 = arith.mulf %706, %705 : vector<1x256xf32>
    %708 = arith.addf %703, %707 : vector<1x256xf32>
    %c35 = arith.constant 35 : index
    %709 = memref.load %arg2[%c35] : memref<144xf32, #tpu.memory_space<smem>>
    %710 = vector.extract_strided_slice %693 {offsets = [3, 0], sizes = [1, 256], strides = [1, 1]} : vector<4x256xf32> to vector<1x256xf32>
    %711 = vector.broadcast %709 : f32 to vector<1x256xf32>
    %712 = arith.mulf %711, %710 : vector<1x256xf32>
    %713 = arith.addf %708, %712 : vector<1x256xf32>
    %c44 = arith.constant 44 : index
    %714 = memref.load %arg2[%c44] : memref<144xf32, #tpu.memory_space<smem>>
    %715 = vector.extract_strided_slice %693 {offsets = [0, 0], sizes = [1, 256], strides = [1, 1]} : vector<4x256xf32> to vector<1x256xf32>
    %716 = vector.broadcast %714 : f32 to vector<1x256xf32>
    %717 = arith.mulf %716, %715 : vector<1x256xf32>
    %718 = arith.addf %646, %717 : vector<1x256xf32>
    %c53 = arith.constant 53 : index
    %719 = memref.load %arg2[%c53] : memref<144xf32, #tpu.memory_space<smem>>
    %720 = vector.extract_strided_slice %693 {offsets = [1, 0], sizes = [1, 256], strides = [1, 1]} : vector<4x256xf32> to vector<1x256xf32>
    %721 = vector.broadcast %719 : f32 to vector<1x256xf32>
    %722 = arith.mulf %721, %720 : vector<1x256xf32>
    %723 = arith.addf %718, %722 : vector<1x256xf32>
    %c62 = arith.constant 62 : index
    %724 = memref.load %arg2[%c62] : memref<144xf32, #tpu.memory_space<smem>>
    %725 = vector.extract_strided_slice %693 {offsets = [2, 0], sizes = [1, 256], strides = [1, 1]} : vector<4x256xf32> to vector<1x256xf32>
    %726 = vector.broadcast %724 : f32 to vector<1x256xf32>
    %727 = arith.mulf %726, %725 : vector<1x256xf32>
    %728 = arith.addf %723, %727 : vector<1x256xf32>
    %c71 = arith.constant 71 : index
    %729 = memref.load %arg2[%c71] : memref<144xf32, #tpu.memory_space<smem>>
    %730 = vector.extract_strided_slice %693 {offsets = [3, 0], sizes = [1, 256], strides = [1, 1]} : vector<4x256xf32> to vector<1x256xf32>
    %731 = vector.broadcast %729 : f32 to vector<1x256xf32>
    %732 = arith.mulf %731, %730 : vector<1x256xf32>
    %733 = arith.addf %728, %732 : vector<1x256xf32>
    %c80 = arith.constant 80 : index
    %734 = memref.load %arg2[%c80] : memref<144xf32, #tpu.memory_space<smem>>
    %735 = vector.extract_strided_slice %693 {offsets = [0, 0], sizes = [1, 256], strides = [1, 1]} : vector<4x256xf32> to vector<1x256xf32>
    %736 = vector.broadcast %734 : f32 to vector<1x256xf32>
    %737 = arith.mulf %736, %735 : vector<1x256xf32>
    %738 = arith.addf %666, %737 : vector<1x256xf32>
    %c89 = arith.constant 89 : index
    %739 = memref.load %arg2[%c89] : memref<144xf32, #tpu.memory_space<smem>>
    %740 = vector.extract_strided_slice %693 {offsets = [1, 0], sizes = [1, 256], strides = [1, 1]} : vector<4x256xf32> to vector<1x256xf32>
    %741 = vector.broadcast %739 : f32 to vector<1x256xf32>
    %742 = arith.mulf %741, %740 : vector<1x256xf32>
    %743 = arith.addf %738, %742 : vector<1x256xf32>
    %c98 = arith.constant 98 : index
    %744 = memref.load %arg2[%c98] : memref<144xf32, #tpu.memory_space<smem>>
    %745 = vector.extract_strided_slice %693 {offsets = [2, 0], sizes = [1, 256], strides = [1, 1]} : vector<4x256xf32> to vector<1x256xf32>
    %746 = vector.broadcast %744 : f32 to vector<1x256xf32>
    %747 = arith.mulf %746, %745 : vector<1x256xf32>
    %748 = arith.addf %743, %747 : vector<1x256xf32>
    %c107 = arith.constant 107 : index
    %749 = memref.load %arg2[%c107] : memref<144xf32, #tpu.memory_space<smem>>
    %750 = vector.extract_strided_slice %693 {offsets = [3, 0], sizes = [1, 256], strides = [1, 1]} : vector<4x256xf32> to vector<1x256xf32>
    %751 = vector.broadcast %749 : f32 to vector<1x256xf32>
    %752 = arith.mulf %751, %750 : vector<1x256xf32>
    %753 = arith.addf %748, %752 : vector<1x256xf32>
    %c116 = arith.constant 116 : index
    %754 = memref.load %arg2[%c116] : memref<144xf32, #tpu.memory_space<smem>>
    %755 = vector.extract_strided_slice %693 {offsets = [0, 0], sizes = [1, 256], strides = [1, 1]} : vector<4x256xf32> to vector<1x256xf32>
    %756 = vector.broadcast %754 : f32 to vector<1x256xf32>
    %757 = arith.mulf %756, %755 : vector<1x256xf32>
    %758 = arith.addf %686, %757 : vector<1x256xf32>
    %c125 = arith.constant 125 : index
    %759 = memref.load %arg2[%c125] : memref<144xf32, #tpu.memory_space<smem>>
    %760 = vector.extract_strided_slice %693 {offsets = [1, 0], sizes = [1, 256], strides = [1, 1]} : vector<4x256xf32> to vector<1x256xf32>
    %761 = vector.broadcast %759 : f32 to vector<1x256xf32>
    %762 = arith.mulf %761, %760 : vector<1x256xf32>
    %763 = arith.addf %758, %762 : vector<1x256xf32>
    %c134 = arith.constant 134 : index
    %764 = memref.load %arg2[%c134] : memref<144xf32, #tpu.memory_space<smem>>
    %765 = vector.extract_strided_slice %693 {offsets = [2, 0], sizes = [1, 256], strides = [1, 1]} : vector<4x256xf32> to vector<1x256xf32>
    %766 = vector.broadcast %764 : f32 to vector<1x256xf32>
    %767 = arith.mulf %766, %765 : vector<1x256xf32>
    %768 = arith.addf %763, %767 : vector<1x256xf32>
    %c143 = arith.constant 143 : index
    %769 = memref.load %arg2[%c143] : memref<144xf32, #tpu.memory_space<smem>>
    %770 = vector.extract_strided_slice %693 {offsets = [3, 0], sizes = [1, 256], strides = [1, 1]} : vector<4x256xf32> to vector<1x256xf32>
    %771 = vector.broadcast %769 : f32 to vector<1x256xf32>
    %772 = arith.mulf %771, %770 : vector<1x256xf32>
    %773 = arith.addf %768, %772 : vector<1x256xf32>
    %c0_32 = arith.constant 0 : index
    %c0_33 = arith.constant 0 : index
    %c0_34 = arith.constant 0 : index
    %774 = vector.load %arg4[%c0_32, %c0_33, %c0_34] : memref<2x4x256xf32, #tpu.memory_space<vmem>>, vector<1x1x256xf32>
    %775 = vector.shape_cast %774 : vector<1x1x256xf32> to vector<1x256xf32>
    %776 = vector.shape_cast %713 : vector<1x256xf32> to vector<1x1x256xf32>
    tpu.vector_store %arg4[%c0_32, %c0_33, %c0_34], %776 {strides = array<i32>} : memref<2x4x256xf32, #tpu.memory_space<vmem>>, vector<1x1x256xf32>,
    %c0_35 = arith.constant 0 : index
    %c1_36 = arith.constant 1 : index
    %c0_37 = arith.constant 0 : index
    %777 = vector.load %arg4[%c0_35, %c1_36, %c0_37] : memref<2x4x256xf32, #tpu.memory_space<vmem>>, vector<1x1x256xf32>
    %778 = vector.shape_cast %777 : vector<1x1x256xf32> to vector<1x256xf32>
    %779 = vector.shape_cast %733 : vector<1x256xf32> to vector<1x1x256xf32>
    tpu.vector_store %arg4[%c0_35, %c1_36, %c0_37], %779 {strides = array<i32>} : memref<2x4x256xf32, #tpu.memory_space<vmem>>, vector<1x1x256xf32>,
    %c0_38 = arith.constant 0 : index
    %c2_39 = arith.constant 2 : index
    %c0_40 = arith.constant 0 : index
    %780 = vector.load %arg4[%c0_38, %c2_39, %c0_40] : memref<2x4x256xf32, #tpu.memory_space<vmem>>, vector<1x1x256xf32>
    %781 = vector.shape_cast %780 : vector<1x1x256xf32> to vector<1x256xf32>
    %782 = vector.shape_cast %753 : vector<1x256xf32> to vector<1x1x256xf32>
    tpu.vector_store %arg4[%c0_38, %c2_39, %c0_40], %782 {strides = array<i32>} : memref<2x4x256xf32, #tpu.memory_space<vmem>>, vector<1x1x256xf32>,
    %c0_41 = arith.constant 0 : index
    %c3_42 = arith.constant 3 : index
    %c0_43 = arith.constant 0 : index
    %783 = vector.load %arg4[%c0_41, %c3_42, %c0_43] : memref<2x4x256xf32, #tpu.memory_space<vmem>>, vector<1x1x256xf32>
    %784 = vector.shape_cast %783 : vector<1x1x256xf32> to vector<1x256xf32>
    %785 = vector.shape_cast %773 : vector<1x256xf32> to vector<1x1x256xf32>
    tpu.vector_store %arg4[%c0_41, %c3_42, %c0_43], %785 {strides = array<i32>} : memref<2x4x256xf32, #tpu.memory_space<vmem>>, vector<1x1x256xf32>,
    %c1_44 = arith.constant 1 : index
    %c0_45 = arith.constant 0 : index
    %c0_46 = arith.constant 0 : index
    %786 = vector.load %arg1[%c1_44, %c0_45, %c0_46] : memref<2x4x256xf32, #tpu.memory_space<vmem>>, vector<1x4x256xf32>
    %787 = vector.shape_cast %786 : vector<1x4x256xf32> to vector<4x256xf32>
    %cst_47 = arith.constant 0.000000e+00 : f32
    %788 = vector.broadcast %cst_47 : f32 to vector<1x256xf32>
    %cst_48 = arith.constant 0.000000e+00 : f32
    %789 = vector.broadcast %cst_48 : f32 to vector<1x256xf32>
    %cst_49 = arith.constant 0.000000e+00 : f32
    %790 = vector.broadcast %cst_49 : f32 to vector<1x256xf32>
    %cst_50 = arith.constant 0.000000e+00 : f32
    %791 = vector.broadcast %cst_50 : f32 to vector<1x256xf32>
    %cst_51 = arith.constant 0.000000e+00 : f32
    %792 = vector.broadcast %cst_51 : f32 to vector<4x17xf32>
    %793 = vector.extract_strided_slice %787 {offsets = [0, 0], sizes = [4, 239], strides = [1, 1]} : vector<4x256xf32> to vector<4x239xf32>
    %794 = tpu.concatenate %792, %793 in 1 : vector<4x17xf32>, vector<4x239xf32> -> vector<4x256xf32>
    %c0_52 = arith.constant 0 : index
    %c0_53 = arith.constant 0 : index
    %c0_54 = arith.constant 0 : index
    %795 = vector.load %arg3[%c0_52, %c0_53, %c0_54] : memref<3x1x256xf32, #tpu.memory_space<vmem>>, vector<1x1x256xf32>
    %796 = vector.shape_cast %795 : vector<1x1x256xf32> to vector<1x256xf32>
    %797 = vector.broadcast %796 : vector<1x256xf32> to vector<4x256xf32>
    %798 = arith.mulf %794, %797 : vector<4x256xf32>
    %c0_55 = arith.constant 0 : index
    %799 = memref.load %arg2[%c0_55] : memref<144xf32, #tpu.memory_space<smem>>
    %800 = vector.extract_strided_slice %798 {offsets = [0, 0], sizes = [1, 256], strides = [1, 1]} : vector<4x256xf32> to vector<1x256xf32>
    %801 = vector.broadcast %799 : f32 to vector<1x256xf32>
    %802 = arith.mulf %801, %800 : vector<1x256xf32>
    %803 = arith.addf %788, %802 : vector<1x256xf32>
    %c9_56 = arith.constant 9 : index
    %804 = memref.load %arg2[%c9_56] : memref<144xf32, #tpu.memory_space<smem>>
    %805 = vector.extract_strided_slice %798 {offsets = [1, 0], sizes = [1, 256], strides = [1, 1]} : vector<4x256xf32> to vector<1x256xf32>
    %806 = vector.broadcast %804 : f32 to vector<1x256xf32>
    %807 = arith.mulf %806, %805 : vector<1x256xf32>
    %808 = arith.addf %803, %807 : vector<1x256xf32>
    %c18_57 = arith.constant 18 : index
    %809 = memref.load %arg2[%c18_57] : memref<144xf32, #tpu.memory_space<smem>>
    %810 = vector.extract_strided_slice %798 {offsets = [2, 0], sizes = [1, 256], strides = [1, 1]} : vector<4x256xf32> to vector<1x256xf32>
    %811 = vector.broadcast %809 : f32 to vector<1x256xf32>
    %812 = arith.mulf %811, %810 : vector<1x256xf32>
    %813 = arith.addf %808, %812 : vector<1x256xf32>
    %c27_58 = arith.constant 27 : index
    %814 = memref.load %arg2[%c27_58] : memref<144xf32, #tpu.memory_space<smem>>
    %815 = vector.extract_strided_slice %798 {offsets = [3, 0], sizes = [1, 256], strides = [1, 1]} : vector<4x256xf32> to vector<1x256xf32>
    %816 = vector.broadcast %814 : f32 to vector<1x256xf32>
    %817 = arith.mulf %816, %815 : vector<1x256xf32>
    %818 = arith.addf %813, %817 : vector<1x256xf32>
    %c36_59 = arith.constant 36 : index
    %819 = memref.load %arg2[%c36_59] : memref<144xf32, #tpu.memory_space<smem>>
    %820 = vector.extract_strided_slice %798 {offsets = [0, 0], sizes = [1, 256], strides = [1, 1]} : vector<4x256xf32> to vector<1x256xf32>
    %821 = vector.broadcast %819 : f32 to vector<1x256xf32>
    %822 = arith.mulf %821, %820 : vector<1x256xf32>
    %823 = arith.addf %789, %822 : vector<1x256xf32>
    %c45_60 = arith.constant 45 : index
    %824 = memref.load %arg2[%c45_60] : memref<144xf32, #tpu.memory_space<smem>>
    %825 = vector.extract_strided_slice %798 {offsets = [1, 0], sizes = [1, 256], strides = [1, 1]} : vector<4x256xf32> to vector<1x256xf32>
    %826 = vector.broadcast %824 : f32 to vector<1x256xf32>
    %827 = arith.mulf %826, %825 : vector<1x256xf32>
    %828 = arith.addf %823, %827 : vector<1x256xf32>
    %c54_61 = arith.constant 54 : index
    %829 = memref.load %arg2[%c54_61] : memref<144xf32, #tpu.memory_space<smem>>
    %830 = vector.extract_strided_slice %798 {offsets = [2, 0], sizes = [1, 256], strides = [1, 1]} : vector<4x256xf32> to vector<1x256xf32>
    %831 = vector.broadcast %829 : f32 to vector<1x256xf32>
    %832 = arith.mulf %831, %830 : vector<1x256xf32>
    %833 = arith.addf %828, %832 : vector<1x256xf32>
    %c63_62 = arith.constant 63 : index
    %834 = memref.load %arg2[%c63_62] : memref<144xf32, #tpu.memory_space<smem>>
    %835 = vector.extract_strided_slice %798 {offsets = [3, 0], sizes = [1, 256], strides = [1, 1]} : vector<4x256xf32> to vector<1x256xf32>
    %836 = vector.broadcast %834 : f32 to vector<1x256xf32>
    %837 = arith.mulf %836, %835 : vector<1x256xf32>
    %838 = arith.addf %833, %837 : vector<1x256xf32>
    %c72_63 = arith.constant 72 : index
    %839 = memref.load %arg2[%c72_63] : memref<144xf32, #tpu.memory_space<smem>>
    %840 = vector.extract_strided_slice %798 {offsets = [0, 0], sizes = [1, 256], strides = [1, 1]} : vector<4x256xf32> to vector<1x256xf32>
    %841 = vector.broadcast %839 : f32 to vector<1x256xf32>
    %842 = arith.mulf %841, %840 : vector<1x256xf32>
    %843 = arith.addf %790, %842 : vector<1x256xf32>
    %c81_64 = arith.constant 81 : index
    %844 = memref.load %arg2[%c81_64] : memref<144xf32, #tpu.memory_space<smem>>
    %845 = vector.extract_strided_slice %798 {offsets = [1, 0], sizes = [1, 256], strides = [1, 1]} : vector<4x256xf32> to vector<1x256xf32>
    %846 = vector.broadcast %844 : f32 to vector<1x256xf32>
    %847 = arith.mulf %846, %845 : vector<1x256xf32>
    %848 = arith.addf %843, %847 : vector<1x256xf32>
    %c90_65 = arith.constant 90 : index
    %849 = memref.load %arg2[%c90_65] : memref<144xf32, #tpu.memory_space<smem>>
    %850 = vector.extract_strided_slice %798 {offsets = [2, 0], sizes = [1, 256], strides = [1, 1]} : vector<4x256xf32> to vector<1x256xf32>
    %851 = vector.broadcast %849 : f32 to vector<1x256xf32>
    %852 = arith.mulf %851, %850 : vector<1x256xf32>
    %853 = arith.addf %848, %852 : vector<1x256xf32>
    %c99_66 = arith.constant 99 : index
    %854 = memref.load %arg2[%c99_66] : memref<144xf32, #tpu.memory_space<smem>>
    %855 = vector.extract_strided_slice %798 {offsets = [3, 0], sizes = [1, 256], strides = [1, 1]} : vector<4x256xf32> to vector<1x256xf32>
    %856 = vector.broadcast %854 : f32 to vector<1x256xf32>
    %857 = arith.mulf %856, %855 : vector<1x256xf32>
    %858 = arith.addf %853, %857 : vector<1x256xf32>
    %c108_67 = arith.constant 108 : index
    %859 = memref.load %arg2[%c108_67] : memref<144xf32, #tpu.memory_space<smem>>
    %860 = vector.extract_strided_slice %798 {offsets = [0, 0], sizes = [1, 256], strides = [1, 1]} : vector<4x256xf32> to vector<1x256xf32>
    %861 = vector.broadcast %859 : f32 to vector<1x256xf32>
    %862 = arith.mulf %861, %860 : vector<1x256xf32>
    %863 = arith.addf %791, %862 : vector<1x256xf32>
    %c117_68 = arith.constant 117 : index
    %864 = memref.load %arg2[%c117_68] : memref<144xf32, #tpu.memory_space<smem>>
    %865 = vector.extract_strided_slice %798 {offsets = [1, 0], sizes = [1, 256], strides = [1, 1]} : vector<4x256xf32> to vector<1x256xf32>
    %866 = vector.broadcast %864 : f32 to vector<1x256xf32>
    %867 = arith.mulf %866, %865 : vector<1x256xf32>
    %868 = arith.addf %863, %867 : vector<1x256xf32>
    %c126_69 = arith.constant 126 : index
    %869 = memref.load %arg2[%c126_69] : memref<144xf32, #tpu.memory_space<smem>>
    %870 = vector.extract_strided_slice %798 {offsets = [2, 0], sizes = [1, 256], strides = [1, 1]} : vector<4x256xf32> to vector<1x256xf32>
    %871 = vector.broadcast %869 : f32 to vector<1x256xf32>
    %872 = arith.mulf %871, %870 : vector<1x256xf32>
    %873 = arith.addf %868, %872 : vector<1x256xf32>
    %c135_70 = arith.constant 135 : index
    %874 = memref.load %arg2[%c135_70] : memref<144xf32, #tpu.memory_space<smem>>
    %875 = vector.extract_strided_slice %798 {offsets = [3, 0], sizes = [1, 256], strides = [1, 1]} : vector<4x256xf32> to vector<1x256xf32>
    %876 = vector.broadcast %874 : f32 to vector<1x256xf32>
    %877 = arith.mulf %876, %875 : vector<1x256xf32>
    %878 = arith.addf %873, %877 : vector<1x256xf32>
    %cst_71 = arith.constant 0.000000e+00 : f32
    %879 = vector.broadcast %cst_71 : f32 to vector<4x16xf32>
    %880 = vector.extract_strided_slice %787 {offsets = [0, 0], sizes = [4, 240], strides = [1, 1]} : vector<4x256xf32> to vector<4x240xf32>
    %881 = tpu.concatenate %879, %880 in 1 : vector<4x16xf32>, vector<4x240xf32> -> vector<4x256xf32>
    %c1_72 = arith.constant 1 : index
    %882 = memref.load %arg2[%c1_72] : memref<144xf32, #tpu.memory_space<smem>>
    %883 = vector.extract_strided_slice %881 {offsets = [0, 0], sizes = [1, 256], strides = [1, 1]} : vector<4x256xf32> to vector<1x256xf32>
    %884 = vector.broadcast %882 : f32 to vector<1x256xf32>
    %885 = arith.mulf %884, %883 : vector<1x256xf32>
    %886 = arith.addf %818, %885 : vector<1x256xf32>
    %c10_73 = arith.constant 10 : index
    %887 = memref.load %arg2[%c10_73] : memref<144xf32, #tpu.memory_space<smem>>
    %888 = vector.extract_strided_slice %881 {offsets = [1, 0], sizes = [1, 256], strides = [1, 1]} : vector<4x256xf32> to vector<1x256xf32>
    %889 = vector.broadcast %887 : f32 to vector<1x256xf32>
    %890 = arith.mulf %889, %888 : vector<1x256xf32>
    %891 = arith.addf %886, %890 : vector<1x256xf32>
    %c19_74 = arith.constant 19 : index
    %892 = memref.load %arg2[%c19_74] : memref<144xf32, #tpu.memory_space<smem>>
    %893 = vector.extract_strided_slice %881 {offsets = [2, 0], sizes = [1, 256], strides = [1, 1]} : vector<4x256xf32> to vector<1x256xf32>
    %894 = vector.broadcast %892 : f32 to vector<1x256xf32>
    %895 = arith.mulf %894, %893 : vector<1x256xf32>
    %896 = arith.addf %891, %895 : vector<1x256xf32>
    %c28_75 = arith.constant 28 : index
    %897 = memref.load %arg2[%c28_75] : memref<144xf32, #tpu.memory_space<smem>>
    %898 = vector.extract_strided_slice %881 {offsets = [3, 0], sizes = [1, 256], strides = [1, 1]} : vector<4x256xf32> to vector<1x256xf32>
    %899 = vector.broadcast %897 : f32 to vector<1x256xf32>
    %900 = arith.mulf %899, %898 : vector<1x256xf32>
    %901 = arith.addf %896, %900 : vector<1x256xf32>
    %c37_76 = arith.constant 37 : index
    %902 = memref.load %arg2[%c37_76] : memref<144xf32, #tpu.memory_space<smem>>
    %903 = vector.extract_strided_slice %881 {offsets = [0, 0], sizes = [1, 256], strides = [1, 1]} : vector<4x256xf32> to vector<1x256xf32>
    %904 = vector.broadcast %902 : f32 to vector<1x256xf32>
    %905 = arith.mulf %904, %903 : vector<1x256xf32>
    %906 = arith.addf %838, %905 : vector<1x256xf32>
    %c46_77 = arith.constant 46 : index
    %907 = memref.load %arg2[%c46_77] : memref<144xf32, #tpu.memory_space<smem>>
    %908 = vector.extract_strided_slice %881 {offsets = [1, 0], sizes = [1, 256], strides = [1, 1]} : vector<4x256xf32> to vector<1x256xf32>
    %909 = vector.broadcast %907 : f32 to vector<1x256xf32>
    %910 = arith.mulf %909, %908 : vector<1x256xf32>
    %911 = arith.addf %906, %910 : vector<1x256xf32>
    %c55_78 = arith.constant 55 : index
    %912 = memref.load %arg2[%c55_78] : memref<144xf32, #tpu.memory_space<smem>>
    %913 = vector.extract_strided_slice %881 {offsets = [2, 0], sizes = [1, 256], strides = [1, 1]} : vector<4x256xf32> to vector<1x256xf32>
    %914 = vector.broadcast %912 : f32 to vector<1x256xf32>
    %915 = arith.mulf %914, %913 : vector<1x256xf32>
    %916 = arith.addf %911, %915 : vector<1x256xf32>
    %c64_79 = arith.constant 64 : index
    %917 = memref.load %arg2[%c64_79] : memref<144xf32, #tpu.memory_space<smem>>
    %918 = vector.extract_strided_slice %881 {offsets = [3, 0], sizes = [1, 256], strides = [1, 1]} : vector<4x256xf32> to vector<1x256xf32>
    %919 = vector.broadcast %917 : f32 to vector<1x256xf32>
    %920 = arith.mulf %919, %918 : vector<1x256xf32>
    %921 = arith.addf %916, %920 : vector<1x256xf32>
    %c73_80 = arith.constant 73 : index
    %922 = memref.load %arg2[%c73_80] : memref<144xf32, #tpu.memory_space<smem>>
    %923 = vector.extract_strided_slice %881 {offsets = [0, 0], sizes = [1, 256], strides = [1, 1]} : vector<4x256xf32> to vector<1x256xf32>
    %924 = vector.broadcast %922 : f32 to vector<1x256xf32>
    %925 = arith.mulf %924, %923 : vector<1x256xf32>
    %926 = arith.addf %858, %925 : vector<1x256xf32>
    %c82_81 = arith.constant 82 : index
    %927 = memref.load %arg2[%c82_81] : memref<144xf32, #tpu.memory_space<smem>>
    %928 = vector.extract_strided_slice %881 {offsets = [1, 0], sizes = [1, 256], strides = [1, 1]} : vector<4x256xf32> to vector<1x256xf32>
    %929 = vector.broadcast %927 : f32 to vector<1x256xf32>
    %930 = arith.mulf %929, %928 : vector<1x256xf32>
    %931 = arith.addf %926, %930 : vector<1x256xf32>
    %c91_82 = arith.constant 91 : index
    %932 = memref.load %arg2[%c91_82] : memref<144xf32, #tpu.memory_space<smem>>
    %933 = vector.extract_strided_slice %881 {offsets = [2, 0], sizes = [1, 256], strides = [1, 1]} : vector<4x256xf32> to vector<1x256xf32>
    %934 = vector.broadcast %932 : f32 to vector<1x256xf32>
    %935 = arith.mulf %934, %933 : vector<1x256xf32>
    %936 = arith.addf %931, %935 : vector<1x256xf32>
    %c100_83 = arith.constant 100 : index
    %937 = memref.load %arg2[%c100_83] : memref<144xf32, #tpu.memory_space<smem>>
    %938 = vector.extract_strided_slice %881 {offsets = [3, 0], sizes = [1, 256], strides = [1, 1]} : vector<4x256xf32> to vector<1x256xf32>
    %939 = vector.broadcast %937 : f32 to vector<1x256xf32>
    %940 = arith.mulf %939, %938 : vector<1x256xf32>
    %941 = arith.addf %936, %940 : vector<1x256xf32>
    %c109_84 = arith.constant 109 : index
    %942 = memref.load %arg2[%c109_84] : memref<144xf32, #tpu.memory_space<smem>>
    %943 = vector.extract_strided_slice %881 {offsets = [0, 0], sizes = [1, 256], strides = [1, 1]} : vector<4x256xf32> to vector<1x256xf32>
    %944 = vector.broadcast %942 : f32 to vector<1x256xf32>
    %945 = arith.mulf %944, %943 : vector<1x256xf32>
    %946 = arith.addf %878, %945 : vector<1x256xf32>
    %c118_85 = arith.constant 118 : index
    %947 = memref.load %arg2[%c118_85] : memref<144xf32, #tpu.memory_space<smem>>
    %948 = vector.extract_strided_slice %881 {offsets = [1, 0], sizes = [1, 256], strides = [1, 1]} : vector<4x256xf32> to vector<1x256xf32>
    %949 = vector.broadcast %947 : f32 to vector<1x256xf32>
    %950 = arith.mulf %949, %948 : vector<1x256xf32>
    %951 = arith.addf %946, %950 : vector<1x256xf32>
    %c127_86 = arith.constant 127 : index
    %952 = memref.load %arg2[%c127_86] : memref<144xf32, #tpu.memory_space<smem>>
    %953 = vector.extract_strided_slice %881 {offsets = [2, 0], sizes = [1, 256], strides = [1, 1]} : vector<4x256xf32> to vector<1x256xf32>
    %954 = vector.broadcast %952 : f32 to vector<1x256xf32>
    %955 = arith.mulf %954, %953 : vector<1x256xf32>
    %956 = arith.addf %951, %955 : vector<1x256xf32>
    %c136_87 = arith.constant 136 : index
    %957 = memref.load %arg2[%c136_87] : memref<144xf32, #tpu.memory_space<smem>>
    %958 = vector.extract_strided_slice %881 {offsets = [3, 0], sizes = [1, 256], strides = [1, 1]} : vector<4x256xf32> to vector<1x256xf32>
    %959 = vector.broadcast %957 : f32 to vector<1x256xf32>
    %960 = arith.mulf %959, %958 : vector<1x256xf32>
    %961 = arith.addf %956, %960 : vector<1x256xf32>
    %cst_88 = arith.constant 0.000000e+00 : f32
    %962 = vector.broadcast %cst_88 : f32 to vector<4x15xf32>
    %963 = vector.extract_strided_slice %787 {offsets = [0, 0], sizes = [4, 241], strides = [1, 1]} : vector<4x256xf32> to vector<4x241xf32>
    %964 = tpu.concatenate %962, %963 in 1 : vector<4x15xf32>, vector<4x241xf32> -> vector<4x256xf32>
    %c2_89 = arith.constant 2 : index
    %c0_90 = arith.constant 0 : index
    %c0_91 = arith.constant 0 : index
    %965 = vector.load %arg3[%c2_89, %c0_90, %c0_91] : memref<3x1x256xf32, #tpu.memory_space<vmem>>, vector<1x1x256xf32>
    %966 = vector.shape_cast %965 : vector<1x1x256xf32> to vector<1x256xf32>
    %967 = vector.broadcast %966 : vector<1x256xf32> to vector<4x256xf32>
    %968 = arith.mulf %964, %967 : vector<4x256xf32>
    %c2_92 = arith.constant 2 : index
    %969 = memref.load %arg2[%c2_92] : memref<144xf32, #tpu.memory_space<smem>>
    %970 = vector.extract_strided_slice %968 {offsets = [0, 0], sizes = [1, 256], strides = [1, 1]} : vector<4x256xf32> to vector<1x256xf32>
    %971 = vector.broadcast %969 : f32 to vector<1x256xf32>
    %972 = arith.mulf %971, %970 : vector<1x256xf32>
    %973 = arith.addf %901, %972 : vector<1x256xf32>
    %c11_93 = arith.constant 11 : index
    %974 = memref.load %arg2[%c11_93] : memref<144xf32, #tpu.memory_space<smem>>
    %975 = vector.extract_strided_slice %968 {offsets = [1, 0], sizes = [1, 256], strides = [1, 1]} : vector<4x256xf32> to vector<1x256xf32>
    %976 = vector.broadcast %974 : f32 to vector<1x256xf32>
    %977 = arith.mulf %976, %975 : vector<1x256xf32>
    %978 = arith.addf %973, %977 : vector<1x256xf32>
    %c20_94 = arith.constant 20 : index
    %979 = memref.load %arg2[%c20_94] : memref<144xf32, #tpu.memory_space<smem>>
    %980 = vector.extract_strided_slice %968 {offsets = [2, 0], sizes = [1, 256], strides = [1, 1]} : vector<4x256xf32> to vector<1x256xf32>
    %981 = vector.broadcast %979 : f32 to vector<1x256xf32>
    %982 = arith.mulf %981, %980 : vector<1x256xf32>
    %983 = arith.addf %978, %982 : vector<1x256xf32>
    %c29_95 = arith.constant 29 : index
    %984 = memref.load %arg2[%c29_95] : memref<144xf32, #tpu.memory_space<smem>>
    %985 = vector.extract_strided_slice %968 {offsets = [3, 0], sizes = [1, 256], strides = [1, 1]} : vector<4x256xf32> to vector<1x256xf32>
    %986 = vector.broadcast %984 : f32 to vector<1x256xf32>
    %987 = arith.mulf %986, %985 : vector<1x256xf32>
    %988 = arith.addf %983, %987 : vector<1x256xf32>
    %c38_96 = arith.constant 38 : index
    %989 = memref.load %arg2[%c38_96] : memref<144xf32, #tpu.memory_space<smem>>
    %990 = vector.extract_strided_slice %968 {offsets = [0, 0], sizes = [1, 256], strides = [1, 1]} : vector<4x256xf32> to vector<1x256xf32>
    %991 = vector.broadcast %989 : f32 to vector<1x256xf32>
    %992 = arith.mulf %991, %990 : vector<1x256xf32>
    %993 = arith.addf %921, %992 : vector<1x256xf32>
    %c47_97 = arith.constant 47 : index
    %994 = memref.load %arg2[%c47_97] : memref<144xf32, #tpu.memory_space<smem>>
    %995 = vector.extract_strided_slice %968 {offsets = [1, 0], sizes = [1, 256], strides = [1, 1]} : vector<4x256xf32> to vector<1x256xf32>
    %996 = vector.broadcast %994 : f32 to vector<1x256xf32>
    %997 = arith.mulf %996, %995 : vector<1x256xf32>
    %998 = arith.addf %993, %997 : vector<1x256xf32>
    %c56_98 = arith.constant 56 : index
    %999 = memref.load %arg2[%c56_98] : memref<144xf32, #tpu.memory_space<smem>>
    %1000 = vector.extract_strided_slice %968 {offsets = [2, 0], sizes = [1, 256], strides = [1, 1]} : vector<4x256xf32> to vector<1x256xf32>
    %1001 = vector.broadcast %999 : f32 to vector<1x256xf32>
    %1002 = arith.mulf %1001, %1000 : vector<1x256xf32>
    %1003 = arith.addf %998, %1002 : vector<1x256xf32>
    %c65_99 = arith.constant 65 : index
    %1004 = memref.load %arg2[%c65_99] : memref<144xf32, #tpu.memory_space<smem>>
    %1005 = vector.extract_strided_slice %968 {offsets = [3, 0], sizes = [1, 256], strides = [1, 1]} : vector<4x256xf32> to vector<1x256xf32>
    %1006 = vector.broadcast %1004 : f32 to vector<1x256xf32>
    %1007 = arith.mulf %1006, %1005 : vector<1x256xf32>
    %1008 = arith.addf %1003, %1007 : vector<1x256xf32>
    %c74_100 = arith.constant 74 : index
    %1009 = memref.load %arg2[%c74_100] : memref<144xf32, #tpu.memory_space<smem>>
    %1010 = vector.extract_strided_slice %968 {offsets = [0, 0], sizes = [1, 256], strides = [1, 1]} : vector<4x256xf32> to vector<1x256xf32>
    %1011 = vector.broadcast %1009 : f32 to vector<1x256xf32>
    %1012 = arith.mulf %1011, %1010 : vector<1x256xf32>
    %1013 = arith.addf %941, %1012 : vector<1x256xf32>
    %c83_101 = arith.constant 83 : index
    %1014 = memref.load %arg2[%c83_101] : memref<144xf32, #tpu.memory_space<smem>>
    %1015 = vector.extract_strided_slice %968 {offsets = [1, 0], sizes = [1, 256], strides = [1, 1]} : vector<4x256xf32> to vector<1x256xf32>
    %1016 = vector.broadcast %1014 : f32 to vector<1x256xf32>
    %1017 = arith.mulf %1016, %1015 : vector<1x256xf32>
    %1018 = arith.addf %1013, %1017 : vector<1x256xf32>
    %c92_102 = arith.constant 92 : index
    %1019 = memref.load %arg2[%c92_102] : memref<144xf32, #tpu.memory_space<smem>>
    %1020 = vector.extract_strided_slice %968 {offsets = [2, 0], sizes = [1, 256], strides = [1, 1]} : vector<4x256xf32> to vector<1x256xf32>
    %1021 = vector.broadcast %1019 : f32 to vector<1x256xf32>
    %1022 = arith.mulf %1021, %1020 : vector<1x256xf32>
    %1023 = arith.addf %1018, %1022 : vector<1x256xf32>
    %c101_103 = arith.constant 101 : index
    %1024 = memref.load %arg2[%c101_103] : memref<144xf32, #tpu.memory_space<smem>>
    %1025 = vector.extract_strided_slice %968 {offsets = [3, 0], sizes = [1, 256], strides = [1, 1]} : vector<4x256xf32> to vector<1x256xf32>
    %1026 = vector.broadcast %1024 : f32 to vector<1x256xf32>
    %1027 = arith.mulf %1026, %1025 : vector<1x256xf32>
    %1028 = arith.addf %1023, %1027 : vector<1x256xf32>
    %c110_104 = arith.constant 110 : index
    %1029 = memref.load %arg2[%c110_104] : memref<144xf32, #tpu.memory_space<smem>>
    %1030 = vector.extract_strided_slice %968 {offsets = [0, 0], sizes = [1, 256], strides = [1, 1]} : vector<4x256xf32> to vector<1x256xf32>
    %1031 = vector.broadcast %1029 : f32 to vector<1x256xf32>
    %1032 = arith.mulf %1031, %1030 : vector<1x256xf32>
    %1033 = arith.addf %961, %1032 : vector<1x256xf32>
    %c119_105 = arith.constant 119 : index
    %1034 = memref.load %arg2[%c119_105] : memref<144xf32, #tpu.memory_space<smem>>
    %1035 = vector.extract_strided_slice %968 {offsets = [1, 0], sizes = [1, 256], strides = [1, 1]} : vector<4x256xf32> to vector<1x256xf32>
    %1036 = vector.broadcast %1034 : f32 to vector<1x256xf32>
    %1037 = arith.mulf %1036, %1035 : vector<1x256xf32>
    %1038 = arith.addf %1033, %1037 : vector<1x256xf32>
    %c128_106 = arith.constant 128 : index
    %1039 = memref.load %arg2[%c128_106] : memref<144xf32, #tpu.memory_space<smem>>
    %1040 = vector.extract_strided_slice %968 {offsets = [2, 0], sizes = [1, 256], strides = [1, 1]} : vector<4x256xf32> to vector<1x256xf32>
    %1041 = vector.broadcast %1039 : f32 to vector<1x256xf32>
    %1042 = arith.mulf %1041, %1040 : vector<1x256xf32>
    %1043 = arith.addf %1038, %1042 : vector<1x256xf32>
    %c137_107 = arith.constant 137 : index
    %1044 = memref.load %arg2[%c137_107] : memref<144xf32, #tpu.memory_space<smem>>
    %1045 = vector.extract_strided_slice %968 {offsets = [3, 0], sizes = [1, 256], strides = [1, 1]} : vector<4x256xf32> to vector<1x256xf32>
    %1046 = vector.broadcast %1044 : f32 to vector<1x256xf32>
    %1047 = arith.mulf %1046, %1045 : vector<1x256xf32>
    %1048 = arith.addf %1043, %1047 : vector<1x256xf32>
    %cst_108 = arith.constant 0.000000e+00 : f32
    %1049 = vector.broadcast %cst_108 : f32 to vector<4x1xf32>
    %1050 = vector.extract_strided_slice %787 {offsets = [0, 0], sizes = [4, 255], strides = [1, 1]} : vector<4x256xf32> to vector<4x255xf32>
    %1051 = tpu.concatenate %1049, %1050 in 1 : vector<4x1xf32>, vector<4x255xf32> -> vector<4x256xf32>
    %c0_109 = arith.constant 0 : index
    %c0_110 = arith.constant 0 : index
    %c0_111 = arith.constant 0 : index
    %1052 = vector.load %arg3[%c0_109, %c0_110, %c0_111] : memref<3x1x256xf32, #tpu.memory_space<vmem>>, vector<1x1x256xf32>
    %1053 = vector.shape_cast %1052 : vector<1x1x256xf32> to vector<1x256xf32>
    %1054 = vector.broadcast %1053 : vector<1x256xf32> to vector<4x256xf32>
    %1055 = arith.mulf %1051, %1054 : vector<4x256xf32>
    %c3_112 = arith.constant 3 : index
    %1056 = memref.load %arg2[%c3_112] : memref<144xf32, #tpu.memory_space<smem>>
    %1057 = vector.extract_strided_slice %1055 {offsets = [0, 0], sizes = [1, 256], strides = [1, 1]} : vector<4x256xf32> to vector<1x256xf32>
    %1058 = vector.broadcast %1056 : f32 to vector<1x256xf32>
    %1059 = arith.mulf %1058, %1057 : vector<1x256xf32>
    %1060 = arith.addf %988, %1059 : vector<1x256xf32>
    %c12_113 = arith.constant 12 : index
    %1061 = memref.load %arg2[%c12_113] : memref<144xf32, #tpu.memory_space<smem>>
    %1062 = vector.extract_strided_slice %1055 {offsets = [1, 0], sizes = [1, 256], strides = [1, 1]} : vector<4x256xf32> to vector<1x256xf32>
    %1063 = vector.broadcast %1061 : f32 to vector<1x256xf32>
    %1064 = arith.mulf %1063, %1062 : vector<1x256xf32>
    %1065 = arith.addf %1060, %1064 : vector<1x256xf32>
    %c21_114 = arith.constant 21 : index
    %1066 = memref.load %arg2[%c21_114] : memref<144xf32, #tpu.memory_space<smem>>
    %1067 = vector.extract_strided_slice %1055 {offsets = [2, 0], sizes = [1, 256], strides = [1, 1]} : vector<4x256xf32> to vector<1x256xf32>
    %1068 = vector.broadcast %1066 : f32 to vector<1x256xf32>
    %1069 = arith.mulf %1068, %1067 : vector<1x256xf32>
    %1070 = arith.addf %1065, %1069 : vector<1x256xf32>
    %c30_115 = arith.constant 30 : index
    %1071 = memref.load %arg2[%c30_115] : memref<144xf32, #tpu.memory_space<smem>>
    %1072 = vector.extract_strided_slice %1055 {offsets = [3, 0], sizes = [1, 256], strides = [1, 1]} : vector<4x256xf32> to vector<1x256xf32>
    %1073 = vector.broadcast %1071 : f32 to vector<1x256xf32>
    %1074 = arith.mulf %1073, %1072 : vector<1x256xf32>
    %1075 = arith.addf %1070, %1074 : vector<1x256xf32>
    %c39_116 = arith.constant 39 : index
    %1076 = memref.load %arg2[%c39_116] : memref<144xf32, #tpu.memory_space<smem>>
    %1077 = vector.extract_strided_slice %1055 {offsets = [0, 0], sizes = [1, 256], strides = [1, 1]} : vector<4x256xf32> to vector<1x256xf32>
    %1078 = vector.broadcast %1076 : f32 to vector<1x256xf32>
    %1079 = arith.mulf %1078, %1077 : vector<1x256xf32>
    %1080 = arith.addf %1008, %1079 : vector<1x256xf32>
    %c48_117 = arith.constant 48 : index
    %1081 = memref.load %arg2[%c48_117] : memref<144xf32, #tpu.memory_space<smem>>
    %1082 = vector.extract_strided_slice %1055 {offsets = [1, 0], sizes = [1, 256], strides = [1, 1]} : vector<4x256xf32> to vector<1x256xf32>
    %1083 = vector.broadcast %1081 : f32 to vector<1x256xf32>
    %1084 = arith.mulf %1083, %1082 : vector<1x256xf32>
    %1085 = arith.addf %1080, %1084 : vector<1x256xf32>
    %c57_118 = arith.constant 57 : index
    %1086 = memref.load %arg2[%c57_118] : memref<144xf32, #tpu.memory_space<smem>>
    %1087 = vector.extract_strided_slice %1055 {offsets = [2, 0], sizes = [1, 256], strides = [1, 1]} : vector<4x256xf32> to vector<1x256xf32>
    %1088 = vector.broadcast %1086 : f32 to vector<1x256xf32>
    %1089 = arith.mulf %1088, %1087 : vector<1x256xf32>
    %1090 = arith.addf %1085, %1089 : vector<1x256xf32>
    %c66_119 = arith.constant 66 : index
    %1091 = memref.load %arg2[%c66_119] : memref<144xf32, #tpu.memory_space<smem>>
    %1092 = vector.extract_strided_slice %1055 {offsets = [3, 0], sizes = [1, 256], strides = [1, 1]} : vector<4x256xf32> to vector<1x256xf32>
    %1093 = vector.broadcast %1091 : f32 to vector<1x256xf32>
    %1094 = arith.mulf %1093, %1092 : vector<1x256xf32>
    %1095 = arith.addf %1090, %1094 : vector<1x256xf32>
    %c75_120 = arith.constant 75 : index
    %1096 = memref.load %arg2[%c75_120] : memref<144xf32, #tpu.memory_space<smem>>
    %1097 = vector.extract_strided_slice %1055 {offsets = [0, 0], sizes = [1, 256], strides = [1, 1]} : vector<4x256xf32> to vector<1x256xf32>
    %1098 = vector.broadcast %1096 : f32 to vector<1x256xf32>
    %1099 = arith.mulf %1098, %1097 : vector<1x256xf32>
    %1100 = arith.addf %1028, %1099 : vector<1x256xf32>
    %c84_121 = arith.constant 84 : index
    %1101 = memref.load %arg2[%c84_121] : memref<144xf32, #tpu.memory_space<smem>>
    %1102 = vector.extract_strided_slice %1055 {offsets = [1, 0], sizes = [1, 256], strides = [1, 1]} : vector<4x256xf32> to vector<1x256xf32>
    %1103 = vector.broadcast %1101 : f32 to vector<1x256xf32>
    %1104 = arith.mulf %1103, %1102 : vector<1x256xf32>
    %1105 = arith.addf %1100, %1104 : vector<1x256xf32>
    %c93_122 = arith.constant 93 : index
    %1106 = memref.load %arg2[%c93_122] : memref<144xf32, #tpu.memory_space<smem>>
    %1107 = vector.extract_strided_slice %1055 {offsets = [2, 0], sizes = [1, 256], strides = [1, 1]} : vector<4x256xf32> to vector<1x256xf32>
    %1108 = vector.broadcast %1106 : f32 to vector<1x256xf32>
    %1109 = arith.mulf %1108, %1107 : vector<1x256xf32>
    %1110 = arith.addf %1105, %1109 : vector<1x256xf32>
    %c102_123 = arith.constant 102 : index
    %1111 = memref.load %arg2[%c102_123] : memref<144xf32, #tpu.memory_space<smem>>
    %1112 = vector.extract_strided_slice %1055 {offsets = [3, 0], sizes = [1, 256], strides = [1, 1]} : vector<4x256xf32> to vector<1x256xf32>
    %1113 = vector.broadcast %1111 : f32 to vector<1x256xf32>
    %1114 = arith.mulf %1113, %1112 : vector<1x256xf32>
    %1115 = arith.addf %1110, %1114 : vector<1x256xf32>
    %c111_124 = arith.constant 111 : index
    %1116 = memref.load %arg2[%c111_124] : memref<144xf32, #tpu.memory_space<smem>>
    %1117 = vector.extract_strided_slice %1055 {offsets = [0, 0], sizes = [1, 256], strides = [1, 1]} : vector<4x256xf32> to vector<1x256xf32>
    %1118 = vector.broadcast %1116 : f32 to vector<1x256xf32>
    %1119 = arith.mulf %1118, %1117 : vector<1x256xf32>
    %1120 = arith.addf %1048, %1119 : vector<1x256xf32>
    %c120_125 = arith.constant 120 : index
    %1121 = memref.load %arg2[%c120_125] : memref<144xf32, #tpu.memory_space<smem>>
    %1122 = vector.extract_strided_slice %1055 {offsets = [1, 0], sizes = [1, 256], strides = [1, 1]} : vector<4x256xf32> to vector<1x256xf32>
    %1123 = vector.broadcast %1121 : f32 to vector<1x256xf32>
    %1124 = arith.mulf %1123, %1122 : vector<1x256xf32>
    %1125 = arith.addf %1120, %1124 : vector<1x256xf32>
    %c129_126 = arith.constant 129 : index
    %1126 = memref.load %arg2[%c129_126] : memref<144xf32, #tpu.memory_space<smem>>
    %1127 = vector.extract_strided_slice %1055 {offsets = [2, 0], sizes = [1, 256], strides = [1, 1]} : vector<4x256xf32> to vector<1x256xf32>
    %1128 = vector.broadcast %1126 : f32 to vector<1x256xf32>
    %1129 = arith.mulf %1128, %1127 : vector<1x256xf32>
    %1130 = arith.addf %1125, %1129 : vector<1x256xf32>
    %c138_127 = arith.constant 138 : index
    %1131 = memref.load %arg2[%c138_127] : memref<144xf32, #tpu.memory_space<smem>>
    %1132 = vector.extract_strided_slice %1055 {offsets = [3, 0], sizes = [1, 256], strides = [1, 1]} : vector<4x256xf32> to vector<1x256xf32>
    %1133 = vector.broadcast %1131 : f32 to vector<1x256xf32>
    %1134 = arith.mulf %1133, %1132 : vector<1x256xf32>
    %1135 = arith.addf %1130, %1134 : vector<1x256xf32>
    %c4_128 = arith.constant 4 : index
    %1136 = memref.load %arg2[%c4_128] : memref<144xf32, #tpu.memory_space<smem>>
    %1137 = vector.extract_strided_slice %787 {offsets = [0, 0], sizes = [1, 256], strides = [1, 1]} : vector<4x256xf32> to vector<1x256xf32>
    %1138 = vector.broadcast %1136 : f32 to vector<1x256xf32>
    %1139 = arith.mulf %1138, %1137 : vector<1x256xf32>
    %1140 = arith.addf %1075, %1139 : vector<1x256xf32>
    %c13_129 = arith.constant 13 : index
    %1141 = memref.load %arg2[%c13_129] : memref<144xf32, #tpu.memory_space<smem>>
    %1142 = vector.extract_strided_slice %787 {offsets = [1, 0], sizes = [1, 256], strides = [1, 1]} : vector<4x256xf32> to vector<1x256xf32>
    %1143 = vector.broadcast %1141 : f32 to vector<1x256xf32>
    %1144 = arith.mulf %1143, %1142 : vector<1x256xf32>
    %1145 = arith.addf %1140, %1144 : vector<1x256xf32>
    %c22_130 = arith.constant 22 : index
    %1146 = memref.load %arg2[%c22_130] : memref<144xf32, #tpu.memory_space<smem>>
    %1147 = vector.extract_strided_slice %787 {offsets = [2, 0], sizes = [1, 256], strides = [1, 1]} : vector<4x256xf32> to vector<1x256xf32>
    %1148 = vector.broadcast %1146 : f32 to vector<1x256xf32>
    %1149 = arith.mulf %1148, %1147 : vector<1x256xf32>
    %1150 = arith.addf %1145, %1149 : vector<1x256xf32>
    %c31_131 = arith.constant 31 : index
    %1151 = memref.load %arg2[%c31_131] : memref<144xf32, #tpu.memory_space<smem>>
    %1152 = vector.extract_strided_slice %787 {offsets = [3, 0], sizes = [1, 256], strides = [1, 1]} : vector<4x256xf32> to vector<1x256xf32>
    %1153 = vector.broadcast %1151 : f32 to vector<1x256xf32>
    %1154 = arith.mulf %1153, %1152 : vector<1x256xf32>
    %1155 = arith.addf %1150, %1154 : vector<1x256xf32>
    %c40_132 = arith.constant 40 : index
    %1156 = memref.load %arg2[%c40_132] : memref<144xf32, #tpu.memory_space<smem>>
    %1157 = vector.extract_strided_slice %787 {offsets = [0, 0], sizes = [1, 256], strides = [1, 1]} : vector<4x256xf32> to vector<1x256xf32>
    %1158 = vector.broadcast %1156 : f32 to vector<1x256xf32>
    %1159 = arith.mulf %1158, %1157 : vector<1x256xf32>
    %1160 = arith.addf %1095, %1159 : vector<1x256xf32>
    %c49_133 = arith.constant 49 : index
    %1161 = memref.load %arg2[%c49_133] : memref<144xf32, #tpu.memory_space<smem>>
    %1162 = vector.extract_strided_slice %787 {offsets = [1, 0], sizes = [1, 256], strides = [1, 1]} : vector<4x256xf32> to vector<1x256xf32>
    %1163 = vector.broadcast %1161 : f32 to vector<1x256xf32>
    %1164 = arith.mulf %1163, %1162 : vector<1x256xf32>
    %1165 = arith.addf %1160, %1164 : vector<1x256xf32>
    %c58_134 = arith.constant 58 : index
    %1166 = memref.load %arg2[%c58_134] : memref<144xf32, #tpu.memory_space<smem>>
    %1167 = vector.extract_strided_slice %787 {offsets = [2, 0], sizes = [1, 256], strides = [1, 1]} : vector<4x256xf32> to vector<1x256xf32>
    %1168 = vector.broadcast %1166 : f32 to vector<1x256xf32>
    %1169 = arith.mulf %1168, %1167 : vector<1x256xf32>
    %1170 = arith.addf %1165, %1169 : vector<1x256xf32>
    %c67_135 = arith.constant 67 : index
    %1171 = memref.load %arg2[%c67_135] : memref<144xf32, #tpu.memory_space<smem>>
    %1172 = vector.extract_strided_slice %787 {offsets = [3, 0], sizes = [1, 256], strides = [1, 1]} : vector<4x256xf32> to vector<1x256xf32>
    %1173 = vector.broadcast %1171 : f32 to vector<1x256xf32>
    %1174 = arith.mulf %1173, %1172 : vector<1x256xf32>
    %1175 = arith.addf %1170, %1174 : vector<1x256xf32>
    %c76_136 = arith.constant 76 : index
    %1176 = memref.load %arg2[%c76_136] : memref<144xf32, #tpu.memory_space<smem>>
    %1177 = vector.extract_strided_slice %787 {offsets = [0, 0], sizes = [1, 256], strides = [1, 1]} : vector<4x256xf32> to vector<1x256xf32>
    %1178 = vector.broadcast %1176 : f32 to vector<1x256xf32>
    %1179 = arith.mulf %1178, %1177 : vector<1x256xf32>
    %1180 = arith.addf %1115, %1179 : vector<1x256xf32>
    %c85_137 = arith.constant 85 : index
    %1181 = memref.load %arg2[%c85_137] : memref<144xf32, #tpu.memory_space<smem>>
    %1182 = vector.extract_strided_slice %787 {offsets = [1, 0], sizes = [1, 256], strides = [1, 1]} : vector<4x256xf32> to vector<1x256xf32>
    %1183 = vector.broadcast %1181 : f32 to vector<1x256xf32>
    %1184 = arith.mulf %1183, %1182 : vector<1x256xf32>
    %1185 = arith.addf %1180, %1184 : vector<1x256xf32>
    %c94_138 = arith.constant 94 : index
    %1186 = memref.load %arg2[%c94_138] : memref<144xf32, #tpu.memory_space<smem>>
    %1187 = vector.extract_strided_slice %787 {offsets = [2, 0], sizes = [1, 256], strides = [1, 1]} : vector<4x256xf32> to vector<1x256xf32>
    %1188 = vector.broadcast %1186 : f32 to vector<1x256xf32>
    %1189 = arith.mulf %1188, %1187 : vector<1x256xf32>
    %1190 = arith.addf %1185, %1189 : vector<1x256xf32>
    %c103_139 = arith.constant 103 : index
    %1191 = memref.load %arg2[%c103_139] : memref<144xf32, #tpu.memory_space<smem>>
    %1192 = vector.extract_strided_slice %787 {offsets = [3, 0], sizes = [1, 256], strides = [1, 1]} : vector<4x256xf32> to vector<1x256xf32>
    %1193 = vector.broadcast %1191 : f32 to vector<1x256xf32>
    %1194 = arith.mulf %1193, %1192 : vector<1x256xf32>
    %1195 = arith.addf %1190, %1194 : vector<1x256xf32>
    %c112_140 = arith.constant 112 : index
    %1196 = memref.load %arg2[%c112_140] : memref<144xf32, #tpu.memory_space<smem>>
    %1197 = vector.extract_strided_slice %787 {offsets = [0, 0], sizes = [1, 256], strides = [1, 1]} : vector<4x256xf32> to vector<1x256xf32>
    %1198 = vector.broadcast %1196 : f32 to vector<1x256xf32>
    %1199 = arith.mulf %1198, %1197 : vector<1x256xf32>
    %1200 = arith.addf %1135, %1199 : vector<1x256xf32>
    %c121_141 = arith.constant 121 : index
    %1201 = memref.load %arg2[%c121_141] : memref<144xf32, #tpu.memory_space<smem>>
    %1202 = vector.extract_strided_slice %787 {offsets = [1, 0], sizes = [1, 256], strides = [1, 1]} : vector<4x256xf32> to vector<1x256xf32>
    %1203 = vector.broadcast %1201 : f32 to vector<1x256xf32>
    %1204 = arith.mulf %1203, %1202 : vector<1x256xf32>
    %1205 = arith.addf %1200, %1204 : vector<1x256xf32>
    %c130_142 = arith.constant 130 : index
    %1206 = memref.load %arg2[%c130_142] : memref<144xf32, #tpu.memory_space<smem>>
    %1207 = vector.extract_strided_slice %787 {offsets = [2, 0], sizes = [1, 256], strides = [1, 1]} : vector<4x256xf32> to vector<1x256xf32>
    %1208 = vector.broadcast %1206 : f32 to vector<1x256xf32>
    %1209 = arith.mulf %1208, %1207 : vector<1x256xf32>
    %1210 = arith.addf %1205, %1209 : vector<1x256xf32>
    %c139_143 = arith.constant 139 : index
    %1211 = memref.load %arg2[%c139_143] : memref<144xf32, #tpu.memory_space<smem>>
    %1212 = vector.extract_strided_slice %787 {offsets = [3, 0], sizes = [1, 256], strides = [1, 1]} : vector<4x256xf32> to vector<1x256xf32>
    %1213 = vector.broadcast %1211 : f32 to vector<1x256xf32>
    %1214 = arith.mulf %1213, %1212 : vector<1x256xf32>
    %1215 = arith.addf %1210, %1214 : vector<1x256xf32>
    %1216 = vector.extract_strided_slice %787 {offsets = [0, 1], sizes = [4, 255], strides = [1, 1]} : vector<4x256xf32> to vector<4x255xf32>
    %cst_144 = arith.constant 0.000000e+00 : f32
    %1217 = vector.broadcast %cst_144 : f32 to vector<4x1xf32>
    %1218 = tpu.concatenate %1216, %1217 in 1 : vector<4x255xf32>, vector<4x1xf32> -> vector<4x256xf32>
    %c2_145 = arith.constant 2 : index
    %c0_146 = arith.constant 0 : index
    %c0_147 = arith.constant 0 : index
    %1219 = vector.load %arg3[%c2_145, %c0_146, %c0_147] : memref<3x1x256xf32, #tpu.memory_space<vmem>>, vector<1x1x256xf32>
    %1220 = vector.shape_cast %1219 : vector<1x1x256xf32> to vector<1x256xf32>
    %1221 = vector.broadcast %1220 : vector<1x256xf32> to vector<4x256xf32>
    %1222 = arith.mulf %1218, %1221 : vector<4x256xf32>
    %c5_148 = arith.constant 5 : index
    %1223 = memref.load %arg2[%c5_148] : memref<144xf32, #tpu.memory_space<smem>>
    %1224 = vector.extract_strided_slice %1222 {offsets = [0, 0], sizes = [1, 256], strides = [1, 1]} : vector<4x256xf32> to vector<1x256xf32>
    %1225 = vector.broadcast %1223 : f32 to vector<1x256xf32>
    %1226 = arith.mulf %1225, %1224 : vector<1x256xf32>
    %1227 = arith.addf %1155, %1226 : vector<1x256xf32>
    %c14_149 = arith.constant 14 : index
    %1228 = memref.load %arg2[%c14_149] : memref<144xf32, #tpu.memory_space<smem>>
    %1229 = vector.extract_strided_slice %1222 {offsets = [1, 0], sizes = [1, 256], strides = [1, 1]} : vector<4x256xf32> to vector<1x256xf32>
    %1230 = vector.broadcast %1228 : f32 to vector<1x256xf32>
    %1231 = arith.mulf %1230, %1229 : vector<1x256xf32>
    %1232 = arith.addf %1227, %1231 : vector<1x256xf32>
    %c23_150 = arith.constant 23 : index
    %1233 = memref.load %arg2[%c23_150] : memref<144xf32, #tpu.memory_space<smem>>
    %1234 = vector.extract_strided_slice %1222 {offsets = [2, 0], sizes = [1, 256], strides = [1, 1]} : vector<4x256xf32> to vector<1x256xf32>
    %1235 = vector.broadcast %1233 : f32 to vector<1x256xf32>
    %1236 = arith.mulf %1235, %1234 : vector<1x256xf32>
    %1237 = arith.addf %1232, %1236 : vector<1x256xf32>
    %c32_151 = arith.constant 32 : index
    %1238 = memref.load %arg2[%c32_151] : memref<144xf32, #tpu.memory_space<smem>>
    %1239 = vector.extract_strided_slice %1222 {offsets = [3, 0], sizes = [1, 256], strides = [1, 1]} : vector<4x256xf32> to vector<1x256xf32>
    %1240 = vector.broadcast %1238 : f32 to vector<1x256xf32>
    %1241 = arith.mulf %1240, %1239 : vector<1x256xf32>
    %1242 = arith.addf %1237, %1241 : vector<1x256xf32>
    %c41_152 = arith.constant 41 : index
    %1243 = memref.load %arg2[%c41_152] : memref<144xf32, #tpu.memory_space<smem>>
    %1244 = vector.extract_strided_slice %1222 {offsets = [0, 0], sizes = [1, 256], strides = [1, 1]} : vector<4x256xf32> to vector<1x256xf32>
    %1245 = vector.broadcast %1243 : f32 to vector<1x256xf32>
    %1246 = arith.mulf %1245, %1244 : vector<1x256xf32>
    %1247 = arith.addf %1175, %1246 : vector<1x256xf32>
    %c50_153 = arith.constant 50 : index
    %1248 = memref.load %arg2[%c50_153] : memref<144xf32, #tpu.memory_space<smem>>
    %1249 = vector.extract_strided_slice %1222 {offsets = [1, 0], sizes = [1, 256], strides = [1, 1]} : vector<4x256xf32> to vector<1x256xf32>
    %1250 = vector.broadcast %1248 : f32 to vector<1x256xf32>
    %1251 = arith.mulf %1250, %1249 : vector<1x256xf32>
    %1252 = arith.addf %1247, %1251 : vector<1x256xf32>
    %c59_154 = arith.constant 59 : index
    %1253 = memref.load %arg2[%c59_154] : memref<144xf32, #tpu.memory_space<smem>>
    %1254 = vector.extract_strided_slice %1222 {offsets = [2, 0], sizes = [1, 256], strides = [1, 1]} : vector<4x256xf32> to vector<1x256xf32>
    %1255 = vector.broadcast %1253 : f32 to vector<1x256xf32>
    %1256 = arith.mulf %1255, %1254 : vector<1x256xf32>
    %1257 = arith.addf %1252, %1256 : vector<1x256xf32>
    %c68_155 = arith.constant 68 : index
    %1258 = memref.load %arg2[%c68_155] : memref<144xf32, #tpu.memory_space<smem>>
    %1259 = vector.extract_strided_slice %1222 {offsets = [3, 0], sizes = [1, 256], strides = [1, 1]} : vector<4x256xf32> to vector<1x256xf32>
    %1260 = vector.broadcast %1258 : f32 to vector<1x256xf32>
    %1261 = arith.mulf %1260, %1259 : vector<1x256xf32>
    %1262 = arith.addf %1257, %1261 : vector<1x256xf32>
    %c77_156 = arith.constant 77 : index
    %1263 = memref.load %arg2[%c77_156] : memref<144xf32, #tpu.memory_space<smem>>
    %1264 = vector.extract_strided_slice %1222 {offsets = [0, 0], sizes = [1, 256], strides = [1, 1]} : vector<4x256xf32> to vector<1x256xf32>
    %1265 = vector.broadcast %1263 : f32 to vector<1x256xf32>
    %1266 = arith.mulf %1265, %1264 : vector<1x256xf32>
    %1267 = arith.addf %1195, %1266 : vector<1x256xf32>
    %c86_157 = arith.constant 86 : index
    %1268 = memref.load %arg2[%c86_157] : memref<144xf32, #tpu.memory_space<smem>>
    %1269 = vector.extract_strided_slice %1222 {offsets = [1, 0], sizes = [1, 256], strides = [1, 1]} : vector<4x256xf32> to vector<1x256xf32>
    %1270 = vector.broadcast %1268 : f32 to vector<1x256xf32>
    %1271 = arith.mulf %1270, %1269 : vector<1x256xf32>
    %1272 = arith.addf %1267, %1271 : vector<1x256xf32>
    %c95_158 = arith.constant 95 : index
    %1273 = memref.load %arg2[%c95_158] : memref<144xf32, #tpu.memory_space<smem>>
    %1274 = vector.extract_strided_slice %1222 {offsets = [2, 0], sizes = [1, 256], strides = [1, 1]} : vector<4x256xf32> to vector<1x256xf32>
    %1275 = vector.broadcast %1273 : f32 to vector<1x256xf32>
    %1276 = arith.mulf %1275, %1274 : vector<1x256xf32>
    %1277 = arith.addf %1272, %1276 : vector<1x256xf32>
    %c104_159 = arith.constant 104 : index
    %1278 = memref.load %arg2[%c104_159] : memref<144xf32, #tpu.memory_space<smem>>
    %1279 = vector.extract_strided_slice %1222 {offsets = [3, 0], sizes = [1, 256], strides = [1, 1]} : vector<4x256xf32> to vector<1x256xf32>
    %1280 = vector.broadcast %1278 : f32 to vector<1x256xf32>
    %1281 = arith.mulf %1280, %1279 : vector<1x256xf32>
    %1282 = arith.addf %1277, %1281 : vector<1x256xf32>
    %c113_160 = arith.constant 113 : index
    %1283 = memref.load %arg2[%c113_160] : memref<144xf32, #tpu.memory_space<smem>>
    %1284 = vector.extract_strided_slice %1222 {offsets = [0, 0], sizes = [1, 256], strides = [1, 1]} : vector<4x256xf32> to vector<1x256xf32>
    %1285 = vector.broadcast %1283 : f32 to vector<1x256xf32>
    %1286 = arith.mulf %1285, %1284 : vector<1x256xf32>
    %1287 = arith.addf %1215, %1286 : vector<1x256xf32>
    %c122_161 = arith.constant 122 : index
    %1288 = memref.load %arg2[%c122_161] : memref<144xf32, #tpu.memory_space<smem>>
    %1289 = vector.extract_strided_slice %1222 {offsets = [1, 0], sizes = [1, 256], strides = [1, 1]} : vector<4x256xf32> to vector<1x256xf32>
    %1290 = vector.broadcast %1288 : f32 to vector<1x256xf32>
    %1291 = arith.mulf %1290, %1289 : vector<1x256xf32>
    %1292 = arith.addf %1287, %1291 : vector<1x256xf32>
    %c131_162 = arith.constant 131 : index
    %1293 = memref.load %arg2[%c131_162] : memref<144xf32, #tpu.memory_space<smem>>
    %1294 = vector.extract_strided_slice %1222 {offsets = [2, 0], sizes = [1, 256], strides = [1, 1]} : vector<4x256xf32> to vector<1x256xf32>
    %1295 = vector.broadcast %1293 : f32 to vector<1x256xf32>
    %1296 = arith.mulf %1295, %1294 : vector<1x256xf32>
    %1297 = arith.addf %1292, %1296 : vector<1x256xf32>
    %c140_163 = arith.constant 140 : index
    %1298 = memref.load %arg2[%c140_163] : memref<144xf32, #tpu.memory_space<smem>>
    %1299 = vector.extract_strided_slice %1222 {offsets = [3, 0], sizes = [1, 256], strides = [1, 1]} : vector<4x256xf32> to vector<1x256xf32>
    %1300 = vector.broadcast %1298 : f32 to vector<1x256xf32>
    %1301 = arith.mulf %1300, %1299 : vector<1x256xf32>
    %1302 = arith.addf %1297, %1301 : vector<1x256xf32>
    %1303 = vector.extract_strided_slice %787 {offsets = [0, 15], sizes = [4, 241], strides = [1, 1]} : vector<4x256xf32> to vector<4x241xf32>
    %cst_164 = arith.constant 0.000000e+00 : f32
    %1304 = vector.broadcast %cst_164 : f32 to vector<4x15xf32>
    %1305 = tpu.concatenate %1303, %1304 in 1 : vector<4x241xf32>, vector<4x15xf32> -> vector<4x256xf32>
    %c0_165 = arith.constant 0 : index
    %c0_166 = arith.constant 0 : index
    %c0_167 = arith.constant 0 : index
    %1306 = vector.load %arg3[%c0_165, %c0_166, %c0_167] : memref<3x1x256xf32, #tpu.memory_space<vmem>>, vector<1x1x256xf32>
    %1307 = vector.shape_cast %1306 : vector<1x1x256xf32> to vector<1x256xf32>
    %1308 = vector.broadcast %1307 : vector<1x256xf32> to vector<4x256xf32>
    %1309 = arith.mulf %1305, %1308 : vector<4x256xf32>
    %c6_168 = arith.constant 6 : index
    %1310 = memref.load %arg2[%c6_168] : memref<144xf32, #tpu.memory_space<smem>>
    %1311 = vector.extract_strided_slice %1309 {offsets = [0, 0], sizes = [1, 256], strides = [1, 1]} : vector<4x256xf32> to vector<1x256xf32>
    %1312 = vector.broadcast %1310 : f32 to vector<1x256xf32>
    %1313 = arith.mulf %1312, %1311 : vector<1x256xf32>
    %1314 = arith.addf %1242, %1313 : vector<1x256xf32>
    %c15_169 = arith.constant 15 : index
    %1315 = memref.load %arg2[%c15_169] : memref<144xf32, #tpu.memory_space<smem>>
    %1316 = vector.extract_strided_slice %1309 {offsets = [1, 0], sizes = [1, 256], strides = [1, 1]} : vector<4x256xf32> to vector<1x256xf32>
    %1317 = vector.broadcast %1315 : f32 to vector<1x256xf32>
    %1318 = arith.mulf %1317, %1316 : vector<1x256xf32>
    %1319 = arith.addf %1314, %1318 : vector<1x256xf32>
    %c24_170 = arith.constant 24 : index
    %1320 = memref.load %arg2[%c24_170] : memref<144xf32, #tpu.memory_space<smem>>
    %1321 = vector.extract_strided_slice %1309 {offsets = [2, 0], sizes = [1, 256], strides = [1, 1]} : vector<4x256xf32> to vector<1x256xf32>
    %1322 = vector.broadcast %1320 : f32 to vector<1x256xf32>
    %1323 = arith.mulf %1322, %1321 : vector<1x256xf32>
    %1324 = arith.addf %1319, %1323 : vector<1x256xf32>
    %c33_171 = arith.constant 33 : index
    %1325 = memref.load %arg2[%c33_171] : memref<144xf32, #tpu.memory_space<smem>>
    %1326 = vector.extract_strided_slice %1309 {offsets = [3, 0], sizes = [1, 256], strides = [1, 1]} : vector<4x256xf32> to vector<1x256xf32>
    %1327 = vector.broadcast %1325 : f32 to vector<1x256xf32>
    %1328 = arith.mulf %1327, %1326 : vector<1x256xf32>
    %1329 = arith.addf %1324, %1328 : vector<1x256xf32>
    %c42_172 = arith.constant 42 : index
    %1330 = memref.load %arg2[%c42_172] : memref<144xf32, #tpu.memory_space<smem>>
    %1331 = vector.extract_strided_slice %1309 {offsets = [0, 0], sizes = [1, 256], strides = [1, 1]} : vector<4x256xf32> to vector<1x256xf32>
    %1332 = vector.broadcast %1330 : f32 to vector<1x256xf32>
    %1333 = arith.mulf %1332, %1331 : vector<1x256xf32>
    %1334 = arith.addf %1262, %1333 : vector<1x256xf32>
    %c51_173 = arith.constant 51 : index
    %1335 = memref.load %arg2[%c51_173] : memref<144xf32, #tpu.memory_space<smem>>
    %1336 = vector.extract_strided_slice %1309 {offsets = [1, 0], sizes = [1, 256], strides = [1, 1]} : vector<4x256xf32> to vector<1x256xf32>
    %1337 = vector.broadcast %1335 : f32 to vector<1x256xf32>
    %1338 = arith.mulf %1337, %1336 : vector<1x256xf32>
    %1339 = arith.addf %1334, %1338 : vector<1x256xf32>
    %c60_174 = arith.constant 60 : index
    %1340 = memref.load %arg2[%c60_174] : memref<144xf32, #tpu.memory_space<smem>>
    %1341 = vector.extract_strided_slice %1309 {offsets = [2, 0], sizes = [1, 256], strides = [1, 1]} : vector<4x256xf32> to vector<1x256xf32>
    %1342 = vector.broadcast %1340 : f32 to vector<1x256xf32>
    %1343 = arith.mulf %1342, %1341 : vector<1x256xf32>
    %1344 = arith.addf %1339, %1343 : vector<1x256xf32>
    %c69_175 = arith.constant 69 : index
    %1345 = memref.load %arg2[%c69_175] : memref<144xf32, #tpu.memory_space<smem>>
    %1346 = vector.extract_strided_slice %1309 {offsets = [3, 0], sizes = [1, 256], strides = [1, 1]} : vector<4x256xf32> to vector<1x256xf32>
    %1347 = vector.broadcast %1345 : f32 to vector<1x256xf32>
    %1348 = arith.mulf %1347, %1346 : vector<1x256xf32>
    %1349 = arith.addf %1344, %1348 : vector<1x256xf32>
    %c78_176 = arith.constant 78 : index
    %1350 = memref.load %arg2[%c78_176] : memref<144xf32, #tpu.memory_space<smem>>
    %1351 = vector.extract_strided_slice %1309 {offsets = [0, 0], sizes = [1, 256], strides = [1, 1]} : vector<4x256xf32> to vector<1x256xf32>
    %1352 = vector.broadcast %1350 : f32 to vector<1x256xf32>
    %1353 = arith.mulf %1352, %1351 : vector<1x256xf32>
    %1354 = arith.addf %1282, %1353 : vector<1x256xf32>
    %c87_177 = arith.constant 87 : index
    %1355 = memref.load %arg2[%c87_177] : memref<144xf32, #tpu.memory_space<smem>>
    %1356 = vector.extract_strided_slice %1309 {offsets = [1, 0], sizes = [1, 256], strides = [1, 1]} : vector<4x256xf32> to vector<1x256xf32>
    %1357 = vector.broadcast %1355 : f32 to vector<1x256xf32>
    %1358 = arith.mulf %1357, %1356 : vector<1x256xf32>
    %1359 = arith.addf %1354, %1358 : vector<1x256xf32>
    %c96_178 = arith.constant 96 : index
    %1360 = memref.load %arg2[%c96_178] : memref<144xf32, #tpu.memory_space<smem>>
    %1361 = vector.extract_strided_slice %1309 {offsets = [2, 0], sizes = [1, 256], strides = [1, 1]} : vector<4x256xf32> to vector<1x256xf32>
    %1362 = vector.broadcast %1360 : f32 to vector<1x256xf32>
    %1363 = arith.mulf %1362, %1361 : vector<1x256xf32>
    %1364 = arith.addf %1359, %1363 : vector<1x256xf32>
    %c105_179 = arith.constant 105 : index
    %1365 = memref.load %arg2[%c105_179] : memref<144xf32, #tpu.memory_space<smem>>
    %1366 = vector.extract_strided_slice %1309 {offsets = [3, 0], sizes = [1, 256], strides = [1, 1]} : vector<4x256xf32> to vector<1x256xf32>
    %1367 = vector.broadcast %1365 : f32 to vector<1x256xf32>
    %1368 = arith.mulf %1367, %1366 : vector<1x256xf32>
    %1369 = arith.addf %1364, %1368 : vector<1x256xf32>
    %c114_180 = arith.constant 114 : index
    %1370 = memref.load %arg2[%c114_180] : memref<144xf32, #tpu.memory_space<smem>>
    %1371 = vector.extract_strided_slice %1309 {offsets = [0, 0], sizes = [1, 256], strides = [1, 1]} : vector<4x256xf32> to vector<1x256xf32>
    %1372 = vector.broadcast %1370 : f32 to vector<1x256xf32>
    %1373 = arith.mulf %1372, %1371 : vector<1x256xf32>
    %1374 = arith.addf %1302, %1373 : vector<1x256xf32>
    %c123_181 = arith.constant 123 : index
    %1375 = memref.load %arg2[%c123_181] : memref<144xf32, #tpu.memory_space<smem>>
    %1376 = vector.extract_strided_slice %1309 {offsets = [1, 0], sizes = [1, 256], strides = [1, 1]} : vector<4x256xf32> to vector<1x256xf32>
    %1377 = vector.broadcast %1375 : f32 to vector<1x256xf32>
    %1378 = arith.mulf %1377, %1376 : vector<1x256xf32>
    %1379 = arith.addf %1374, %1378 : vector<1x256xf32>
    %c132_182 = arith.constant 132 : index
    %1380 = memref.load %arg2[%c132_182] : memref<144xf32, #tpu.memory_space<smem>>
    %1381 = vector.extract_strided_slice %1309 {offsets = [2, 0], sizes = [1, 256], strides = [1, 1]} : vector<4x256xf32> to vector<1x256xf32>
    %1382 = vector.broadcast %1380 : f32 to vector<1x256xf32>
    %1383 = arith.mulf %1382, %1381 : vector<1x256xf32>
    %1384 = arith.addf %1379, %1383 : vector<1x256xf32>
    %c141_183 = arith.constant 141 : index
    %1385 = memref.load %arg2[%c141_183] : memref<144xf32, #tpu.memory_space<smem>>
    %1386 = vector.extract_strided_slice %1309 {offsets = [3, 0], sizes = [1, 256], strides = [1, 1]} : vector<4x256xf32> to vector<1x256xf32>
    %1387 = vector.broadcast %1385 : f32 to vector<1x256xf32>
    %1388 = arith.mulf %1387, %1386 : vector<1x256xf32>
    %1389 = arith.addf %1384, %1388 : vector<1x256xf32>
    %1390 = vector.extract_strided_slice %787 {offsets = [0, 16], sizes = [4, 240], strides = [1, 1]} : vector<4x256xf32> to vector<4x240xf32>
    %cst_184 = arith.constant 0.000000e+00 : f32
    %1391 = vector.broadcast %cst_184 : f32 to vector<4x16xf32>
    %1392 = tpu.concatenate %1390, %1391 in 1 : vector<4x240xf32>, vector<4x16xf32> -> vector<4x256xf32>
    %c7_185 = arith.constant 7 : index
    %1393 = memref.load %arg2[%c7_185] : memref<144xf32, #tpu.memory_space<smem>>
    %1394 = vector.extract_strided_slice %1392 {offsets = [0, 0], sizes = [1, 256], strides = [1, 1]} : vector<4x256xf32> to vector<1x256xf32>
    %1395 = vector.broadcast %1393 : f32 to vector<1x256xf32>
    %1396 = arith.mulf %1395, %1394 : vector<1x256xf32>
    %1397 = arith.addf %1329, %1396 : vector<1x256xf32>
    %c16_186 = arith.constant 16 : index
    %1398 = memref.load %arg2[%c16_186] : memref<144xf32, #tpu.memory_space<smem>>
    %1399 = vector.extract_strided_slice %1392 {offsets = [1, 0], sizes = [1, 256], strides = [1, 1]} : vector<4x256xf32> to vector<1x256xf32>
    %1400 = vector.broadcast %1398 : f32 to vector<1x256xf32>
    %1401 = arith.mulf %1400, %1399 : vector<1x256xf32>
    %1402 = arith.addf %1397, %1401 : vector<1x256xf32>
    %c25_187 = arith.constant 25 : index
    %1403 = memref.load %arg2[%c25_187] : memref<144xf32, #tpu.memory_space<smem>>
    %1404 = vector.extract_strided_slice %1392 {offsets = [2, 0], sizes = [1, 256], strides = [1, 1]} : vector<4x256xf32> to vector<1x256xf32>
    %1405 = vector.broadcast %1403 : f32 to vector<1x256xf32>
    %1406 = arith.mulf %1405, %1404 : vector<1x256xf32>
    %1407 = arith.addf %1402, %1406 : vector<1x256xf32>
    %c34_188 = arith.constant 34 : index
    %1408 = memref.load %arg2[%c34_188] : memref<144xf32, #tpu.memory_space<smem>>
    %1409 = vector.extract_strided_slice %1392 {offsets = [3, 0], sizes = [1, 256], strides = [1, 1]} : vector<4x256xf32> to vector<1x256xf32>
    %1410 = vector.broadcast %1408 : f32 to vector<1x256xf32>
    %1411 = arith.mulf %1410, %1409 : vector<1x256xf32>
    %1412 = arith.addf %1407, %1411 : vector<1x256xf32>
    %c43_189 = arith.constant 43 : index
    %1413 = memref.load %arg2[%c43_189] : memref<144xf32, #tpu.memory_space<smem>>
    %1414 = vector.extract_strided_slice %1392 {offsets = [0, 0], sizes = [1, 256], strides = [1, 1]} : vector<4x256xf32> to vector<1x256xf32>
    %1415 = vector.broadcast %1413 : f32 to vector<1x256xf32>
    %1416 = arith.mulf %1415, %1414 : vector<1x256xf32>
    %1417 = arith.addf %1349, %1416 : vector<1x256xf32>
    %c52_190 = arith.constant 52 : index
    %1418 = memref.load %arg2[%c52_190] : memref<144xf32, #tpu.memory_space<smem>>
    %1419 = vector.extract_strided_slice %1392 {offsets = [1, 0], sizes = [1, 256], strides = [1, 1]} : vector<4x256xf32> to vector<1x256xf32>
    %1420 = vector.broadcast %1418 : f32 to vector<1x256xf32>
    %1421 = arith.mulf %1420, %1419 : vector<1x256xf32>
    %1422 = arith.addf %1417, %1421 : vector<1x256xf32>
    %c61_191 = arith.constant 61 : index
    %1423 = memref.load %arg2[%c61_191] : memref<144xf32, #tpu.memory_space<smem>>
    %1424 = vector.extract_strided_slice %1392 {offsets = [2, 0], sizes = [1, 256], strides = [1, 1]} : vector<4x256xf32> to vector<1x256xf32>
    %1425 = vector.broadcast %1423 : f32 to vector<1x256xf32>
    %1426 = arith.mulf %1425, %1424 : vector<1x256xf32>
    %1427 = arith.addf %1422, %1426 : vector<1x256xf32>
    %c70_192 = arith.constant 70 : index
    %1428 = memref.load %arg2[%c70_192] : memref<144xf32, #tpu.memory_space<smem>>
    %1429 = vector.extract_strided_slice %1392 {offsets = [3, 0], sizes = [1, 256], strides = [1, 1]} : vector<4x256xf32> to vector<1x256xf32>
    %1430 = vector.broadcast %1428 : f32 to vector<1x256xf32>
    %1431 = arith.mulf %1430, %1429 : vector<1x256xf32>
    %1432 = arith.addf %1427, %1431 : vector<1x256xf32>
    %c79_193 = arith.constant 79 : index
    %1433 = memref.load %arg2[%c79_193] : memref<144xf32, #tpu.memory_space<smem>>
    %1434 = vector.extract_strided_slice %1392 {offsets = [0, 0], sizes = [1, 256], strides = [1, 1]} : vector<4x256xf32> to vector<1x256xf32>
    %1435 = vector.broadcast %1433 : f32 to vector<1x256xf32>
    %1436 = arith.mulf %1435, %1434 : vector<1x256xf32>
    %1437 = arith.addf %1369, %1436 : vector<1x256xf32>
    %c88_194 = arith.constant 88 : index
    %1438 = memref.load %arg2[%c88_194] : memref<144xf32, #tpu.memory_space<smem>>
    %1439 = vector.extract_strided_slice %1392 {offsets = [1, 0], sizes = [1, 256], strides = [1, 1]} : vector<4x256xf32> to vector<1x256xf32>
    %1440 = vector.broadcast %1438 : f32 to vector<1x256xf32>
    %1441 = arith.mulf %1440, %1439 : vector<1x256xf32>
    %1442 = arith.addf %1437, %1441 : vector<1x256xf32>
    %c97_195 = arith.constant 97 : index
    %1443 = memref.load %arg2[%c97_195] : memref<144xf32, #tpu.memory_space<smem>>
    %1444 = vector.extract_strided_slice %1392 {offsets = [2, 0], sizes = [1, 256], strides = [1, 1]} : vector<4x256xf32> to vector<1x256xf32>
    %1445 = vector.broadcast %1443 : f32 to vector<1x256xf32>
    %1446 = arith.mulf %1445, %1444 : vector<1x256xf32>
    %1447 = arith.addf %1442, %1446 : vector<1x256xf32>
    %c106_196 = arith.constant 106 : index
    %1448 = memref.load %arg2[%c106_196] : memref<144xf32, #tpu.memory_space<smem>>
    %1449 = vector.extract_strided_slice %1392 {offsets = [3, 0], sizes = [1, 256], strides = [1, 1]} : vector<4x256xf32> to vector<1x256xf32>
    %1450 = vector.broadcast %1448 : f32 to vector<1x256xf32>
    %1451 = arith.mulf %1450, %1449 : vector<1x256xf32>
    %1452 = arith.addf %1447, %1451 : vector<1x256xf32>
    %c115_197 = arith.constant 115 : index
    %1453 = memref.load %arg2[%c115_197] : memref<144xf32, #tpu.memory_space<smem>>
    %1454 = vector.extract_strided_slice %1392 {offsets = [0, 0], sizes = [1, 256], strides = [1, 1]} : vector<4x256xf32> to vector<1x256xf32>
    %1455 = vector.broadcast %1453 : f32 to vector<1x256xf32>
    %1456 = arith.mulf %1455, %1454 : vector<1x256xf32>
    %1457 = arith.addf %1389, %1456 : vector<1x256xf32>
    %c124_198 = arith.constant 124 : index
    %1458 = memref.load %arg2[%c124_198] : memref<144xf32, #tpu.memory_space<smem>>
    %1459 = vector.extract_strided_slice %1392 {offsets = [1, 0], sizes = [1, 256], strides = [1, 1]} : vector<4x256xf32> to vector<1x256xf32>
    %1460 = vector.broadcast %1458 : f32 to vector<1x256xf32>
    %1461 = arith.mulf %1460, %1459 : vector<1x256xf32>
    %1462 = arith.addf %1457, %1461 : vector<1x256xf32>
    %c133_199 = arith.constant 133 : index
    %1463 = memref.load %arg2[%c133_199] : memref<144xf32, #tpu.memory_space<smem>>
    %1464 = vector.extract_strided_slice %1392 {offsets = [2, 0], sizes = [1, 256], strides = [1, 1]} : vector<4x256xf32> to vector<1x256xf32>
    %1465 = vector.broadcast %1463 : f32 to vector<1x256xf32>
    %1466 = arith.mulf %1465, %1464 : vector<1x256xf32>
    %1467 = arith.addf %1462, %1466 : vector<1x256xf32>
    %c142_200 = arith.constant 142 : index
    %1468 = memref.load %arg2[%c142_200] : memref<144xf32, #tpu.memory_space<smem>>
    %1469 = vector.extract_strided_slice %1392 {offsets = [3, 0], sizes = [1, 256], strides = [1, 1]} : vector<4x256xf32> to vector<1x256xf32>
    %1470 = vector.broadcast %1468 : f32 to vector<1x256xf32>
    %1471 = arith.mulf %1470, %1469 : vector<1x256xf32>
    %1472 = arith.addf %1467, %1471 : vector<1x256xf32>
    %1473 = vector.extract_strided_slice %787 {offsets = [0, 17], sizes = [4, 239], strides = [1, 1]} : vector<4x256xf32> to vector<4x239xf32>
    %cst_201 = arith.constant 0.000000e+00 : f32
    %1474 = vector.broadcast %cst_201 : f32 to vector<4x17xf32>
    %1475 = tpu.concatenate %1473, %1474 in 1 : vector<4x239xf32>, vector<4x17xf32> -> vector<4x256xf32>
    %c2_202 = arith.constant 2 : index
    %c0_203 = arith.constant 0 : index
    %c0_204 = arith.constant 0 : index
    %1476 = vector.load %arg3[%c2_202, %c0_203, %c0_204] : memref<3x1x256xf32, #tpu.memory_space<vmem>>, vector<1x1x256xf32>
    %1477 = vector.shape_cast %1476 : vector<1x1x256xf32> to vector<1x256xf32>
    %1478 = vector.broadcast %1477 : vector<1x256xf32> to vector<4x256xf32>
    %1479 = arith.mulf %1475, %1478 : vector<4x256xf32>
    %c8_205 = arith.constant 8 : index
    %1480 = memref.load %arg2[%c8_205] : memref<144xf32, #tpu.memory_space<smem>>
    %1481 = vector.extract_strided_slice %1479 {offsets = [0, 0], sizes = [1, 256], strides = [1, 1]} : vector<4x256xf32> to vector<1x256xf32>
    %1482 = vector.broadcast %1480 : f32 to vector<1x256xf32>
    %1483 = arith.mulf %1482, %1481 : vector<1x256xf32>
    %1484 = arith.addf %1412, %1483 : vector<1x256xf32>
    %c17_206 = arith.constant 17 : index
    %1485 = memref.load %arg2[%c17_206] : memref<144xf32, #tpu.memory_space<smem>>
    %1486 = vector.extract_strided_slice %1479 {offsets = [1, 0], sizes = [1, 256], strides = [1, 1]} : vector<4x256xf32> to vector<1x256xf32>
    %1487 = vector.broadcast %1485 : f32 to vector<1x256xf32>
    %1488 = arith.mulf %1487, %1486 : vector<1x256xf32>
    %1489 = arith.addf %1484, %1488 : vector<1x256xf32>
    %c26_207 = arith.constant 26 : index
    %1490 = memref.load %arg2[%c26_207] : memref<144xf32, #tpu.memory_space<smem>>
    %1491 = vector.extract_strided_slice %1479 {offsets = [2, 0], sizes = [1, 256], strides = [1, 1]} : vector<4x256xf32> to vector<1x256xf32>
    %1492 = vector.broadcast %1490 : f32 to vector<1x256xf32>
    %1493 = arith.mulf %1492, %1491 : vector<1x256xf32>
    %1494 = arith.addf %1489, %1493 : vector<1x256xf32>
    %c35_208 = arith.constant 35 : index
    %1495 = memref.load %arg2[%c35_208] : memref<144xf32, #tpu.memory_space<smem>>
    %1496 = vector.extract_strided_slice %1479 {offsets = [3, 0], sizes = [1, 256], strides = [1, 1]} : vector<4x256xf32> to vector<1x256xf32>
    %1497 = vector.broadcast %1495 : f32 to vector<1x256xf32>
    %1498 = arith.mulf %1497, %1496 : vector<1x256xf32>
    %1499 = arith.addf %1494, %1498 : vector<1x256xf32>
    %c44_209 = arith.constant 44 : index
    %1500 = memref.load %arg2[%c44_209] : memref<144xf32, #tpu.memory_space<smem>>
    %1501 = vector.extract_strided_slice %1479 {offsets = [0, 0], sizes = [1, 256], strides = [1, 1]} : vector<4x256xf32> to vector<1x256xf32>
    %1502 = vector.broadcast %1500 : f32 to vector<1x256xf32>
    %1503 = arith.mulf %1502, %1501 : vector<1x256xf32>
    %1504 = arith.addf %1432, %1503 : vector<1x256xf32>
    %c53_210 = arith.constant 53 : index
    %1505 = memref.load %arg2[%c53_210] : memref<144xf32, #tpu.memory_space<smem>>
    %1506 = vector.extract_strided_slice %1479 {offsets = [1, 0], sizes = [1, 256], strides = [1, 1]} : vector<4x256xf32> to vector<1x256xf32>
    %1507 = vector.broadcast %1505 : f32 to vector<1x256xf32>
    %1508 = arith.mulf %1507, %1506 : vector<1x256xf32>
    %1509 = arith.addf %1504, %1508 : vector<1x256xf32>
    %c62_211 = arith.constant 62 : index
    %1510 = memref.load %arg2[%c62_211] : memref<144xf32, #tpu.memory_space<smem>>
    %1511 = vector.extract_strided_slice %1479 {offsets = [2, 0], sizes = [1, 256], strides = [1, 1]} : vector<4x256xf32> to vector<1x256xf32>
    %1512 = vector.broadcast %1510 : f32 to vector<1x256xf32>
    %1513 = arith.mulf %1512, %1511 : vector<1x256xf32>
    %1514 = arith.addf %1509, %1513 : vector<1x256xf32>
    %c71_212 = arith.constant 71 : index
    %1515 = memref.load %arg2[%c71_212] : memref<144xf32, #tpu.memory_space<smem>>
    %1516 = vector.extract_strided_slice %1479 {offsets = [3, 0], sizes = [1, 256], strides = [1, 1]} : vector<4x256xf32> to vector<1x256xf32>
    %1517 = vector.broadcast %1515 : f32 to vector<1x256xf32>
    %1518 = arith.mulf %1517, %1516 : vector<1x256xf32>
    %1519 = arith.addf %1514, %1518 : vector<1x256xf32>
    %c80_213 = arith.constant 80 : index
    %1520 = memref.load %arg2[%c80_213] : memref<144xf32, #tpu.memory_space<smem>>
    %1521 = vector.extract_strided_slice %1479 {offsets = [0, 0], sizes = [1, 256], strides = [1, 1]} : vector<4x256xf32> to vector<1x256xf32>
    %1522 = vector.broadcast %1520 : f32 to vector<1x256xf32>
    %1523 = arith.mulf %1522, %1521 : vector<1x256xf32>
    %1524 = arith.addf %1452, %1523 : vector<1x256xf32>
    %c89_214 = arith.constant 89 : index
    %1525 = memref.load %arg2[%c89_214] : memref<144xf32, #tpu.memory_space<smem>>
    %1526 = vector.extract_strided_slice %1479 {offsets = [1, 0], sizes = [1, 256], strides = [1, 1]} : vector<4x256xf32> to vector<1x256xf32>
    %1527 = vector.broadcast %1525 : f32 to vector<1x256xf32>
    %1528 = arith.mulf %1527, %1526 : vector<1x256xf32>
    %1529 = arith.addf %1524, %1528 : vector<1x256xf32>
    %c98_215 = arith.constant 98 : index
    %1530 = memref.load %arg2[%c98_215] : memref<144xf32, #tpu.memory_space<smem>>
    %1531 = vector.extract_strided_slice %1479 {offsets = [2, 0], sizes = [1, 256], strides = [1, 1]} : vector<4x256xf32> to vector<1x256xf32>
    %1532 = vector.broadcast %1530 : f32 to vector<1x256xf32>
    %1533 = arith.mulf %1532, %1531 : vector<1x256xf32>
    %1534 = arith.addf %1529, %1533 : vector<1x256xf32>
    %c107_216 = arith.constant 107 : index
    %1535 = memref.load %arg2[%c107_216] : memref<144xf32, #tpu.memory_space<smem>>
    %1536 = vector.extract_strided_slice %1479 {offsets = [3, 0], sizes = [1, 256], strides = [1, 1]} : vector<4x256xf32> to vector<1x256xf32>
    %1537 = vector.broadcast %1535 : f32 to vector<1x256xf32>
    %1538 = arith.mulf %1537, %1536 : vector<1x256xf32>
    %1539 = arith.addf %1534, %1538 : vector<1x256xf32>
    %c116_217 = arith.constant 116 : index
    %1540 = memref.load %arg2[%c116_217] : memref<144xf32, #tpu.memory_space<smem>>
    %1541 = vector.extract_strided_slice %1479 {offsets = [0, 0], sizes = [1, 256], strides = [1, 1]} : vector<4x256xf32> to vector<1x256xf32>
    %1542 = vector.broadcast %1540 : f32 to vector<1x256xf32>
    %1543 = arith.mulf %1542, %1541 : vector<1x256xf32>
    %1544 = arith.addf %1472, %1543 : vector<1x256xf32>
    %c125_218 = arith.constant 125 : index
    %1545 = memref.load %arg2[%c125_218] : memref<144xf32, #tpu.memory_space<smem>>
    %1546 = vector.extract_strided_slice %1479 {offsets = [1, 0], sizes = [1, 256], strides = [1, 1]} : vector<4x256xf32> to vector<1x256xf32>
    %1547 = vector.broadcast %1545 : f32 to vector<1x256xf32>
    %1548 = arith.mulf %1547, %1546 : vector<1x256xf32>
    %1549 = arith.addf %1544, %1548 : vector<1x256xf32>
    %c134_219 = arith.constant 134 : index
    %1550 = memref.load %arg2[%c134_219] : memref<144xf32, #tpu.memory_space<smem>>
    %1551 = vector.extract_strided_slice %1479 {offsets = [2, 0], sizes = [1, 256], strides = [1, 1]} : vector<4x256xf32> to vector<1x256xf32>
    %1552 = vector.broadcast %1550 : f32 to vector<1x256xf32>
    %1553 = arith.mulf %1552, %1551 : vector<1x256xf32>
    %1554 = arith.addf %1549, %1553 : vector<1x256xf32>
    %c143_220 = arith.constant 143 : index
    %1555 = memref.load %arg2[%c143_220] : memref<144xf32, #tpu.memory_space<smem>>
    %1556 = vector.extract_strided_slice %1479 {offsets = [3, 0], sizes = [1, 256], strides = [1, 1]} : vector<4x256xf32> to vector<1x256xf32>
    %1557 = vector.broadcast %1555 : f32 to vector<1x256xf32>
    %1558 = arith.mulf %1557, %1556 : vector<1x256xf32>
    %1559 = arith.addf %1554, %1558 : vector<1x256xf32>
    %c1_221 = arith.constant 1 : index
    %c0_222 = arith.constant 0 : index
    %c0_223 = arith.constant 0 : index
    %1560 = vector.load %arg4[%c1_221, %c0_222, %c0_223] : memref<2x4x256xf32, #tpu.memory_space<vmem>>, vector<1x1x256xf32>
    %1561 = vector.shape_cast %1560 : vector<1x1x256xf32> to vector<1x256xf32>
    %1562 = vector.shape_cast %1499 : vector<1x256xf32> to vector<1x1x256xf32>
    tpu.vector_store %arg4[%c1_221, %c0_222, %c0_223], %1562 {strides = array<i32>} : memref<2x4x256xf32, #tpu.memory_space<vmem>>, vector<1x1x256xf32>,
    %c1_224 = arith.constant 1 : index
    %c1_225 = arith.constant 1 : index
    %c0_226 = arith.constant 0 : index
    %1563 = vector.load %arg4[%c1_224, %c1_225, %c0_226] : memref<2x4x256xf32, #tpu.memory_space<vmem>>, vector<1x1x256xf32>
    %1564 = vector.shape_cast %1563 : vector<1x1x256xf32> to vector<1x256xf32>
    %1565 = vector.shape_cast %1519 : vector<1x256xf32> to vector<1x1x256xf32>
    tpu.vector_store %arg4[%c1_224, %c1_225, %c0_226], %1565 {strides = array<i32>} : memref<2x4x256xf32, #tpu.memory_space<vmem>>, vector<1x1x256xf32>,
    %c1_227 = arith.constant 1 : index
    %c2_228 = arith.constant 2 : index
    %c0_229 = arith.constant 0 : index
    %1566 = vector.load %arg4[%c1_227, %c2_228, %c0_229] : memref<2x4x256xf32, #tpu.memory_space<vmem>>, vector<1x1x256xf32>
    %1567 = vector.shape_cast %1566 : vector<1x1x256xf32> to vector<1x256xf32>
    %1568 = vector.shape_cast %1539 : vector<1x256xf32> to vector<1x1x256xf32>
    tpu.vector_store %arg4[%c1_227, %c2_228, %c0_229], %1568 {strides = array<i32>} : memref<2x4x256xf32, #tpu.memory_space<vmem>>, vector<1x1x256xf32>,
    %c1_230 = arith.constant 1 : index
    %c3_231 = arith.constant 3 : index
    %c0_232 = arith.constant 0 : index
    %1569 = vector.load %arg4[%c1_230, %c3_231, %c0_232] : memref<2x4x256xf32, #tpu.memory_space<vmem>>, vector<1x1x256xf32>
    %1570 = vector.shape_cast %1569 : vector<1x1x256xf32> to vector<1x256xf32>
    %1571 = vector.shape_cast %1559 : vector<1x256xf32> to vector<1x1x256xf32>
    tpu.vector_store %arg4[%c1_230, %c3_231, %c0_232], %1571 {strides = array<i32>} : memref<2x4x256xf32, #tpu.memory_space<vmem>>, vector<1x1x256xf32>,
    return
  }
  func.func @transform_0(%arg0: i32) -> (i32, i32, i32) {
    %c0_i32 = arith.constant 0 : i32
    %c0_i32_0 = arith.constant 0 : i32
    %c0_i32_1 = arith.constant 0 : i32
    return %arg0, %c0_i32, %c0_i32_0 : i32, i32, i32
  }
  func.func @transform_1(%arg0: i32) -> i32 {
    %c0_i32 = arith.constant 0 : i32
    %c0_i32_0 = arith.constant 0 : i32
    return %c0_i32 : i32
  }
  func.func @transform_2(%arg0: i32) -> (i32, i32, i32) {
    %c0_i32 = arith.constant 0 : i32
    %c0_i32_0 = arith.constant 0 : i32
    %c0_i32_1 = arith.constant 0 : i32
    %c0_i32_2 = arith.constant 0 : i32
    return %c0_i32, %c0_i32_0, %c0_i32_1 : i32, i32, i32
  }
  func.func @transform_3(%arg0: i32) -> (i32, i32, i32) {
    %c0_i32 = arith.constant 0 : i32
    %c0_i32_0 = arith.constant 0 : i32
    %c0_i32_1 = arith.constant 0 : i32
    return %arg0, %c0_i32, %c0_i32_0 : i32, i32, i32
  }
}

</mosaic_0001>

<bundles_post_ra>
// kernel: tpu_custom_call.1
= control target key start
LH: loop header
LB: loop body
LE: loop exit
PB: predicated region body
PF: predicated region fallthrough
CT: control target
= control target key end

     0   :  { %8 = vsyncpa [#allocation3], 0  ;;  %s5910_s0 = inlined_call_operand.hbm [shape: f32[2,4,256], index: 0, kind: input, shape index: {}]   ;;  %s5911_s1 = inlined_call_operand.hbm [shape: f32[144], index: 1, kind: input, shape index: {}]   ;;  %s5912_s2 = inlined_call_operand.hbm [shape: f32[3,1,256], index: 2, kind: input, shape index: {}]   ;;  %s5913_s3 = inlined_call_operand.hbm [shape: f32[2,4,256], index: 3, kind: output, shape index: {}]  }
   0x1   :  { %9 = vsyncpa [#allocation5], 0 }
   0x2   :  { %10 = vsyncpa [#allocation8], 0 }
   0x3   :  { %11 = vsyncpa [#allocation4], 0  ;;  %s16_s14 = sshll.u32 %s5910_s0, 4  ;;  %s3784_s15 = smov [#allocation2]   ;;  %s17_s14 = int_to_ptr.hbm [resolvable:$true] %s16_s14 }
   0x4   :  { %s18_s16 = sshll.u32 %s3784_s15, 4  ;;  %s30_s19 = sshll.u32 %s5911_s1, 4  ;;  %s19_s16 = int_to_ptr.vmem [resolvable:$true] %s18_s16  ;;  %s31_s19 = int_to_ptr.hbm [resolvable:$true] %s30_s19 }
   0x5   :  { %s3785_s20 = smov 128   ;;  %s3786_s21 = smov 8  }
   0x6   :  { %24 = dma.hbm_to_vmem [thread:$0]  %s17_s14, 256, %s19_s16, [#allocation3], %s3785_s20, %s3785_s20, %s3786_s21  }
   0x7   :  { %s3787_s22 = smov [#allocation6]   ;;  %s38_s0 = sshll.u32 %s5912_s2, 4  ;;  %s39_s0 = int_to_ptr.hbm [resolvable:$true] %s38_s0 }
   0x8   :  { %33 = dma.hbm_to_smem %s31_s19, 32, %s3787_s22, [#allocation5]  }
   0x9   :  { %s3788_s25 = smov [#allocation7]   ;;  %s3789_s27 = smov 32  }
   0xa   :  { %s40_s26 = sshll.u32 %s3788_s25, 4  ;;  %s3790_s28 = smov 2   ;;  %s41_s26 = int_to_ptr.vmem [resolvable:$true] %s40_s26 }
   0xb   :  { %46 = dma.hbm_to_vmem [thread:$0]  %s39_s0, 96, %s41_s26, [#allocation8], %s3789_s27, %s3789_s27, %s3790_s28  }
   0xc   :  { %3776 = dma.done.wait [#allocation3], 256  }
   0xd   :  { %3777 = vsyncadd [#allocation3], 4294967040 }
   0xe   :  { %3778 = dma.done.wait [#allocation5], 32  }
   0xf   :  { %3779 = vsyncadd [#allocation5], 4294967264 }
  0x10   :  { %3780 = dma.done.wait [#allocation8], 96  }
  0x11   :  { %3781 = vsyncadd [#allocation8], 4294967200 }
  0x12   :  { %59 = sfence }
  0x13   :  { %v3832_v0 = vld [vmem:[#allocation2] sm:$0xff]  ;;  %s3791_s1 = smov 17   ;;  %s3792_s2 = smov 16   ;;  %v3850_v15 = vld [vmem:[#allocation2 + $0x8] sm:$0xff]  ;;  %v3884_v32 = vld [vmem:[#allocation7] sm:$0x3] }
  0x14   :  { %5951 = vst [vmem:[#allocation14_spill] sm:$0xff] %v3832_v0  ;;  %s3793_s29 = smov 15   ;;  %s3794_s30 = smov 1   ;;  %vm69_vm0 = vcmask 138240   ;;  %v3891_v33 = vperm.slane %v3884_v32, 0  ;;  %vm257_vm1 = vcmask 130048  }
  0x15   :  { %62 = vst [vmem:[#allocation1] ss:$2 sm:$0xff] %v3832_v0  ;;  %s3795_s4 = smov 127   ;;  %s3796_s5 = smov 113   ;;  %vm437_vm2 = vcmask 121856   ;;  %vm626_vm3 = vcmask 7168  }
  0x16   :  { %5952 = vst [vmem:[#allocation15_spill] sm:$0xff] %v3850_v15  ;;  %s3872_s6 = sld [smem:[#allocation6]]  ;;  %s3797_s9 = smov 112   ;;  %vm1150_vm4 = vcmask 924672   ;;  %vm968_vm5 = vcmask 1039360   ;;  %vm1332_vm6 = vcmask 916480  }
  0x17   :  { %s3390_s7 = sld [smem:[#allocation6 + $0x9]]  ;;  %5953 = vst [vmem:[#allocation16_spill] sm:$0xff] %v3891_v33  ;;  %s3798_s27 = smov 111   ;;  %vm1512_vm7 = vcmask 908288   ;;  %vm1690_vm8 = vcmask 1040384  }
  0x18   :  { %s3874_s8 = sld [smem:[#allocation6 + $0x12]] }
  0x19   :  { %s3880_s10 = sld [smem:[#allocation6 + $0x1b]] }
  0x1a   :  { %s3882_s11 = sld [smem:[#allocation6 + $0x24]] }
  0x1b   :  { %s3394_s12 = sld [smem:[#allocation6 + $0x2d]] }
  0x1c   :  { %v63_v1 = vld.sshfl [vmem:[#allocation1] sm:$0xff pattern:$0x75316420]  ;;  %v64_v2 = vld.sshfl [vmem:[#allocation1 + $0x8] sm:$0xff pattern:$0x75316420]  ;;  %v3930_v43 = vstv %s3872_s6 }
  0x1d   :  { %65 = vrot.lane.b32.xlu0 %v63_v1, %s3791_s1  ;;  %250 = vst [vmem:[#allocation1] ss:$2 sm:$0xff] %v3832_v0  ;;  %s3886_s13 = sld [smem:[#allocation6 + $0x36]]  ;;  %v3910_v37 = vstv %s3390_s7 }
  0x1e   :  { %s3888_s14 = sld [smem:[#allocation6 + $0x3f]]  ;;  %v3925_v42 = vstv %s3874_s8 }
  0x1f   :  { %s3398_s15 = sld [smem:[#allocation6 + $0x51]]  ;;  %v3956_v50 = vstv %s3880_s10 }
  0x20   :  { %s3895_s16 = sld [smem:[#allocation6 + $0x48]]  ;;  %v3943_v46 = vstv %s3882_s11 }
  0x21   :  { %s3402_s17 = sld [smem:[#allocation6 + $0x75]]  ;;  %v3914_v38 = vstv %s3394_s12 }
  0x22   :  { %s3901_s18 = sld [smem:[#allocation6 + $0x5a]] }
  0x23   :  { %s3905_s19 = sld [smem:[#allocation6 + $0x63]]  ;;  %v3946_v47 = vstv %s3886_s13 }
  0x24   :  { %v251_v3 = vld.sshfl [vmem:[#allocation1] sm:$0xff pattern:$0x75316420]  ;;  %v252_v4 = vld.sshfl [vmem:[#allocation1 + $0x8] sm:$0xff pattern:$0x75316420]  ;;  %v3984_v61 = vstv %s3888_s14 }
  0x25   :  { %67 = vrot.lane.b32.xlu0 %v64_v2, %s3791_s1  ;;  %430 = vst [vmem:[#allocation1] ss:$2 sm:$0xff] %v3832_v0  ;;  %253 = vrot.lane.b32.xlu2 %v251_v3, %s3792_s2  ;;  %s3401_s22 = sld [smem:[#allocation6 + $0x6c]]  ;;  %v3918_v39 = vstv %s3398_s15 }
  0x26   :  { %s3912_s23 = sld [smem:[#allocation6 + $0x7e]]  ;;  %5954 = vst [vmem:[#allocation17_spill] sm:$0xff] %v3918_v39  ;;  %v3959_v51 = vstv %s3895_s16 }
  0x27   :  { %s3916_s24 = sld [smem:[#allocation6 + $0x87]]  ;;  %v3934_v45 = vstv %s3402_s17 }
  0x28   :  { %s3920_s0 = sld [smem:[#allocation6 + $0x1]]  ;;  %5955 = vst [vmem:[#allocation18_spill] sm:$0xff] %v3934_v45  ;;  %v3962_v52 = vstv %s3901_s18 }
  0x29   :  { %s3927_s25 = sld [smem:[#allocation6 + $0xa]]  ;;  %5956 = vst [vmem:[#allocation19_spill] sm:$0xff] %v3962_v52 }
  0x2a   :  { %s3936_s26 = sld [smem:[#allocation6 + $0x13]] }
  0x2b   :  { %s3950_s28 = sld [smem:[#allocation6 + $0x1c]]  ;;  %v3968_v55 = vstv %s3401_s22 }
  0x2c   :  { %v432_v5 = vld.sshfl [vmem:[#allocation1 + $0x8] sm:$0xff pattern:$0x75316420]  ;;  %v431_v6 = vld.sshfl [vmem:[#allocation1] sm:$0xff pattern:$0x75316420]  ;;  %v3979_v60 = vstv %s3912_s23 }
  0x2d   :  { %435 = vrot.lane.b32.xlu0 %v432_v5, %s3793_s29  ;;  %619 = vst [vmem:[#allocation1] ss:$2 sm:$0xff] %v3832_v0  ;;  %255 = vrot.lane.b32.xlu2 %v252_v4, %s3792_s2  ;;  %v3995_v4 = vstv %s3905_s19  ;;  %s4010_s6 = sld [smem:[#allocation6 + $0x5b]] }
  0x2e   :  { %5957 = vst [vmem:[#allocation20_spill] sm:$0xff] %v3968_v55  ;;  %s4016_s7 = sld [smem:[#allocation6 + $0x64]] }
  0x2f   :  { %5958 = vst [vmem:[#allocation21_spill] sm:$0xff] %v3979_v60  ;;  %s4023_s8 = sld [smem:[#allocation6 + $0x6d]] }
  0x30   :  { %s4029_s10 = sld [smem:[#allocation6 + $0x7f]] }
  0x31   :  { %s4031_s11 = sld [smem:[#allocation6 + $0x88]] }
  0x32   :  { %s4364_s12 = sld [smem:[#allocation6 + $0x2]] }
  0x33   :  { %s4373_s13 = sld [smem:[#allocation6 + $0xb]] }
  0x34   :  { %v620_v7 = vld.sshfl [vmem:[#allocation1] sm:$0xff pattern:$0x75316420]  ;;  %v621_v8 = vld.sshfl [vmem:[#allocation1 + $0x8] sm:$0xff pattern:$0x75316420] }
  0x35   :  { %961 = vst [vmem:[#allocation1] ss:$2 sm:$0xff] %v3832_v0  ;;  %433 = vrot.lane.b32.xlu2 %v431_v6, %s3793_s29  ;;  %s4385_s14 = sld [smem:[#allocation6 + $0x14]] }
  0x36   :  { %s4408_s15 = sld [smem:[#allocation6 + $0x1d]] }
  0x37   :  { %s4419_s16 = sld [smem:[#allocation6 + $0x26]] }
  0x38   :  { %s4431_s17 = sld [smem:[#allocation6 + $0x2f]] }
  0x39   :  { %s4444_s18 = sld [smem:[#allocation6 + $0x38]] }
  0x3a   :  { %s4470_s19 = sld [smem:[#allocation6 + $0x4a]] }
  0x3b   :  { %s4473_s22 = sld [smem:[#allocation6 + $0x41]] }
  0x3c   :  { %v962_v9 = vld.sshfl [vmem:[#allocation1] sm:$0xff pattern:$0x75316420]  ;;  %v963_v10 = vld.sshfl [vmem:[#allocation1 + $0x8] sm:$0xff pattern:$0x75316420] }
  0x3d   :  { %1143 = vst [vmem:[#allocation1] ss:$2 sm:$0xff] %v3832_v0  ;;  %s4480_s23 = sld [smem:[#allocation6 + $0x53]] }
  0x44   :  { %v1144_v11 = vld.sshfl [vmem:[#allocation1] sm:$0xff pattern:$0x75316420]  ;;  %v1145_v12 = vld.sshfl [vmem:[#allocation1 + $0x8] sm:$0xff pattern:$0x75316420] }
  0x45   :  { %1325 = vst [vmem:[#allocation1] ss:$2 sm:$0xff] %v3832_v0 }
  0x4c   :  { %v3847_v13 = vld.sshfl [vmem:[#allocation1] sm:$0xff pattern:$0x75316420]  ;;  %v1327_v14 = vld.sshfl [vmem:[#allocation1 + $0x8] sm:$0xff pattern:$0x75316420] }
  0x4d   :  { %1505 = vst [vmem:[#allocation1] ss:$2 sm:$0xff] %v3832_v0 }
  0x54   :  { %v3852_v16 = vld.sshfl [vmem:[#allocation1] sm:$0xff pattern:$0x75316420]  ;;  %v3854_v17 = vld.sshfl [vmem:[#allocation1 + $0x8] sm:$0xff pattern:$0x75316420] }
  0x55   :  { %1722 = vst [vmem:[#allocation1] ss:$2 sm:$0xff] %v3850_v15 }
  0x5c   :  { %v1723_v18 = vld.sshfl [vmem:[#allocation1] sm:$0xff pattern:$0x75316420]  ;;  %v1724_v19 = vld.sshfl [vmem:[#allocation1 + $0x8] sm:$0xff pattern:$0x75316420] }
  0x5d   :  { %1725 = vrot.lane.b32.xlu1 %v1723_v18, %s3791_s1  ;;  %1909 = vst [vmem:[#allocation1] ss:$2 sm:$0xff] %v3850_v15  ;;  %v4019_v18 = vperm.slane %v3884_v32, 1  ;;  %v4040_v32 = vstv %s3927_s25  ;;  %s4505_s25 = sld [smem:[#allocation6 + $0x65]] }
  0x5f   :  { %5960 = vst [vmem:[#allocation23_spill] sm:$0xff] %v4019_v18 }
  0x64   :  { %v1910_v20 = vld.sshfl [vmem:[#allocation1] sm:$0xff pattern:$0x75316420]  ;;  %v1911_v21 = vld.sshfl [vmem:[#allocation1 + $0x8] sm:$0xff pattern:$0x75316420] }
  0x65   :  { %1727 = vrot.lane.b32.xlu1 %v1724_v19, %s3791_s1  ;;  %1912 = vrot.lane.b32.xlu0 %v1910_v20, %s3792_s2  ;;  %2088 = vst [vmem:[#allocation1] ss:$2 sm:$0xff] %v3850_v15  ;;  %s3964_s1 = sld [smem:[#allocation6 + $0x25]] }
  0x6c   :  { %v2089_v22 = vld.sshfl [vmem:[#allocation1] sm:$0xff pattern:$0x75316420]  ;;  %v2090_v23 = vld.sshfl [vmem:[#allocation1 + $0x8] sm:$0xff pattern:$0x75316420] }
  0x6d   :  { %1914 = vrot.lane.b32.xlu1 %v1911_v21, %s3792_s2  ;;  %622 = vrot.lane.b32.xlu0 %v620_v7, %s3794_s30  ;;  %2275 = vst [vmem:[#allocation1] ss:$2 sm:$0xff] %v3850_v15  ;;  %s3972_s2 = sld [smem:[#allocation6 + $0x2e]] }
  0x6e   :  { %2093 = vrot.lane.b32.xlu2 %v2090_v23, %s3793_s29 }
  0x74   :  { %v2277_v24 = vld.sshfl [vmem:[#allocation1 + $0x8] sm:$0xff pattern:$0x75316420]  ;;  %v2276_v25 = vld.sshfl [vmem:[#allocation1] sm:$0xff pattern:$0x75316420] }
  0x75   :  { %2091 = vrot.lane.b32.xlu1 %v2089_v22, %s3793_s29  ;;  %2280 = vrot.lane.b32.xlu0 %v2277_v24, %s3794_s30  ;;  %2616 = vst [vmem:[#allocation1] ss:$2 sm:$0xff] %v3850_v15  ;;  %s3981_s29 = sld [smem:[#allocation6 + $0x37]] }
  0x76   :  { %2278 = vrot.lane.b32.xlu2 %v2276_v25, %s3794_s30 }
  0x7c   :  { %v2617_v26 = vld.sshfl [vmem:[#allocation1] sm:$0xff pattern:$0x75316420]  ;;  %v2618_v27 = vld.sshfl [vmem:[#allocation1 + $0x8] sm:$0xff pattern:$0x75316420] }
  0x7d   :  { %2797 = vst [vmem:[#allocation1] ss:$2 sm:$0xff] %v3850_v15  ;;  %624 = vrot.lane.b32.xlu1 %v621_v8, %s3794_s30  ;;  %964 = vrot.lane.b32.xlu0 %v962_v9, %s3795_s4  ;;  %s3990_s30 = sld [smem:[#allocation6 + $0x40]] }
  0x7e   :  { %1148 = vrot.lane.b32.xlu2 %v1145_v12, %s3796_s5 }
  0x84   :  { %v2799_v28 = vld.sshfl [vmem:[#allocation1 + $0x8] sm:$0xff pattern:$0x75316420]  ;;  %v2798_v29 = vld.sshfl [vmem:[#allocation1] sm:$0xff pattern:$0x75316420] }
  0x85   :  { %966 = vrot.lane.b32.xlu1 %v963_v10, %s3795_s4  ;;  %2802 = vrot.lane.b32.xlu0 %v2799_v28, %s3796_s5  ;;  %2978 = vst [vmem:[#allocation1] ss:$2 sm:$0xff] %v3850_v15 }
  0x86   :  { %2621 = vrot.lane.b32.xlu2 %v2618_v27, %s3795_s4 }
  0x8c   :  { %v2979_v30 = vld.sshfl [vmem:[#allocation1] sm:$0xff pattern:$0x75316420]  ;;  %v3876_v31 = vld.sshfl [vmem:[#allocation1 + $0x8] sm:$0xff pattern:$0x75316420] }
  0x8d   :  { %1146 = vrot.lane.b32.xlu1 %v1144_v11, %s3796_s5  ;;  %1330 = vrot.lane.b32.xlu0 %v1327_v14, %s3797_s9  ;;  %3157 = vst [vmem:[#allocation1] ss:$2 sm:$0xff] %v3850_v15 }
  0x8e   :  { %2800 = vrot.lane.b32.xlu2 %v2798_v29, %s3796_s5  ;;  %s4003_s5 = sld [smem:[#allocation6 + $0x52]] }
  0x8f   :  { %v3893_v34 = vpop.permute.xlu0 %65 }
  0x90   :  { %v73_v35 = vsel %vm69_vm0, 0.0, %v3893_v34 }
  0x91   :  { %v3908_v36 = vmul.f32 %v3891_v33, %v73_v35 }
  0x93   :  { %v90_v41 = vmul.f32 %v3910_v37, %v3908_v36  ;;  %v132_v44 = vmul.f32 %v3914_v38, %v3908_v36  ;;  %v174_v48 = vmul.f32 %v3918_v39, %v3908_v36  ;;  %v102_v49 = vmul.f32 %v3925_v42, %v3908_v36 }
  0x94   :  { %v3159_v40 = vld.sshfl [vmem:[#allocation1 + $0x8] sm:$0xff pattern:$0x75316420]  ;;  %v84_v53 = vmul.f32 %v3930_v43, %v3908_v36  ;;  %v216_v56 = vmul.f32 %v3934_v45, %v3908_v36  ;;  %v126_v57 = vmul.f32 %v3943_v46, %v3908_v36  ;;  %v144_v59 = vmul.f32 %v3946_v47, %v3908_v36  ;;  %v3158_v29 = vld.sshfl [vmem:[#allocation1] sm:$0xff pattern:$0x75316420] }
  0x95   :  { %2619 = vrot.lane.b32.xlu1 %v2617_v26, %s3795_s4  ;;  %2981 = vrot.lane.b32.xlu0 %v2979_v30, %s3797_s9  ;;  %v94_v54 = vrot.slane %v90_v41, 1  ;;  %v136_v58 = vrot.slane %v132_v44, 1  ;;  %v168_v62 = vmul.f32 %v3959_v51, %v3908_v36  ;;  %v178_v63 = vrot.slane %v174_v48, 1  ;;  %s3997_s4 = sld [smem:[#allocation6 + $0x49]] }
  0x96   :  { %1328 = vrot.lane.b32.xlu2 %v3847_v13, %s3797_s9  ;;  %v186_v1 = vmul.f32 %v3962_v52, %v3908_v36  ;;  %v106_v2 = vrot.slane %v102_v49, 2  ;;  %v114_v3 = vmul.f32 %v3956_v50, %v3908_v36  ;;  %v210_v7 = vmul.f32 %v3968_v55, %v3908_v36 }
  0x97   :  { %v68_v5 = vpop.permute.xlu0 %67  ;;  %v98_v6 = vadd.f32 %v94_v54, %v84_v53  ;;  %v220_v8 = vrot.slane %v216_v56, 1  ;;  %v228_v9 = vmul.f32 %v3979_v60, %v3908_v36  ;;  %v140_v10 = vadd.f32 %v136_v58, %v126_v57 }
  0x98   :  { %v148_v11 = vrot.slane %v144_v59, 2  ;;  %v156_v12 = vmul.f32 %v3984_v61, %v3908_v36  ;;  %v4008_v13 = vstv %s3916_s24  ;;  %v182_v14 = vadd.f32 %v178_v63, %v168_v62  ;;  %s4486_s24 = sld [smem:[#allocation6 + $0x5c]] }
  0x99   :  { %5959 = vst [vmem:[#allocation22_spill] sm:$0xff] %v4008_v13  ;;  %v70_v19 = vsel %vm69_vm0, %v3893_v34, %v68_v5  ;;  %v118_v20 = vrot.slane %v114_v3, 3  ;;  %v110_v21 = vadd.f32 %v106_v2, %v98_v6  ;;  %v224_v22 = vadd.f32 %v220_v8, %v210_v7  ;;  %v4042_v34 = vpop.permute.xlu2 %253 }
  0x9a   :  { %v232_v23 = vrot.slane %v228_v9, 2  ;;  %v240_v24 = vmul.f32 %v4008_v13, %v3908_v36  ;;  %v152_v25 = vadd.f32 %v148_v11, %v140_v10  ;;  %v160_v26 = vrot.slane %v156_v12, 3 }
  0x9b   :  { %v4034_v30 = vmul.f32 %v4019_v18, %v70_v19  ;;  %v122_v35 = vadd.f32 %v118_v20, %v110_v21  ;;  %v4046_v41 = vsel %vm257_vm1, 0.0, %v4042_v34  ;;  %v4049_v48 = vstv %s3936_s26  ;;  %s4513_s26 = sld [smem:[#allocation6 + $0x77]] }
  0x9c   :  { %v164_v44 = vadd.f32 %v160_v26, %v152_v25  ;;  %v4052_v49 = vstv %s3950_s28  ;;  %v4055_v53 = vstv %s3964_s1  ;;  %v4061_v56 = vstv %s3972_s2  ;;  %s4533_s28 = sld [smem:[#allocation6 + $0x89]] }
  0x9d   :  { %1510 = vrot.lane.b32.xlu1 %v3854_v17, %s3798_s27  ;;  %1508 = vrot.lane.b32.xlu0 %v3852_v16, %s3798_s27  ;;  %v190_v16 = vrot.slane %v186_v1, 2  ;;  %v198_v17 = vmul.f32 %v3995_v4, %v3908_v36  ;;  %v236_v36 = vadd.f32 %v232_v23, %v224_v22  ;;  %v4064_v57 = vstv %s3981_s29  ;;  %s4546_s1 = sld [smem:[#allocation6 + $0x3]] }
  0x9e   :  { %3162 = vrot.lane.b32.xlu2 %v3159_v40, %s3798_s27  ;;  %v244_v40 = vrot.slane %v240_v24, 3  ;;  %v4067_v58 = vstv %s3990_s30  ;;  %v4070_v59 = vstv %s3997_s4  ;;  %v4073_v62 = vstv %s4003_s5  ;;  %s4548_s2 = sld [smem:[#allocation6 + $0xc]] }
  0x9f   :  { %v194_v27 = vadd.f32 %v190_v16, %v182_v14  ;;  %v202_v28 = vrot.slane %v198_v17, 3  ;;  %v4076_v63 = vstv %s4010_s6  ;;  %v4083_v3 = vstv %s4016_s7  ;;  %s4554_s29 = sld [smem:[#allocation6 + $0x15]] }
  0xa0   :  { %v4080_v2 = vadd.f32 %v244_v40, %v236_v36  ;;  %v270_v5 = vmul.f32 %v4040_v32, %v4046_v41  ;;  %v282_v6 = vmul.f32 %v4049_v48, %v4046_v41  ;;  %v4090_v7 = vstv %s4023_s8  ;;  %s4564_s30 = sld [smem:[#allocation6 + $0x27]] }
  0xa1   :  { %v4058_v54 = vadd.f32 %v202_v28, %v194_v27  ;;  %5961 = vst [vmem:[#allocation24_spill] sm:$0xff] %v4090_v7  ;;  %v4097_v9 = vmul.f32 %v4052_v49, %v4046_v41  ;;  %v91_v10 = vmul.f32 %v3910_v37, %v4034_v30  ;;  %v4102_v11 = vstv %s4029_s10  ;;  %s4572_s4 = sld [smem:[#allocation6 + $0x1e]] }
  0xa2   :  { %5963 = vst [vmem:[#allocation26_spill] sm:$0xff] %v4102_v11  ;;  %v4105_v12 = vstv %s4031_s11  ;;  %v306_v14 = vmul.f32 %v4055_v53, %v4046_v41  ;;  %v133_v16 = vmul.f32 %v3914_v38, %v4034_v30  ;;  %v312_v19 = vmul.f32 %v4061_v56, %v4046_v41  ;;  %s4577_s5 = sld [smem:[#allocation6 + $0x30]] }
  0xa3   :  { %v324_v20 = vmul.f32 %v4064_v57, %v4046_v41  ;;  %v175_v21 = vmul.f32 %v3918_v39, %v4034_v30  ;;  %v274_v22 = vrot.slane %v270_v5, 1  ;;  %v286_v23 = vrot.slane %v282_v6, 2  ;;  %s4583_s6 = sld [smem:[#allocation6 + $0x39]] }
  0xa4   :  { %v4119_v24 = vmul.f32 %v4067_v58, %v4046_v41  ;;  %v217_v25 = vmul.f32 %v3934_v45, %v4034_v30  ;;  %v85_v27 = vmul.f32 %v3930_v43, %v4034_v30  ;;  %v95_v28 = vrot.slane %v91_v10, 1  ;;  %s4593_s7 = sld [smem:[#allocation6 + $0x4b]] }
  0xa5   :  { %2983 = vrot.lane.b32.xlu1 %v3876_v31, %s3797_s9  ;;  %s4027_s9 = sld [smem:[#allocation6 + $0x76]]  ;;  %v4037_v31 = vstv %s3920_s0  ;;  %v127_v36 = vmul.f32 %v3943_v46, %v4034_v30  ;;  %v137_v40 = vrot.slane %v133_v16, 1  ;;  %v316_v5 = vrot.slane %v312_v19, 1 }
  0xa6   :  { %v264_v1 = vmul.f32 %v4037_v31, %v4046_v41  ;;  %v169_v6 = vmul.f32 %v3959_v51, %v4034_v30  ;;  %v179_v26 = vrot.slane %v175_v21, 1  ;;  %v187_v15 = vmul.f32 %v3962_v52, %v4034_v30  ;;  %s4497_s0 = sld [smem:[#allocation6 + $0x6e]] }
  0xa7   :  { %v328_v10 = vrot.slane %v324_v20, 2  ;;  %v211_v0 = vmul.f32 %v3968_v55, %v4034_v30  ;;  %v99_v18 = vadd.f32 %v95_v28, %v85_v27  ;;  %v115_v19 = vmul.f32 %v3956_v50, %v4034_v30  ;;  %s4600_s8 = sld [smem:[#allocation6 + $0x42]] }
  0xa8   :  { %v266_v17 = vadd.f32 %v264_v1, %v122_v35  ;;  %v308_v35 = vadd.f32 %v306_v14, %v164_v44  ;;  %v145_v1 = vmul.f32 %v3946_v47, %v4034_v30  ;;  %v221_v44 = vrot.slane %v217_v25, 1  ;;  %s4611_s10 = sld [smem:[#allocation6 + $0x5d]] }
  0xa9   :  { %v229_v14 = vmul.f32 %v3979_v60, %v4034_v30  ;;  %v141_v21 = vadd.f32 %v137_v40, %v127_v36  ;;  %v157_v20 = vmul.f32 %v3984_v61, %v4034_v30  ;;  %v348_v55 = vmul.f32 %v4070_v59, %v4046_v41  ;;  %v256_v60 = vpop.permute.xlu2 %255  ;;  %s4617_s11 = sld [smem:[#allocation6 + $0x6f]] }
  0xaa   :  { %v278_v16 = vadd.f32 %v274_v22, %v266_v17  ;;  %v149_v39 = vrot.slane %v145_v1, 2  ;;  %v183_v25 = vadd.f32 %v179_v26, %v169_v6  ;;  %v191_v52 = vrot.slane %v187_v15, 2 }
  0xab   :  { %v4093_v8 = vstv %s4027_s9  ;;  %v199_v17 = vmul.f32 %v3995_v4, %v4034_v30  ;;  %v354_v22 = vmul.f32 %v4073_v62, %v4046_v41  ;;  %v225_v27 = vadd.f32 %v221_v44, %v211_v0  ;;  %s4607_s9 = sld [smem:[#allocation6 + $0x54]] }
  0xac   :  { %5962 = vst [vmem:[#allocation25_spill] sm:$0xff] %v4093_v8  ;;  %v233_v28 = vrot.slane %v229_v14, 2  ;;  %v320_v36 = vadd.f32 %v316_v5, %v308_v35  ;;  %v366_v40 = vmul.f32 %v4076_v63, %v4046_v41  ;;  %v119_v45 = vrot.slane %v115_v19, 3 }
  0xad   :  { %3160 = vrot.lane.b32.xlu1 %v3158_v29, %s3798_s27  ;;  %v103_v29 = vmul.f32 %v3925_v42, %v4034_v30  ;;  %v4157_v15 = vmul.f32 %v4083_v3, %v4046_v41  ;;  %v153_v26 = vadd.f32 %v149_v39, %v141_v21  ;;  %v161_v6 = vrot.slane %v157_v20, 3  ;;  %s4519_s27 = sld [smem:[#allocation6 + $0x80]] }
  0xae   :  { %v258_v0 = vsel %vm257_vm1, %v4042_v34, %v256_v60  ;;  %v4161_v44 = vadd.f32 %v286_v23, %v278_v16  ;;  %v195_v35 = vadd.f32 %v191_v52, %v183_v25  ;;  %v203_v5 = vrot.slane %v199_v17, 3 }
  0xaf   :  { %v107_v33 = vrot.slane %v103_v29, 2  ;;  %v241_v29 = vmul.f32 %v4008_v13, %v4034_v30  ;;  %v390_v30 = vmul.f32 %v4090_v7, %v4046_v41  ;;  %v237_v14 = vadd.f32 %v233_v28, %v225_v27 }
  0xb0   :  { %v4166_v13 = vadd.f32 %v328_v10, %v320_v36  ;;  %v396_v39 = vmul.f32 %v4093_v8, %v4046_v41  ;;  %v265_v60 = vmul.f32 %v4037_v31, %v258_v0  ;;  %v165_v34 = vadd.f32 %v161_v6, %v153_v26 }
  0xb1   :  { %v111_v1 = vadd.f32 %v107_v33, %v99_v18  ;;  %v350_v33 = vadd.f32 %v348_v55, %v4058_v54  ;;  %v358_v18 = vrot.slane %v354_v22, 1  ;;  %v245_v19 = vrot.slane %v241_v29, 3 }
  0xb2   :  { %v271_v23 = vmul.f32 %v4040_v32, %v258_v0  ;;  %v307_v16 = vmul.f32 %v4055_v53, %v258_v0  ;;  %v313_v52 = vmul.f32 %v4061_v56, %v258_v0  ;;  %v370_v20 = vrot.slane %v366_v40, 2 }
  0xb3   :  { %v123_v21 = vadd.f32 %v119_v45, %v111_v1  ;;  %v207_v55 = vadd.f32 %v203_v5, %v195_v35  ;;  %v349_v54 = vmul.f32 %v4070_v59, %v258_v0  ;;  %v355_v10 = vmul.f32 %v4073_v62, %v258_v0 }
  0xb4   :  { %v392_v25 = vadd.f32 %v390_v30, %v4080_v2  ;;  %v249_v17 = vadd.f32 %v245_v19, %v237_v14  ;;  %v391_v45 = vmul.f32 %v4090_v7, %v258_v0  ;;  %v397_v22 = vmul.f32 %v4093_v8, %v258_v0 }
  0xb5   :  { %v400_v27 = vrot.slane %v396_v39, 1  ;;  %v408_v28 = vmul.f32 %v4102_v11, %v4046_v41  ;;  %v267_v29 = vadd.f32 %v265_v60, %v123_v21  ;;  %v283_v36 = vmul.f32 %v4049_v48, %v258_v0 }
  0xb6   :  { %v275_v40 = vrot.slane %v271_v23, 1  ;;  %v309_v1 = vadd.f32 %v307_v16, %v165_v34  ;;  %v317_v26 = vrot.slane %v313_v52, 1  ;;  %v325_v6 = vmul.f32 %v4064_v57, %v258_v0 }
  0xb7   :  { %v362_v35 = vadd.f32 %v358_v18, %v350_v33  ;;  %v351_v5 = vadd.f32 %v349_v54, %v207_v55  ;;  %v359_v2 = vrot.slane %v355_v10, 1  ;;  %v367_v30 = vmul.f32 %v4076_v63, %v258_v0  ;;  %v1733_v18 = vld [vmem:[#allocation7] sm:$0x3] }
  0xb8   :  { %v420_v14 = vmul.f32 %v4105_v12, %v4046_v41  ;;  %v393_v19 = vadd.f32 %v391_v45, %v249_v17  ;;  %v401_v39 = vrot.slane %v397_v22, 1  ;;  %v409_v8 = vmul.f32 %v4102_v11, %v258_v0 }
  0xb9   :  { %v404_v21 = vadd.f32 %v400_v27, %v392_v25  ;;  %v412_v60 = vrot.slane %v408_v28, 2  ;;  %v287_v7 = vrot.slane %v283_v36, 2  ;;  %v295_v34 = vmul.f32 %v4052_v49, %v258_v0  ;;  %v443_v27 = vld [vmem:[#allocation7 + $0x4] sm:$0x3] }
  0xba   :  { %v279_v23 = vadd.f32 %v275_v40, %v267_v29  ;;  %v321_v16 = vadd.f32 %v317_v26, %v309_v1  ;;  %v329_v52 = vrot.slane %v325_v6, 2  ;;  %v337_v33 = vmul.f32 %v4067_v58, %v258_v0  ;;  %v434_v40 = vpop.permute.xlu2 %433 }
  0xbb   :  { %v382_v55 = vrot.slane %v4157_v15, 3  ;;  %v363_v54 = vadd.f32 %v359_v2, %v351_v5  ;;  %v371_v10 = vrot.slane %v367_v30, 2  ;;  %v379_v41 = vmul.f32 %v4083_v3, %v258_v0  ;;  %v436_v5 = vpop.permute.xlu0 %435 }
  0xbc   :  { %v374_v17 = vadd.f32 %v370_v20, %v362_v35  ;;  %v405_v45 = vadd.f32 %v401_v39, %v393_v19  ;;  %v413_v22 = vrot.slane %v409_v8, 2  ;;  %v421_v25 = vmul.f32 %v4105_v12, %v258_v0 }
  0xbd   :  { %v416_v28 = vadd.f32 %v412_v60, %v404_v21  ;;  %v424_v36 = vrot.slane %v420_v14, 3  ;;  %v4192_v29 = vperm.slane %v1733_v18, 0  ;;  %v291_v1 = vadd.f32 %v287_v7, %v279_v23 }
  0xbe   :  { %v299_v26 = vrot.slane %v295_v34, 3  ;;  %v333_v6 = vadd.f32 %v329_v52, %v321_v16  ;;  %v341_v15 = vrot.slane %v337_v33, 3  ;;  %v375_v2 = vadd.f32 %v371_v10, %v363_v54 }
  0xbf   :  { %5964 = vst [vmem:[#allocation27_spill] sm:$0xff] %v4192_v29  ;;  %v383_v30 = vrot.slane %v379_v41, 3  ;;  %v4194_v11 = vperm.slane %v443_v27, 0  ;;  %v4196_v20 = vperm.slane %v443_v27, 1  ;;  %v417_v8 = vadd.f32 %v413_v22, %v405_v45 }
  0xc0   :  { %v425_v0 = vrot.slane %v421_v25, 3  ;;  %v438_v14 = vsel %vm437_vm2, %v434_v40, %v436_v5  ;;  %v441_v19 = vsel %vm437_vm2, 0.0, %v434_v40  ;;  %v5967_v7 = vrot.slane %v4097_v9, 3 }
  0xc1   :  { %5965 = vst [vmem:[#allocation28_spill] sm:$0xff] %v4194_v11  ;;  %v5969_v21 = vrot.slane %v4119_v24, 3  ;;  %v4210_v34 = vadd.f32 %v382_v55, %v374_v17  ;;  %v4213_v16 = vadd.f32 %v424_v36, %v416_v28  ;;  %v4215_v52 = vadd.f32 %v299_v26, %v291_v1 }
  0xc2   :  { %5966 = vst [vmem:[#allocation29_spill] sm:$0xff] %v4196_v20  ;;  %v4203_v39 = vadd.f32 %v5967_v7, %v4161_v44  ;;  %v4217_v33 = vadd.f32 %v341_v15, %v333_v6  ;;  %v4220_v9 = vadd.f32 %v383_v30, %v375_v2  ;;  %v4223_v44 = vmul.f32 %v4194_v11, %v441_v19  ;;  %v5980_v15 = vld [vmem:[#allocation17_spill] sm:$0xff]  ;;  %v5990_v11 = vld [vmem:[#allocation26_spill] sm:$0xff] }
  0xc3   :  { %v4208_v60 = vadd.f32 %v5969_v21, %v4166_v13  ;;  %5971 = vst [vmem:[#allocation32_spill] sm:$0xff] %v4210_v34  ;;  %v4226_v13 = vmul.f32 %v4196_v20, %v438_v14  ;;  %v4228_v24 = vperm.slane %v1733_v18, 1  ;;  %v4230_v55 = vadd.f32 %v425_v0, %v417_v8  ;;  %v5981_v0 = vld [vmem:[#allocation19_spill] sm:$0xff]  ;;  %v5984_v34 = vld [vmem:[#allocation21_spill] sm:$0xff] }
  0xc4   :  { %5968 = vst [vmem:[#allocation30_spill] sm:$0xff] %v4203_v39  ;;  %v5985_v39 = vld [vmem:[#allocation22_spill] sm:$0xff]  ;;  %v5989_v20 = vld [vmem:[#allocation25_spill] sm:$0xff] }
  0xc5   :  { %5970 = vst [vmem:[#allocation31_spill] sm:$0xff] %v4208_v60 }
  0xc6   :  { %5972 = vst [vmem:[#allocation33_spill] sm:$0xff] %v4213_v16  ;;  %v5983_v16 = vld [vmem:[#allocation20_spill] sm:$0xff] }
  0xc7   :  { %5973 = vst [vmem:[#allocation34_spill] sm:$0xff] %v4215_v52 }
  0xc8   :  { %5974 = vst [vmem:[#allocation35_spill] sm:$0xff] %v4217_v33 }
  0xc9   :  { %5975 = vst [vmem:[#allocation36_spill] sm:$0xff] %v4220_v9 }
  0xca   :  { %5976 = vst [vmem:[#allocation37_spill] sm:$0xff] %v4223_v44 }
  0xcb   :  { %5977 = vst [vmem:[#allocation38_spill] sm:$0xff] %v4226_v13 }
  0xcc   :  { %5978 = vst [vmem:[#allocation39_spill] sm:$0xff] %v4228_v24 }
  0xcd   :  { %5979 = vst [vmem:[#allocation40_spill] sm:$0xff] %v4230_v55 }
  0xcf   :  { %v1726_v35 = vpop.permute.xlu1 %1725 }
  0xd0   :  { %v1732_v23 = vsel %vm69_vm0, 0.0, %v1726_v35 }
  0xd1   :  { %v1739_v54 = vmul.f32 %v4192_v29, %v1732_v23 }
  0xd3   :  { %v1749_v10 = vmul.f32 %v1739_v54, %v3910_v37  ;;  %v1761_v41 = vmul.f32 %v1739_v54, %v3925_v42  ;;  %v1773_v17 = vmul.f32 %v1739_v54, %v3956_v50  ;;  %v1743_v45 = vmul.f32 %v1739_v54, %v3930_v43 }
  0xd4   :  { %v1791_v22 = vmul.f32 %v1739_v54, %v3914_v38  ;;  %v1803_v25 = vmul.f32 %v1739_v54, %v3946_v47  ;;  %v1815_v27 = vmul.f32 %v1739_v54, %v3984_v61  ;;  %v1785_v40 = vmul.f32 %v1739_v54, %v3943_v46 }
  0xd5   :  { %v1753_v28 = vrot.slane %v1749_v10, 1  ;;  %v1765_v36 = vrot.slane %v1761_v41, 2  ;;  %v1777_v18 = vrot.slane %v1773_v17, 3  ;;  %v1827_v6 = vmul.f32 %v1739_v54, %v3959_v51  ;;  %v5982_v41 = vld [vmem:[#allocation18_spill] sm:$0xff] }
  0xd6   :  { %v1795_v1 = vrot.slane %v1791_v22, 1  ;;  %v1807_v26 = vrot.slane %v1803_v25, 2  ;;  %v1833_v5 = vmul.f32 %v1739_v54, %v5980_v15  ;;  %v1819_v8 = vrot.slane %v1815_v27, 3 }
  0xd7   :  { %v1728_v2 = vpop.permute.xlu1 %1727  ;;  %v1757_v30 = vadd.f32 %v1753_v28, %v1743_v45  ;;  %v1845_v14 = vmul.f32 %v1739_v54, %v5981_v0  ;;  %v1857_v19 = vmul.f32 %v1739_v54, %v3995_v4  ;;  %v4244_v7 = vpop.permute.xlu0 %1912  ;;  %v1875_v17 = vmul.f32 %v1739_v54, %v5982_v41 }
  0xd8   :  { %v1729_v21 = vsel %vm69_vm0, %v1726_v35, %v1728_v2  ;;  %v1799_v23 = vadd.f32 %v1795_v1, %v1785_v40  ;;  %v1837_v10 = vrot.slane %v1833_v5, 1  ;;  %v1869_v45 = vmul.f32 %v1739_v54, %v5983_v16 }
  0xd9   :  { %v4249_v22 = vmul.f32 %v4228_v24, %v1729_v21  ;;  %v1769_v25 = vadd.f32 %v1765_v36, %v1757_v30  ;;  %v1849_v55 = vrot.slane %v1845_v14, 2  ;;  %v1879_v9 = vrot.slane %v1875_v17, 1  ;;  %v4259_v14 = vpop.permute.xlu2 %2093 }
  0xda   :  { %v1811_v27 = vadd.f32 %v1807_v26, %v1799_v23  ;;  %v1841_v28 = vadd.f32 %v1837_v10, %v1827_v6  ;;  %v1887_v33 = vmul.f32 %v1739_v54, %v5984_v34  ;;  %v1861_v52 = vrot.slane %v1857_v19, 3  ;;  %5986 = vst [vmem:[#allocation17_spill] sm:$0xff] %v4259_v14 }
  0xdb   :  { %v1781_v60 = vadd.f32 %v1777_v18, %v1769_v25  ;;  %v1899_v35 = vmul.f32 %v1739_v54, %v5985_v39  ;;  %v1919_v40 = vsel %vm257_vm1, 0.0, %v4244_v7  ;;  %v1883_v2 = vadd.f32 %v1879_v9, %v1869_v45 }
  0xdc   :  { %v1823_v1 = vadd.f32 %v1819_v8, %v1811_v27  ;;  %v1853_v5 = vadd.f32 %v1849_v55, %v1841_v28  ;;  %v1891_v21 = vrot.slane %v1887_v33, 2  ;;  %v1922_v30 = vmul.f32 %v1919_v40, %v4037_v31 }
  0xdd   :  { %v1903_v36 = vrot.slane %v1899_v35, 3  ;;  %v1928_v26 = vmul.f32 %v1919_v40, %v4040_v32  ;;  %v1940_v6 = vmul.f32 %v1919_v40, %v4049_v48  ;;  %v1952_v54 = vmul.f32 %v1919_v40, %v4052_v49 }
  0xde   :  { %v1865_v18 = vadd.f32 %v1861_v52, %v1853_v5  ;;  %v1895_v19 = vadd.f32 %v1891_v21, %v1883_v2  ;;  %v1964_v23 = vmul.f32 %v1919_v40, %v4055_v53  ;;  %v1924_v10 = vadd.f32 %v1922_v30, %v1781_v60 }
  0xdf   :  { %v1932_v8 = vrot.slane %v1928_v26, 1  ;;  %v1944_v55 = vrot.slane %v1940_v6, 2  ;;  %v1970_v33 = vmul.f32 %v1919_v40, %v4061_v56  ;;  %v4264_v9 = vpop.permute.xlu1 %1914  ;;  %v4266_v17 = vpop.permute.xlu0 %622  ;;  %v1956_v45 = vrot.slane %v1952_v54, 3 }
  0xe0   :  { %5987 = vst [vmem:[#allocation19_spill] sm:$0xff] %v4266_v17  ;;  %v1907_v25 = vadd.f32 %v1903_v36, %v1895_v19  ;;  %v1966_v27 = vadd.f32 %v1964_v23, %v1823_v1  ;;  %v1982_v28 = vmul.f32 %v1919_v40, %v4064_v57  ;;  %v1994_v5 = vmul.f32 %v1919_v40, %v4067_v58 }
  0xe1   :  { %v1936_v52 = vadd.f32 %v1932_v8, %v1924_v10  ;;  %v1974_v35 = vrot.slane %v1970_v33, 1  ;;  %v2006_v2 = vmul.f32 %v1919_v40, %v4070_v59  ;;  %v2012_v21 = vmul.f32 %v1919_v40, %v4073_v62  ;;  %v5988_v10 = vld [vmem:[#allocation24_spill] sm:$0xff]  ;;  %v4279_v29 = vpop.permute.xlu2 %2278 }
  0xe2   :  { %v1986_v60 = vrot.slane %v1982_v28, 2  ;;  %v2024_v30 = vmul.f32 %v1919_v40, %v4076_v63  ;;  %v2036_v26 = vmul.f32 %v1919_v40, %v4083_v3  ;;  %v1998_v36 = vrot.slane %v1994_v5, 3 }
  0xe3   :  { %v1948_v6 = vadd.f32 %v1944_v55, %v1936_v52  ;;  %v1978_v13 = vadd.f32 %v1974_v35, %v1966_v27  ;;  %v2008_v19 = vadd.f32 %v2006_v2, %v1865_v18  ;;  %v2016_v1 = vrot.slane %v2012_v21, 1 }
  0xe4   :  { %v2028_v54 = vrot.slane %v2024_v30, 2  ;;  %v2040_v23 = vrot.slane %v2036_v26, 3  ;;  %v2048_v8 = vmul.f32 %v1919_v40, %v5988_v10  ;;  %v2054_v28 = vmul.f32 %v1919_v40, %v5989_v20 }
  0xe5   :  { %v4275_v33 = vadd.f32 %v1956_v45, %v1948_v6  ;;  %v1990_v44 = vadd.f32 %v1986_v60, %v1978_v13  ;;  %v2066_v24 = vmul.f32 %v1919_v40, %v5990_v11  ;;  %v2020_v14 = vadd.f32 %v2016_v1, %v2008_v19 }
  0xe6   :  { %v2050_v17 = vadd.f32 %v2048_v8, %v1907_v25  ;;  %v2078_v55 = vmul.f32 %v1919_v40, %v4105_v12  ;;  %v1750_v18 = vmul.f32 %v4249_v22, %v3910_v37  ;;  %v2058_v52 = vrot.slane %v2054_v28, 1 }
  0xe7   :  { %v4284_v27 = vadd.f32 %v1998_v36, %v1990_v44  ;;  %v2070_v35 = vrot.slane %v2066_v24, 2  ;;  %v1762_v13 = vmul.f32 %v4249_v22, %v3925_v42  ;;  %v4288_v45 = vpop.permute.xlu1 %2091  ;;  %v4290_v5 = vpop.permute.xlu0 %2280  ;;  %v2032_v2 = vadd.f32 %v2028_v54, %v2020_v14 }
  0xe8   :  { %v1744_v25 = vmul.f32 %v4249_v22, %v3930_v43  ;;  %v1754_v60 = vrot.slane %v1750_v18, 1  ;;  %v1774_v40 = vmul.f32 %v4249_v22, %v3956_v50  ;;  %v2062_v37 = vadd.f32 %v2058_v52, %v2050_v17 }
  0xe9   :  { %v2082_v44 = vrot.slane %v2078_v55, 3  ;;  %v1766_v21 = vrot.slane %v1762_v13, 2  ;;  %v1792_v24 = vmul.f32 %v4249_v22, %v3914_v38  ;;  %v4298_v30 = vadd.f32 %v2040_v23, %v2032_v2  ;;  %v4316_v8 = vpop.permute.xlu2 %1148 }
  0xea   :  { %v1758_v42 = vadd.f32 %v1754_v60, %v1744_v25  ;;  %v1786_v26 = vmul.f32 %v4249_v22, %v3943_v46  ;;  %v1804_v14 = vmul.f32 %v4249_v22, %v3946_v47  ;;  %v2074_v43 = vadd.f32 %v2070_v35, %v2062_v37 }
  0xeb   :  { %v1778_v6 = vrot.slane %v1774_v40, 3  ;;  %v1796_v36 = vrot.slane %v1792_v24, 1  ;;  %v1816_v50 = vmul.f32 %v4249_v22, %v3984_v61  ;;  %v1828_v19 = vmul.f32 %v4249_v22, %v3959_v51 }
  0xec   :  { %v1770_v17 = vadd.f32 %v1766_v21, %v1758_v42  ;;  %v1834_v38 = vmul.f32 %v4249_v22, %v5980_v15  ;;  %v1846_v1 = vmul.f32 %v4249_v22, %v5981_v0  ;;  %v4312_v46 = vadd.f32 %v2082_v44, %v2074_v43 }
  0xed   :  { %v1800_v54 = vadd.f32 %v1796_v36, %v1786_v26  ;;  %v1808_v47 = vrot.slane %v1804_v14, 2  ;;  %v1858_v23 = vmul.f32 %v4249_v22, %v3995_v4  ;;  %v1820_v28 = vrot.slane %v1816_v50, 3 }
  0xee   :  { %v1782_v61 = vadd.f32 %v1778_v6, %v1770_v17  ;;  %v1838_v55 = vrot.slane %v1834_v38, 1  ;;  %v1850_v18 = vrot.slane %v1846_v1, 2  ;;  %v1870_v15 = vmul.f32 %v4249_v22, %v5983_v16 }
  0xef   :  { %v1812_v51 = vadd.f32 %v1808_v47, %v1800_v54  ;;  %v1876_v0 = vmul.f32 %v4249_v22, %v5982_v41  ;;  %v1888_v52 = vmul.f32 %v4249_v22, %v5984_v34  ;;  %v4324_v35 = vpop.permute.xlu1 %624  ;;  %v4326_v13 = vpop.permute.xlu0 %964  ;;  %v1862_v2 = vrot.slane %v1858_v23, 3 }
  0xf0   :  { %v1842_v4 = vadd.f32 %v1838_v55, %v1828_v19  ;;  %v1900_v25 = vmul.f32 %v4249_v22, %v5985_v39  ;;  %v1916_v60 = vsel %vm257_vm1, %v4244_v7, %v4264_v9 }
  0xf1   :  { %v1824_v16 = vadd.f32 %v1820_v28, %v1812_v51  ;;  %v1880_v40 = vrot.slane %v1876_v0, 1  ;;  %v1892_v37 = vrot.slane %v1888_v52, 2  ;;  %v1923_v41 = vmul.f32 %v1916_v60, %v4037_v31  ;;  %v4340_v17 = vpop.permute.xlu2 %2621  ;;  %v2099_v0 = vld [vmem:[#allocation7 + $0x4] sm:$0x3] }
  0xf2   :  { %v1854_v34 = vadd.f32 %v1850_v18, %v1842_v4  ;;  %v1904_v44 = vrot.slane %v1900_v25, 3  ;;  %v1929_v21 = vmul.f32 %v1916_v60, %v4040_v32  ;;  %v1941_v24 = vmul.f32 %v1916_v60, %v4049_v48 }
  0xf3   :  { %v1884_v42 = vadd.f32 %v1880_v40, %v1870_v15  ;;  %v1925_v26 = vadd.f32 %v1923_v41, %v1782_v61  ;;  %v1953_v39 = vmul.f32 %v1916_v60, %v4052_v49  ;;  %v1965_v22 = vmul.f32 %v1916_v60, %v4055_v53 }
  0xf4   :  { %v1866_v14 = vadd.f32 %v1862_v2, %v1854_v34  ;;  %v1933_v7 = vrot.slane %v1929_v21, 1  ;;  %v1945_v9 = vrot.slane %v1941_v24, 2  ;;  %v1971_v43 = vmul.f32 %v1916_v60, %v4061_v56 }
  0xf5   :  { %v1896_v6 = vadd.f32 %v1892_v37, %v1884_v42  ;;  %v1957_v31 = vrot.slane %v1953_v39, 3  ;;  %v1967_v36 = vadd.f32 %v1965_v22, %v1824_v16  ;;  %v1983_v50 = vmul.f32 %v1916_v60, %v4064_v57 }
  0xf6   :  { %v1937_v32 = vadd.f32 %v1933_v7, %v1925_v26  ;;  %v1975_v48 = vrot.slane %v1971_v43, 1  ;;  %v1995_v19 = vmul.f32 %v1916_v60, %v4067_v58  ;;  %v2007_v49 = vmul.f32 %v1916_v60, %v4070_v59 }
  0xf7   :  { %v1908_v38 = vadd.f32 %v1904_v44, %v1896_v6  ;;  %v1987_v53 = vrot.slane %v1983_v50, 2  ;;  %v2013_v1 = vmul.f32 %v1916_v60, %v4073_v62  ;;  %v2025_v54 = vmul.f32 %v1916_v60, %v4076_v63  ;;  %v967_v56 = vpop.permute.xlu1 %966  ;;  %v4346_v47 = vpop.permute.xlu0 %2802  ;;  %v5992_v44 = vld [vmem:[#allocation16_spill] sm:$0xff]  ;;  %v5995_v50 = vld [vmem:[#allocation39_spill] sm:$0xff] }
  0xf8   :  { %v1949_v23 = vadd.f32 %v1945_v9, %v1937_v32  ;;  %v1979_v61 = vadd.f32 %v1975_v48, %v1967_v36  ;;  %v1999_v57 = vrot.slane %v1995_v19, 3  ;;  %v2009_v28 = vadd.f32 %v2007_v49, %v1866_v14  ;;  %v5996_v48 = vld [vmem:[#allocation23_spill] sm:$0xff] }
  0xf9   :  { %v2017_v55 = vrot.slane %v2013_v1, 1  ;;  %v2029_v18 = vrot.slane %v2025_v54, 2  ;;  %v2037_v51 = vmul.f32 %v1916_v60, %v4083_v3  ;;  %v2049_v58 = vmul.f32 %v1916_v60, %v5988_v10  ;;  %v5991_v3 = vld [vmem:[#allocation19_spill] sm:$0xff]  ;;  %v5997_v1 = vld [vmem:[#allocation28_spill] sm:$0xff] }
  0xfa   :  { %v4350_v59 = vadd.f32 %v1957_v31, %v1949_v23  ;;  %v1991_v15 = vadd.f32 %v1987_v53, %v1979_v61  ;;  %v2055_v62 = vmul.f32 %v1916_v60, %v5989_v20  ;;  %v2067_v63 = vmul.f32 %v1916_v60, %v5990_v11  ;;  %v2801_v11 = vpop.permute.xlu2 %2800  ;;  %v5994_v31 = vld [vmem:[#allocation27_spill] sm:$0xff]  ;;  %v5998_v61 = vld [vmem:[#allocation29_spill] sm:$0xff] }
  0xfb   :  { %v2021_v52 = vadd.f32 %v2017_v55, %v2009_v28  ;;  %v2041_v4 = vrot.slane %v2037_v51, 3  ;;  %v2051_v2 = vadd.f32 %v2049_v58, %v1908_v38  ;;  %v2079_v25 = vmul.f32 %v1916_v60, %v4105_v12  ;;  %v5993_v12 = vld [vmem:[#allocation17_spill] sm:$0xff] }
  0xfc   :  { %v4355_v16 = vadd.f32 %v1999_v57, %v1991_v15  ;;  %v2059_v40 = vrot.slane %v2055_v62, 1  ;;  %v2071_v37 = vrot.slane %v2067_v63, 2  ;;  %v630_v10 = vsel %vm626_vm3, 0.0, %v5991_v3 }
  0xfd   :  { %v2033_v41 = vadd.f32 %v2029_v18, %v2021_v52  ;;  %v2083_v34 = vrot.slane %v2079_v25, 3  ;;  %v4360_v21 = vmul.f32 %v630_v10, %v5992_v44  ;;  %v4362_v20 = vperm.slane %v2099_v0, 0  ;;  %v6000_v25 = vld [vmem:[#allocation38_spill] sm:$0xff] }
  0xfe   :  { %v2063_v24 = vadd.f32 %v2059_v40, %v2051_v2  ;;  %v4366_v42 = vperm.slane %v2099_v0, 1  ;;  %v2095_v60 = vsel %vm437_vm2, %v4288_v45, %v5993_v12  ;;  %v2098_v26 = vsel %vm437_vm2, 0.0, %v4288_v45  ;;  %v6002_v12 = vld [vmem:[#allocation34_spill] sm:$0xff] }
  0xff   :  { %v4375_v39 = vadd.f32 %v2041_v4, %v2033_v41  ;;  %v4378_v22 = vmul.f32 %v4362_v20, %v2098_v26  ;;  %v2282_v14 = vsel %vm626_vm3, %v4279_v29, %v4290_v5  ;;  %v2285_v7 = vsel %vm626_vm3, 0.0, %v4279_v29  ;;  %v1147_v9 = vpop.permute.xlu1 %1146  ;;  %v1331_v43 = vpop.permute.xlu0 %1330  ;;  %v5999_v4 = vld [vmem:[#allocation37_spill] sm:$0xff] }
 0x100   :  { %v2075_v6 = vadd.f32 %v2071_v37, %v2063_v24  ;;  %v4388_v45 = vmul.f32 %v4366_v42, %v2095_v60  ;;  %v4391_v36 = vmul.f32 %v2285_v7, %v5994_v31  ;;  %v4394_v32 = vmul.f32 %v2282_v14, %v5995_v50 }
 0x101   :  { %v627_v5 = vsel %vm626_vm3, %v5991_v3, %v4324_v35  ;;  %v1154_v49 = vsel %vm1150_vm4, %v4316_v8, 0.0  ;;  %v969_v38 = vsel %vm968_vm5, %v4326_v13, %v967_v56  ;;  %v972_v35 = vsel %vm968_vm5, %v967_v56, 0.0 }
 0x102   :  { %v4399_v29 = vadd.f32 %v2083_v34, %v2075_v6  ;;  %v4402_v19 = vmul.f32 %v627_v5, %v5996_v48  ;;  %v4411_v53 = vmul.f32 %v1154_v49, %v5996_v48  ;;  %v4415_v54 = vmul.f32 %v969_v38, %v5997_v1  ;;  %v1329_v15 = vpop.permute.xlu2 %1328 }
 0x103   :  { %v2807_v23 = vsel %vm1150_vm4, %v4346_v47, 0.0  ;;  %v4422_v57 = vmul.f32 %v972_v35, %v5998_v61  ;;  %v2626_v28 = vsel %vm968_vm5, %v4340_v17, 0.0  ;;  %v1151_v56 = vsel %vm1150_vm4, %v1147_v9, %v4316_v8 }
 0x104   :  { %v4425_v13 = vmul.f32 %v2807_v23, %v5995_v50  ;;  %v4434_v55 = vmul.f32 %v2626_v28, %v4366_v42  ;;  %v4437_v18 = vmul.f32 %v1151_v56, %v5992_v44  ;;  %v4440_v51 = vsel %vm1332_vm6, %v1331_v43, 0.0 }
 0x105   :  { %v2804_v58 = vsel %vm1150_vm4, %v2801_v11, %v4346_v47  ;;  %v4450_v62 = vsel %vm1332_vm6, %v1329_v15, %v1331_v43  ;;  %v452_v63 = vstv %s4364_s12  ;;  %v458_v47 = vstv %s4373_s13  ;;  %v6001_v11 = vld [vmem:[#allocation30_spill] sm:$0xff]  ;;  %s4623_s12 = sld [smem:[#allocation6 + $0x66]] }
 0x106   :  { %v4447_v8 = vmul.f32 %v2804_v58, %v5994_v31  ;;  %v453_v2 = vmul.f32 %v452_v63, %v5999_v4  ;;  %v454_v40 = vmul.f32 %v452_v63, %v6000_v25  ;;  %v470_v37 = vstv %s4385_s14  ;;  %s4633_s13 = sld [smem:[#allocation6 + $0x78]] }
 0x107   :  { %v2620_v0 = vpop.permute.xlu1 %2619  ;;  %v4453_v52 = vpop.permute.xlu0 %2981  ;;  %v459_v10 = vmul.f32 %v458_v47, %v5999_v4  ;;  %v460_v41 = vmul.f32 %v458_v47, %v6000_v25  ;;  %v471_v34 = vmul.f32 %v470_v37, %v5999_v4  ;;  %v472_v26 = vmul.f32 %v470_v37, %v6000_v25  ;;  %s4637_s14 = sld [smem:[#allocation6 + $0x81]] }
 0x108   :  { %v2623_v3 = vsel %vm968_vm5, %v2620_v0, %v4340_v17  ;;  %v455_v24 = vadd.f32 %v453_v2, %v6001_v11  ;;  %v456_v60 = vadd.f32 %v454_v40, %v6002_v12  ;;  %v482_v9 = vstv %s4408_s15  ;;  %v6003_v2 = vld [vmem:[#allocation31_spill] sm:$0xff]  ;;  %s4643_s15 = sld [smem:[#allocation6 + $0x8a]] }
 0x109   :  { %v4465_v44 = vmul.f32 %v2623_v3, %v4362_v20  ;;  %v463_v14 = vrot.slane %v459_v10, 1  ;;  %v464_v17 = vrot.slane %v460_v41, 1  ;;  %v475_v7 = vrot.slane %v471_v34, 2  ;;  %v6004_v10 = vld [vmem:[#allocation35_spill] sm:$0xff] }
 0x10a   :  { %v476_v43 = vrot.slane %v472_v26, 2  ;;  %v483_v6 = vmul.f32 %v482_v9, %v5999_v4  ;;  %v484_v31 = vmul.f32 %v482_v9, %v6000_v25  ;;  %v494_v50 = vstv %s4419_s16  ;;  %v4482_v35 = vpop.permute.xlu2 %3162  ;;  %s4647_s16 = sld [smem:[#allocation6 + $0x4]] }
 0x10b   :  { %v467_v5 = vadd.f32 %v463_v14, %v455_v24  ;;  %v468_v48 = vadd.f32 %v464_v17, %v456_v60  ;;  %v495_v49 = vmul.f32 %v494_v50, %v5999_v4  ;;  %v496_v38 = vmul.f32 %v494_v50, %v6000_v25 }
 0x10c   :  { %v487_v23 = vrot.slane %v483_v6, 3  ;;  %v488_v28 = vrot.slane %v484_v31, 3  ;;  %v500_v56 = vstv %s4431_s17  ;;  %v512_v58 = vstv %s4444_s18  ;;  %s4659_s17 = sld [smem:[#allocation6 + $0xd]] }
 0x10d   :  { %v3167_v15 = vsel %vm1512_vm7, %v4482_v35, 0.0  ;;  %v479_v63 = vadd.f32 %v475_v7, %v467_v5  ;;  %v480_v0 = vadd.f32 %v476_v43, %v468_v48  ;;  %v497_v40 = vadd.f32 %v495_v49, %v6003_v2  ;;  %v6005_v2 = vld [vmem:[#allocation32_spill] sm:$0xff]  ;;  %s4665_s18 = sld [smem:[#allocation6 + $0x16]] }
 0x10e   :  { %v4492_v3 = vmul.f32 %v3167_v15, %v4366_v42  ;;  %v498_v41 = vadd.f32 %v496_v38, %v6004_v10  ;;  %v501_v34 = vmul.f32 %v500_v56, %v5999_v4  ;;  %v502_v11 = vmul.f32 %v500_v56, %v6000_v25 }
 0x10f   :  { %v1511_v47 = vpop.permute.xlu1 %1510  ;;  %v1509_v37 = vpop.permute.xlu0 %1508  ;;  %v4501_v60 = vadd.f32 %v487_v23, %v479_v63  ;;  %v4503_v26 = vadd.f32 %v488_v28, %v480_v0  ;;  %v513_v9 = vmul.f32 %v512_v58, %v5999_v4  ;;  %v514_v43 = vmul.f32 %v512_v58, %v6000_v25 }
 0x110   :  { %v1516_v24 = vsel %vm1512_vm7, %v1511_v47, 0.0  ;;  %v1513_v12 = vsel %vm1512_vm7, %v1509_v37, %v1511_v47  ;;  %v505_v17 = vrot.slane %v501_v34, 1  ;;  %v506_v7 = vrot.slane %v502_v11, 1 }
 0x111   :  { %v4508_v42 = vmul.f32 %v1516_v24, %v5998_v61  ;;  %v4511_v14 = vmul.f32 %v1513_v12, %v5997_v1  ;;  %v524_v6 = vstv %s4473_s22  ;;  %v536_v31 = vstv %s4470_s19  ;;  %s4671_s19 = sld [smem:[#allocation6 + $0x1f]] }
 0x112   :  { %v509_v50 = vadd.f32 %v505_v17, %v497_v40  ;;  %v510_v61 = vadd.f32 %v506_v7, %v498_v41  ;;  %v525_v5 = vmul.f32 %v524_v6, %v5999_v4  ;;  %v526_v1 = vmul.f32 %v524_v6, %v6000_v25  ;;  %v6006_v40 = vld [vmem:[#allocation36_spill] sm:$0xff]  ;;  %s4679_s22 = sld [smem:[#allocation6 + $0x28]] }
 0x113   :  { %v517_v48 = vrot.slane %v513_v9, 2  ;;  %v518_v49 = vrot.slane %v514_v43, 2  ;;  %v537_v38 = vmul.f32 %v536_v31, %v5999_v4  ;;  %v538_v23 = vmul.f32 %v536_v31, %v6000_v25 }
 0x114   :  { %v529_v28 = vrot.slane %v525_v5, 3  ;;  %v530_v56 = vrot.slane %v526_v1, 3  ;;  %v542_v15 = vstv %s4480_s23  ;;  %v554_v58 = vstv %s4486_s24  ;;  %s4685_s23 = sld [smem:[#allocation6 + $0x31]] }
 0x115   :  { %v521_v63 = vadd.f32 %v517_v48, %v509_v50  ;;  %v522_v0 = vadd.f32 %v518_v49, %v510_v61  ;;  %v539_v47 = vadd.f32 %v537_v38, %v6005_v2  ;;  %v540_v37 = vadd.f32 %v538_v23, %v6006_v40  ;;  %s4689_s24 = sld [smem:[#allocation6 + $0x3a]] }
 0x116   :  { %v543_v41 = vmul.f32 %v542_v15, %v5999_v4  ;;  %v544_v34 = vmul.f32 %v542_v15, %v6000_v25  ;;  %v555_v11 = vmul.f32 %v554_v58, %v5999_v4  ;;  %v556_v24 = vmul.f32 %v554_v58, %v6000_v25 }
 0x117   :  { %v2984_v10 = vpop.permute.xlu1 %2983  ;;  %v4542_v7 = vadd.f32 %v529_v28, %v521_v63  ;;  %v4544_v9 = vadd.f32 %v530_v56, %v522_v0  ;;  %v566_v61 = vstv %s4505_s25  ;;  %v578_v5 = vstv %s4497_s0  ;;  %s4695_s0 = sld [smem:[#allocation6 + $0x43]] }
 0x118   :  { %v4537_v12 = vsel %vm1332_vm6, %v4453_v52, %v2984_v10  ;;  %v4540_v17 = vsel %vm1332_vm6, %v2984_v10, 0.0  ;;  %v547_v43 = vrot.slane %v543_v41, 1  ;;  %v548_v6 = vrot.slane %v544_v34, 1  ;;  %v6007_v10 = vld [vmem:[#allocation33_spill] sm:$0xff]  ;;  %s4699_s25 = sld [smem:[#allocation6 + $0x4c]] }
 0x119   :  { %v559_v31 = vrot.slane %v555_v11, 2  ;;  %v560_v50 = vrot.slane %v556_v24, 2  ;;  %v584_v1 = vstv %s4513_s26  ;;  %v596_v52 = vstv %s4519_s27  ;;  %s4707_s26 = sld [smem:[#allocation6 + $0x55]] }
 0x11a   :  { %v551_v48 = vadd.f32 %v547_v43, %v539_v47  ;;  %v552_v49 = vadd.f32 %v548_v6, %v540_v37  ;;  %v567_v38 = vmul.f32 %v566_v61, %v5999_v4  ;;  %v568_v23 = vmul.f32 %v566_v61, %v6000_v25  ;;  %v6008_v37 = vld [vmem:[#allocation40_spill] sm:$0xff]  ;;  %s4711_s27 = sld [smem:[#allocation6 + $0x5e]] }
 0x11b   :  { %v579_v28 = vmul.f32 %v578_v5, %v5999_v4  ;;  %v580_v56 = vmul.f32 %v578_v5, %v6000_v25  ;;  %v585_v15 = vmul.f32 %v584_v1, %v5999_v4  ;;  %v586_v58 = vmul.f32 %v584_v1, %v6000_v25 }
 0x11c   :  { %v563_v63 = vadd.f32 %v559_v31, %v551_v48  ;;  %v564_v0 = vadd.f32 %v560_v50, %v552_v49  ;;  %v571_v2 = vrot.slane %v567_v38, 3  ;;  %v572_v40 = vrot.slane %v568_v23, 3 }
 0x11d   :  { %v581_v47 = vadd.f32 %v579_v28, %v6007_v10  ;;  %v582_v41 = vadd.f32 %v580_v56, %v6008_v37  ;;  %v589_v34 = vrot.slane %v585_v15, 1  ;;  %v590_v11 = vrot.slane %v586_v58, 1 }
 0x11e   :  { %v4566_v43 = vadd.f32 %v571_v2, %v563_v63  ;;  %v4568_v6 = vadd.f32 %v572_v40, %v564_v0  ;;  %v597_v31 = vmul.f32 %v596_v52, %v5999_v4  ;;  %v598_v50 = vmul.f32 %v596_v52, %v6000_v25 }
 0x11f   :  { %v3161_v24 = vpop.permute.xlu1 %3160  ;;  %v593_v5 = vadd.f32 %v589_v34, %v581_v47  ;;  %v594_v1 = vadd.f32 %v590_v11, %v582_v41  ;;  %v608_v48 = vstv %s4533_s28  ;;  %v634_v56 = vstv %s4546_s1  ;;  %s4717_s28 = sld [smem:[#allocation6 + $0x67]] }
 0x120   :  { %v3164_v61 = vsel %vm1512_vm7, %v3161_v24, %v4482_v35  ;;  %v601_v38 = vrot.slane %v597_v31, 2  ;;  %v602_v23 = vrot.slane %v598_v50, 2  ;;  %v609_v28 = vmul.f32 %v608_v48, %v5999_v4  ;;  %s4721_s1 = sld [smem:[#allocation6 + $0x70]] }
 0x121   :  { %v4580_v49 = vmul.f32 %v3164_v61, %v4362_v20  ;;  %v610_v52 = vmul.f32 %v608_v48, %v6000_v25  ;;  %v640_v15 = vstv %s4548_s2  ;;  %v652_v58 = vstv %s4554_s29  ;;  %s4729_s2 = sld [smem:[#allocation6 + $0x79]] }
 0x122   :  { %v605_v35 = vadd.f32 %v601_v38, %v593_v5  ;;  %v606_v63 = vadd.f32 %v602_v23, %v594_v1  ;;  %v613_v0 = vrot.slane %v609_v28, 3  ;;  %v635_v2 = vmul.f32 %v634_v56, %v4360_v21  ;;  %s4733_s29 = sld [smem:[#allocation6 + $0x82]] }
 0x123   :  { %v614_v40 = vrot.slane %v610_v52, 3  ;;  %v636_v20 = vmul.f32 %v634_v56, %v4402_v19  ;;  %v641_v10 = vmul.f32 %v640_v15, %v4360_v21  ;;  %v642_v4 = vmul.f32 %v640_v15, %v4402_v19 }
 0x124   :  { %v4595_v25 = vadd.f32 %v613_v0, %v605_v35  ;;  %v637_v47 = vadd.f32 %v635_v2, %v4501_v60  ;;  %v653_v37 = vmul.f32 %v652_v58, %v4360_v21  ;;  %v654_v41 = vmul.f32 %v652_v58, %v4402_v19 }
 0x125   :  { %v4602_v34 = vadd.f32 %v614_v40, %v606_v63  ;;  %v638_v11 = vadd.f32 %v636_v20, %v4503_v26  ;;  %v645_v24 = vrot.slane %v641_v10, 1  ;;  %v646_v31 = vrot.slane %v642_v4, 1 }
 0x126   :  { %v657_v50 = vrot.slane %v653_v37, 2  ;;  %v658_v61 = vrot.slane %v654_v41, 2  ;;  %v664_v5 = vstv %s4572_s4  ;;  %v676_v1 = vstv %s4564_s30  ;;  %s4739_s30 = sld [smem:[#allocation6 + $0x8b]] }
 0x127   :  { %v649_v60 = vadd.f32 %v645_v24, %v637_v47  ;;  %v650_v48 = vadd.f32 %v646_v31, %v638_v11  ;;  %v665_v38 = vmul.f32 %v664_v5, %v4360_v21  ;;  %v666_v23 = vmul.f32 %v664_v5, %v4402_v19  ;;  %s4743_s4 = sld [smem:[#allocation6 + $0x5]] }
 0x128   :  { %v677_v28 = vmul.f32 %v676_v1, %v4360_v21  ;;  %v678_v26 = vmul.f32 %v676_v1, %v4402_v19  ;;  %v682_v52 = vstv %s4577_s5  ;;  %v694_v56 = vstv %s4583_s6  ;;  %s4751_s5 = sld [smem:[#allocation6 + $0xe]] }
 0x129   :  { %v661_v15 = vadd.f32 %v657_v50, %v649_v60  ;;  %v662_v58 = vadd.f32 %v658_v61, %v650_v48  ;;  %v669_v35 = vrot.slane %v665_v38, 3  ;;  %v670_v63 = vrot.slane %v666_v23, 3  ;;  %s4755_s6 = sld [smem:[#allocation6 + $0x17]] }
 0x12a   :  { %v679_v0 = vadd.f32 %v677_v28, %v4542_v7  ;;  %v680_v2 = vadd.f32 %v678_v26, %v4544_v9  ;;  %v683_v40 = vmul.f32 %v682_v52, %v4360_v21  ;;  %v684_v20 = vmul.f32 %v682_v52, %v4402_v19 }
 0x12b   :  { %v4625_v10 = vadd.f32 %v669_v35, %v661_v15  ;;  %v4627_v4 = vadd.f32 %v670_v63, %v662_v58  ;;  %v695_v47 = vmul.f32 %v694_v56, %v4360_v21  ;;  %v696_v37 = vmul.f32 %v694_v56, %v4402_v19 }
 0x12c   :  { %v687_v41 = vrot.slane %v683_v40, 1  ;;  %v688_v11 = vrot.slane %v684_v20, 1  ;;  %v706_v7 = vstv %s4600_s8  ;;  %v718_v9 = vstv %s4593_s7  ;;  %s4761_s7 = sld [smem:[#allocation6 + $0x20]] }
 0x12d   :  { %v699_v24 = vrot.slane %v695_v47, 2  ;;  %v700_v31 = vrot.slane %v696_v37, 2  ;;  %v707_v50 = vmul.f32 %v706_v7, %v4360_v21  ;;  %v708_v61 = vmul.f32 %v706_v7, %v4402_v19  ;;  %s4763_s8 = sld [smem:[#allocation6 + $0x29]] }
 0x12e   :  { %v691_v5 = vadd.f32 %v687_v41, %v679_v0  ;;  %v692_v1 = vadd.f32 %v688_v11, %v680_v2  ;;  %v719_v60 = vmul.f32 %v718_v9, %v4360_v21  ;;  %v720_v48 = vmul.f32 %v718_v9, %v4402_v19 }
 0x12f   :  { %v711_v38 = vrot.slane %v707_v50, 3  ;;  %v712_v23 = vrot.slane %v708_v61, 3  ;;  %v724_v28 = vstv %s4607_s9  ;;  %v736_v26 = vstv %s4611_s10  ;;  %s4773_s9 = sld [smem:[#allocation6 + $0x32]] }
 0x130   :  { %v703_v52 = vadd.f32 %v699_v24, %v691_v5  ;;  %v704_v56 = vadd.f32 %v700_v31, %v692_v1  ;;  %v721_v15 = vadd.f32 %v719_v60, %v4566_v43  ;;  %v722_v58 = vadd.f32 %v720_v48, %v4568_v6  ;;  %s4777_s10 = sld [smem:[#allocation6 + $0x3b]] }
 0x131   :  { %v725_v35 = vmul.f32 %v724_v28, %v4360_v21  ;;  %v726_v63 = vmul.f32 %v724_v28, %v4402_v19  ;;  %v737_v0 = vmul.f32 %v736_v26, %v4360_v21  ;;  %v738_v2 = vmul.f32 %v736_v26, %v4402_v19 }
 0x132   :  { %v4653_v40 = vadd.f32 %v711_v38, %v703_v52  ;;  %v4655_v20 = vadd.f32 %v712_v23, %v704_v56  ;;  %v748_v47 = vstv %s4623_s12  ;;  %v760_v43 = vstv %s4617_s11  ;;  %s4783_s11 = sld [smem:[#allocation6 + $0x44]] }
 0x133   :  { %v729_v37 = vrot.slane %v725_v35, 1  ;;  %v730_v6 = vrot.slane %v726_v63, 1  ;;  %v741_v41 = vrot.slane %v737_v0, 2  ;;  %v742_v11 = vrot.slane %v738_v2, 2  ;;  %s4787_s12 = sld [smem:[#allocation6 + $0x4d]] }
 0x134   :  { %v749_v7 = vmul.f32 %v748_v47, %v4360_v21  ;;  %v750_v9 = vmul.f32 %v748_v47, %v4402_v19  ;;  %v761_v24 = vmul.f32 %v760_v43, %v4360_v21  ;;  %v762_v31 = vmul.f32 %v760_v43, %v4402_v19 }
 0x135   :  { %v733_v50 = vadd.f32 %v729_v37, %v721_v15  ;;  %v734_v61 = vadd.f32 %v730_v6, %v722_v58  ;;  %v766_v5 = vstv %s4633_s13  ;;  %v778_v1 = vstv %s4637_s14  ;;  %s4799_s13 = sld [smem:[#allocation6 + $0x56]] }
 0x136   :  { %v753_v60 = vrot.slane %v749_v7, 3  ;;  %v754_v48 = vrot.slane %v750_v9, 3  ;;  %v763_v38 = vadd.f32 %v761_v24, %v4595_v25  ;;  %v764_v23 = vadd.f32 %v762_v31, %v4602_v34  ;;  %v6009_v7 = vld [vmem:[#allocation14_spill] sm:$0xff]  ;;  %s4805_s14 = sld [smem:[#allocation6 + $0x5f]] }
 0x137   :  { %v745_v28 = vadd.f32 %v741_v41, %v733_v50  ;;  %v746_v26 = vadd.f32 %v742_v11, %v734_v61  ;;  %v767_v52 = vmul.f32 %v766_v5, %v4360_v21  ;;  %v768_v56 = vmul.f32 %v766_v5, %v4402_v19 }
 0x138   :  { %v779_v15 = vmul.f32 %v778_v1, %v4360_v21  ;;  %v780_v58 = vmul.f32 %v778_v1, %v4402_v19  ;;  %v790_v35 = vstv %s4643_s15  ;;  %v802_v63 = vstv %s4647_s16  ;;  %s4811_s15 = sld [smem:[#allocation6 + $0x68]] }
 0x139   :  { %v4681_v25 = vadd.f32 %v753_v60, %v745_v28  ;;  %v4683_v34 = vadd.f32 %v754_v48, %v746_v26  ;;  %v771_v0 = vrot.slane %v767_v52, 1  ;;  %v772_v2 = vrot.slane %v768_v56, 1  ;;  %s4815_s16 = sld [smem:[#allocation6 + $0x71]] }
 0x13a   :  { %v783_v47 = vrot.slane %v779_v15, 2  ;;  %v784_v43 = vrot.slane %v780_v58, 2  ;;  %v791_v37 = vmul.f32 %v790_v35, %v4360_v21  ;;  %v792_v6 = vmul.f32 %v790_v35, %v4402_v19 }
 0x13b   :  { %v775_v41 = vadd.f32 %v771_v0, %v763_v38  ;;  %v776_v11 = vadd.f32 %v772_v2, %v764_v23  ;;  %v803_v9 = vmul.f32 %v802_v63, %v6009_v7  ;;  %v812_v24 = vstv %s4659_s17  ;;  %s4825_s17 = sld [smem:[#allocation6 + $0x7a]] }
 0x13c   :  { %v795_v31 = vrot.slane %v791_v37, 3  ;;  %v796_v50 = vrot.slane %v792_v6, 3  ;;  %v813_v61 = vmul.f32 %v812_v24, %v6009_v7  ;;  %v822_v5 = vstv %s4665_s18  ;;  %s4829_s18 = sld [smem:[#allocation6 + $0x83]] }
 0x13d   :  { %v787_v1 = vadd.f32 %v783_v47, %v775_v41  ;;  %v788_v60 = vadd.f32 %v784_v43, %v776_v11  ;;  %v805_v21 = vperm.slane %v803_v9, 0  ;;  %v806_v19 = vperm.slane %v803_v9, 4 }
 0x13e   :  { %v815_v48 = vperm.slane %v813_v61, 1  ;;  %v816_v28 = vperm.slane %v813_v61, 5  ;;  %v823_v38 = vmul.f32 %v822_v5, %v6009_v7  ;;  %v832_v23 = vstv %s4671_s19  ;;  %s4835_s19 = sld [smem:[#allocation6 + $0x8c]] }
 0x13f   :  { %v4701_v26 = vadd.f32 %v795_v31, %v787_v1  ;;  %v4703_v52 = vadd.f32 %v796_v50, %v788_v60  ;;  %v809_v56 = vadd.f32 %v805_v21, %v4625_v10  ;;  %v810_v15 = vadd.f32 %v806_v19, %v4627_v4 }
 0x140   :  { %v825_v58 = vperm.slane %v823_v38, 2  ;;  %v826_v35 = vperm.slane %v823_v38, 6  ;;  %v833_v63 = vmul.f32 %v832_v23, %v6009_v7  ;;  %v842_v0 = vstv %s4679_s22  ;;  %s4839_s22 = sld [smem:[#allocation6 + $0x6]] }
 0x141   :  { %v819_v2 = vadd.f32 %v815_v48, %v809_v56  ;;  %v820_v47 = vadd.f32 %v816_v28, %v810_v15  ;;  %v843_v43 = vmul.f32 %v842_v0, %v6009_v7  ;;  %v852_v37 = vstv %s4685_s23  ;;  %s4851_s23 = sld [smem:[#allocation6 + $0xf]] }
 0x142   :  { %v835_v6 = vperm.slane %v833_v63, 3  ;;  %v836_v41 = vperm.slane %v833_v63, 7  ;;  %v853_v10 = vmul.f32 %v852_v37, %v6009_v7  ;;  %v862_v4 = vstv %s4689_s24  ;;  %s4857_s24 = sld [smem:[#allocation6 + $0x18]] }
 0x143   :  { %v829_v11 = vadd.f32 %v825_v58, %v819_v2  ;;  %v830_v9 = vadd.f32 %v826_v35, %v820_v47  ;;  %v845_v24 = vperm.slane %v843_v43, 0  ;;  %v846_v31 = vperm.slane %v843_v43, 4 }
 0x144   :  { %v855_v50 = vperm.slane %v853_v10, 1  ;;  %v856_v61 = vperm.slane %v853_v10, 5  ;;  %v863_v5 = vmul.f32 %v862_v4, %v6009_v7  ;;  %v872_v1 = vstv %s4695_s0  ;;  %s4863_s0 = sld [smem:[#allocation6 + $0x21]] }
 0x145   :  { %v4723_v60 = vadd.f32 %v835_v6, %v829_v11  ;;  %v4725_v21 = vadd.f32 %v836_v41, %v830_v9  ;;  %v849_v19 = vadd.f32 %v845_v24, %v4653_v40  ;;  %v850_v48 = vadd.f32 %v846_v31, %v4655_v20 }
 0x146   :  { %v865_v28 = vperm.slane %v863_v5, 2  ;;  %v866_v38 = vperm.slane %v863_v5, 6  ;;  %v873_v23 = vmul.f32 %v872_v1, %v6009_v7  ;;  %v882_v56 = vstv %s4699_s25  ;;  %s4867_s25 = sld [smem:[#allocation6 + $0x2a]] }
 0x147   :  { %v859_v15 = vadd.f32 %v855_v50, %v849_v19  ;;  %v860_v58 = vadd.f32 %v856_v61, %v850_v48  ;;  %v883_v35 = vmul.f32 %v882_v56, %v6009_v7  ;;  %v892_v63 = vstv %s4707_s26  ;;  %s4877_s26 = sld [smem:[#allocation6 + $0x33]] }
 0x148   :  { %v875_v0 = vperm.slane %v873_v23, 3  ;;  %v876_v2 = vperm.slane %v873_v23, 7  ;;  %v893_v40 = vmul.f32 %v892_v63, %v6009_v7  ;;  %v902_v20 = vstv %s4711_s27  ;;  %s4881_s27 = sld [smem:[#allocation6 + $0x3c]] }
 0x149   :  { %v869_v47 = vadd.f32 %v865_v28, %v859_v15  ;;  %v870_v43 = vadd.f32 %v866_v38, %v860_v58  ;;  %v885_v37 = vperm.slane %v883_v35, 0  ;;  %v886_v6 = vperm.slane %v883_v35, 4 }
 0x14a   :  { %v895_v41 = vperm.slane %v893_v40, 1  ;;  %v896_v10 = vperm.slane %v893_v40, 5  ;;  %v903_v4 = vmul.f32 %v902_v20, %v6009_v7  ;;  %v912_v11 = vstv %s4717_s28  ;;  %s4887_s28 = sld [smem:[#allocation6 + $0x45]] }
 0x14b   :  { %v4745_v9 = vadd.f32 %v875_v0, %v869_v47  ;;  %v4747_v24 = vadd.f32 %v876_v2, %v870_v43  ;;  %v889_v31 = vadd.f32 %v885_v37, %v4681_v25  ;;  %v890_v50 = vadd.f32 %v886_v6, %v4683_v34 }
 0x14c   :  { %v905_v61 = vperm.slane %v903_v4, 2  ;;  %v906_v5 = vperm.slane %v903_v4, 6  ;;  %v913_v1 = vmul.f32 %v912_v11, %v6009_v7  ;;  %v922_v19 = vstv %s4721_s1  ;;  %s4891_s1 = sld [smem:[#allocation6 + $0x4e]] }
 0x14d   :  { %v899_v48 = vadd.f32 %v895_v41, %v889_v31  ;;  %v900_v28 = vadd.f32 %v896_v10, %v890_v50  ;;  %v923_v38 = vmul.f32 %v922_v19, %v6009_v7  ;;  %v932_v23 = vstv %s4729_s2  ;;  %s4903_s2 = sld [smem:[#allocation6 + $0x57]] }
 0x14e   :  { %v915_v56 = vperm.slane %v913_v1, 3  ;;  %v916_v15 = vperm.slane %v913_v1, 7  ;;  %v933_v25 = vmul.f32 %v932_v23, %v6009_v7  ;;  %v942_v34 = vstv %s4733_s29  ;;  %s4909_s29 = sld [smem:[#allocation6 + $0x60]] }
 0x14f   :  { %v909_v58 = vadd.f32 %v905_v61, %v899_v48  ;;  %v910_v35 = vadd.f32 %v906_v5, %v900_v28  ;;  %v925_v63 = vperm.slane %v923_v38, 0  ;;  %v926_v0 = vperm.slane %v923_v38, 4 }
 0x150   :  { %v935_v2 = vperm.slane %v933_v25, 1  ;;  %v936_v40 = vperm.slane %v933_v25, 5  ;;  %v943_v20 = vmul.f32 %v942_v34, %v6009_v7  ;;  %v952_v47 = vstv %s4739_s30  ;;  %s4915_s30 = sld [smem:[#allocation6 + $0x69]] }
 0x151   :  { %v4767_v43 = vadd.f32 %v915_v56, %v909_v58  ;;  %v4769_v37 = vadd.f32 %v916_v15, %v910_v35  ;;  %v929_v6 = vadd.f32 %v925_v63, %v4701_v26  ;;  %v930_v41 = vadd.f32 %v926_v0, %v4703_v52 }
 0x152   :  { %v945_v10 = vperm.slane %v943_v20, 2  ;;  %v946_v4 = vperm.slane %v943_v20, 6  ;;  %v953_v11 = vmul.f32 %v952_v47, %v6009_v7  ;;  %v976_v31 = vstv %s4743_s4  ;;  %s4919_s4 = sld [smem:[#allocation6 + $0x72]] }
 0x153   :  { %v939_v50 = vadd.f32 %v935_v2, %v929_v6  ;;  %v940_v61 = vadd.f32 %v936_v40, %v930_v41  ;;  %v977_v5 = vmul.f32 %v976_v31, %v4415_v54  ;;  %v978_v1 = vmul.f32 %v976_v31, %v4422_v57 }
 0x154   :  { %v955_v19 = vperm.slane %v953_v11, 3  ;;  %v956_v26 = vperm.slane %v953_v11, 7  ;;  %v982_v52 = vstv %s4751_s5  ;;  %v994_v48 = vstv %s4755_s6  ;;  %s4929_s5 = sld [smem:[#allocation6 + $0x7b]] }
 0x155   :  { %v949_v28 = vadd.f32 %v945_v10, %v939_v50  ;;  %v950_v38 = vadd.f32 %v946_v4, %v940_v61  ;;  %v979_v7 = vadd.f32 %v977_v5, %v4723_v60  ;;  %v980_v23 = vadd.f32 %v978_v1, %v4725_v21  ;;  %s4933_s6 = sld [smem:[#allocation6 + $0x84]] }
 0x156   :  { %v983_v56 = vmul.f32 %v982_v52, %v4415_v54  ;;  %v984_v15 = vmul.f32 %v982_v52, %v4422_v57  ;;  %v995_v25 = vmul.f32 %v994_v48, %v4415_v54  ;;  %v996_v34 = vmul.f32 %v994_v48, %v4422_v57 }
 0x157   :  { %v4793_v58 = vadd.f32 %v955_v19, %v949_v28  ;;  %v4795_v35 = vadd.f32 %v956_v26, %v950_v38  ;;  %v1006_v63 = vstv %s4761_s7  ;;  %v1018_v60 = vstv %s4763_s8  ;;  %s4939_s7 = sld [smem:[#allocation6 + $0x8d]] }
 0x158   :  { %v987_v0 = vrot.slane %v983_v56, 1  ;;  %v988_v21 = vrot.slane %v984_v15, 1  ;;  %v999_v2 = vrot.slane %v995_v25, 2  ;;  %v1000_v40 = vrot.slane %v996_v34, 2  ;;  %s4943_s8 = sld [smem:[#allocation6 + $0x7]] }
 0x159   :  { %v1007_v20 = vmul.f32 %v1006_v63, %v4415_v54  ;;  %v1008_v47 = vmul.f32 %v1006_v63, %v4422_v57  ;;  %v1019_v6 = vmul.f32 %v1018_v60, %v4415_v54  ;;  %v1020_v41 = vmul.f32 %v1018_v60, %v4422_v57 }
 0x15a   :  { %v991_v10 = vadd.f32 %v987_v0, %v979_v7  ;;  %v992_v4 = vadd.f32 %v988_v21, %v980_v23  ;;  %v1024_v11 = vstv %s4773_s9  ;;  %v1036_v31 = vstv %s4777_s10  ;;  %s4955_s9 = sld [smem:[#allocation6 + $0x10]] }
 0x15b   :  { %v1011_v50 = vrot.slane %v1007_v20, 3  ;;  %v1012_v61 = vrot.slane %v1008_v47, 3  ;;  %v1021_v5 = vadd.f32 %v1019_v6, %v4745_v9  ;;  %v1022_v1 = vadd.f32 %v1020_v41, %v4747_v24  ;;  %s4961_s10 = sld [smem:[#allocation6 + $0x19]] }
 0x15c   :  { %v1003_v19 = vadd.f32 %v999_v2, %v991_v10  ;;  %v1004_v26 = vadd.f32 %v1000_v40, %v992_v4  ;;  %v1025_v52 = vmul.f32 %v1024_v11, %v4415_v54  ;;  %v1026_v48 = vmul.f32 %v1024_v11, %v4422_v57 }
 0x15d   :  { %v1037_v28 = vmul.f32 %v1036_v31, %v4415_v54  ;;  %v1038_v38 = vmul.f32 %v1036_v31, %v4422_v57  ;;  %v1048_v7 = vstv %s4783_s11  ;;  %v1060_v23 = vstv %s4787_s12  ;;  %s4967_s11 = sld [smem:[#allocation6 + $0x2b]] }
 0x15e   :  { %v4821_v56 = vadd.f32 %v1011_v50, %v1003_v19  ;;  %v4823_v9 = vadd.f32 %v1012_v61, %v1004_v26  ;;  %v1029_v24 = vrot.slane %v1025_v52, 1  ;;  %v1030_v15 = vrot.slane %v1026_v48, 1  ;;  %s4971_s12 = sld [smem:[#allocation6 + $0x22]] }
 0x15f   :  { %v1041_v25 = vrot.slane %v1037_v28, 2  ;;  %v1042_v34 = vrot.slane %v1038_v38, 2  ;;  %v1049_v63 = vmul.f32 %v1048_v7, %v4415_v54  ;;  %v1050_v60 = vmul.f32 %v1048_v7, %v4422_v57 }
 0x160   :  { %v1033_v0 = vadd.f32 %v1029_v24, %v1021_v5  ;;  %v1034_v21 = vadd.f32 %v1030_v15, %v1022_v1  ;;  %v1061_v2 = vmul.f32 %v1060_v23, %v4415_v54  ;;  %v1062_v40 = vmul.f32 %v1060_v23, %v4422_v57 }
 0x161   :  { %v1053_v20 = vrot.slane %v1049_v63, 3  ;;  %v1054_v47 = vrot.slane %v1050_v60, 3  ;;  %v1066_v6 = vstv %s4799_s13  ;;  %v1078_v41 = vstv %s4805_s14  ;;  %s4981_s13 = sld [smem:[#allocation6 + $0x34]] }
 0x162   :  { %v1045_v10 = vadd.f32 %v1041_v25, %v1033_v0  ;;  %v1046_v4 = vadd.f32 %v1042_v34, %v1034_v21  ;;  %v1063_v11 = vadd.f32 %v1061_v2, %v4767_v43  ;;  %v1064_v31 = vadd.f32 %v1062_v40, %v4769_v37  ;;  %s4985_s14 = sld [smem:[#allocation6 + $0x3d]] }
 0x163   :  { %v1067_v50 = vmul.f32 %v1066_v6, %v4415_v54  ;;  %v1068_v61 = vmul.f32 %v1066_v6, %v4422_v57  ;;  %v1079_v5 = vmul.f32 %v1078_v41, %v4415_v54  ;;  %v1080_v1 = vmul.f32 %v1078_v41, %v4422_v57 }
 0x164   :  { %v4845_v19 = vadd.f32 %v1053_v20, %v1045_v10  ;;  %v4847_v26 = vadd.f32 %v1054_v47, %v1046_v4  ;;  %v1090_v52 = vstv %s4811_s15  ;;  %v1102_v43 = vstv %s4815_s16  ;;  %s4991_s15 = sld [smem:[#allocation6 + $0x46]] }
 0x165   :  { %v1071_v48 = vrot.slane %v1067_v50, 1  ;;  %v1072_v37 = vrot.slane %v1068_v61, 1  ;;  %v1083_v28 = vrot.slane %v1079_v5, 2  ;;  %v1084_v38 = vrot.slane %v1080_v1, 2  ;;  %s4995_s16 = sld [smem:[#allocation6 + $0x4f]] }
 0x166   :  { %v1091_v7 = vmul.f32 %v1090_v52, %v4415_v54  ;;  %v1092_v23 = vmul.f32 %v1090_v52, %v4422_v57  ;;  %v1103_v24 = vmul.f32 %v1102_v43, %v4415_v54  ;;  %v1104_v15 = vmul.f32 %v1102_v43, %v4422_v57 }
 0x167   :  { %v1075_v25 = vadd.f32 %v1071_v48, %v1063_v11  ;;  %v1076_v34 = vadd.f32 %v1072_v37, %v1064_v31  ;;  %v1108_v63 = vstv %s4825_s17  ;;  %v1120_v60 = vstv %s4829_s18  ;;  %s5007_s17 = sld [smem:[#allocation6 + $0x58]] }
 0x168   :  { %v1095_v0 = vrot.slane %v1091_v7, 3  ;;  %v1096_v21 = vrot.slane %v1092_v23, 3  ;;  %v1105_v2 = vadd.f32 %v1103_v24, %v4793_v58  ;;  %v1106_v40 = vadd.f32 %v1104_v15, %v4795_v35  ;;  %s5013_s18 = sld [smem:[#allocation6 + $0x61]] }
 0x169   :  { %v1087_v20 = vadd.f32 %v1083_v28, %v1075_v25  ;;  %v1088_v47 = vadd.f32 %v1084_v38, %v1076_v34  ;;  %v1109_v6 = vmul.f32 %v1108_v63, %v4415_v54  ;;  %v1110_v41 = vmul.f32 %v1108_v63, %v4422_v57 }
 0x16a   :  { %v1121_v10 = vmul.f32 %v1120_v60, %v4415_v54  ;;  %v1122_v4 = vmul.f32 %v1120_v60, %v4422_v57  ;;  %v1132_v11 = vstv %s4835_s19  ;;  %v1158_v31 = vstv %s4839_s22  ;;  %s5019_s19 = sld [smem:[#allocation6 + $0x6a]] }
 0x16b   :  { %v4873_v50 = vadd.f32 %v1095_v0, %v1087_v20  ;;  %v4875_v58 = vadd.f32 %v1096_v21, %v1088_v47  ;;  %v1113_v35 = vrot.slane %v1109_v6, 1  ;;  %v1114_v61 = vrot.slane %v1110_v41, 1  ;;  %s5023_s22 = sld [smem:[#allocation6 + $0x73]] }
 0x16c   :  { %v1125_v5 = vrot.slane %v1121_v10, 2  ;;  %v1126_v1 = vrot.slane %v1122_v4, 2  ;;  %v1133_v52 = vmul.f32 %v1132_v11, %v4415_v54  ;;  %v1134_v43 = vmul.f32 %v1132_v11, %v4422_v57 }
 0x16d   :  { %v1117_v48 = vadd.f32 %v1113_v35, %v1105_v2  ;;  %v1118_v37 = vadd.f32 %v1114_v61, %v1106_v40  ;;  %v1159_v28 = vmul.f32 %v1158_v31, %v4437_v18  ;;  %v1160_v38 = vmul.f32 %v1158_v31, %v4411_v53 }
 0x16e   :  { %v1137_v7 = vrot.slane %v1133_v52, 3  ;;  %v1138_v23 = vrot.slane %v1134_v43, 3  ;;  %v1164_v24 = vstv %s4851_s23  ;;  %v1176_v15 = vstv %s4857_s24  ;;  %s5033_s23 = sld [smem:[#allocation6 + $0x7c]] }
 0x16f   :  { %v1129_v25 = vadd.f32 %v1125_v5, %v1117_v48  ;;  %v1130_v54 = vadd.f32 %v1126_v1, %v1118_v37  ;;  %v1161_v57 = vadd.f32 %v1159_v28, %v4821_v56  ;;  %v1162_v34 = vadd.f32 %v1160_v38, %v4823_v9  ;;  %s5037_s24 = sld [smem:[#allocation6 + $0x85]] }
 0x170   :  { %v1165_v63 = vmul.f32 %v1164_v24, %v4437_v18  ;;  %v1166_v60 = vmul.f32 %v1164_v24, %v4411_v53  ;;  %v1177_v0 = vmul.f32 %v1176_v15, %v4437_v18  ;;  %v1178_v21 = vmul.f32 %v1176_v15, %v4411_v53 }
 0x171   :  { %v4897_v2 = vadd.f32 %v1137_v7, %v1129_v25  ;;  %v4899_v40 = vadd.f32 %v1138_v23, %v1130_v54  ;;  %v1188_v20 = vstv %s4863_s0  ;;  %v1200_v56 = vstv %s4867_s25  ;;  %s5043_s0 = sld [smem:[#allocation6 + $0x8e]] }
 0x172   :  { %v1169_v47 = vrot.slane %v1165_v63, 1  ;;  %v1170_v9 = vrot.slane %v1166_v60, 1  ;;  %v1181_v6 = vrot.slane %v1177_v0, 2  ;;  %v1182_v41 = vrot.slane %v1178_v21, 2  ;;  %s5047_s25 = sld [smem:[#allocation6 + $0x8]] }
 0x173   :  { %v1189_v10 = vmul.f32 %v1188_v20, %v4437_v18  ;;  %v1190_v4 = vmul.f32 %v1188_v20, %v4411_v53  ;;  %v1201_v11 = vmul.f32 %v1200_v56, %v4437_v18  ;;  %v1202_v31 = vmul.f32 %v1200_v56, %v4411_v53 }
 0x174   :  { %v1173_v35 = vadd.f32 %v1169_v47, %v1161_v57  ;;  %v1174_v61 = vadd.f32 %v1170_v9, %v1162_v34  ;;  %v1206_v5 = vstv %s4877_s26  ;;  %v1218_v1 = vstv %s4881_s27  ;;  %s5059_s26 = sld [smem:[#allocation6 + $0x11]] }
 0x175   :  { %v1193_v52 = vrot.slane %v1189_v10, 3  ;;  %v1194_v43 = vrot.slane %v1190_v4, 3  ;;  %v1203_v48 = vadd.f32 %v1201_v11, %v4845_v19  ;;  %v1204_v37 = vadd.f32 %v1202_v31, %v4847_v26  ;;  %s5065_s27 = sld [smem:[#allocation6 + $0x1a]] }
 0x176   :  { %v1185_v28 = vadd.f32 %v1181_v6, %v1173_v35  ;;  %v1186_v38 = vadd.f32 %v1182_v41, %v1174_v61  ;;  %v1207_v7 = vmul.f32 %v1206_v5, %v4437_v18  ;;  %v1208_v23 = vmul.f32 %v1206_v5, %v4411_v53 }
 0x177   :  { %v1219_v24 = vmul.f32 %v1218_v1, %v4437_v18  ;;  %v1220_v15 = vmul.f32 %v1218_v1, %v4411_v53  ;;  %v1230_v25 = vstv %s4887_s28  ;;  %v1242_v54 = vstv %s4891_s1  ;;  %s5071_s28 = sld [smem:[#allocation6 + $0x23]] }
 0x178   :  { %v4925_v57 = vadd.f32 %v1193_v52, %v1185_v28  ;;  %v4927_v19 = vadd.f32 %v1194_v43, %v1186_v38  ;;  %v1211_v26 = vrot.slane %v1207_v7, 1  ;;  %v1212_v34 = vrot.slane %v1208_v23, 1  ;;  %s5075_s1 = sld [smem:[#allocation6 + $0x2c]] }
 0x179   :  { %v1223_v63 = vrot.slane %v1219_v24, 2  ;;  %v1224_v60 = vrot.slane %v1220_v15, 2  ;;  %v1231_v0 = vmul.f32 %v1230_v25, %v4437_v18  ;;  %v1232_v21 = vmul.f32 %v1230_v25, %v4411_v53 }
 0x17a   :  { %v1215_v20 = vadd.f32 %v1211_v26, %v1203_v48  ;;  %v1216_v56 = vadd.f32 %v1212_v34, %v1204_v37  ;;  %v1243_v47 = vmul.f32 %v1242_v54, %v4437_v18  ;;  %v1244_v9 = vmul.f32 %v1242_v54, %v4411_v53 }
 0x17b   :  { %v1235_v6 = vrot.slane %v1231_v0, 3  ;;  %v1236_v41 = vrot.slane %v1232_v21, 3  ;;  %v1248_v10 = vstv %s4903_s2  ;;  %v1260_v4 = vstv %s4909_s29  ;;  %s5085_s2 = sld [smem:[#allocation6 + $0x35]] }
 0x17c   :  { %v1227_v11 = vadd.f32 %v1223_v63, %v1215_v20  ;;  %v1228_v31 = vadd.f32 %v1224_v60, %v1216_v56  ;;  %v1245_v35 = vadd.f32 %v1243_v47, %v4873_v50  ;;  %v1246_v61 = vadd.f32 %v1244_v9, %v4875_v58  ;;  %s5089_s29 = sld [smem:[#allocation6 + $0x3e]] }
 0x17d   :  { %v1249_v5 = vmul.f32 %v1248_v10, %v4437_v18  ;;  %v1250_v1 = vmul.f32 %v1248_v10, %v4411_v53  ;;  %v1261_v52 = vmul.f32 %v1260_v4, %v4437_v18  ;;  %v1262_v43 = vmul.f32 %v1260_v4, %v4411_v53 }
 0x17e   :  { %v4949_v48 = vadd.f32 %v1235_v6, %v1227_v11  ;;  %v4951_v37 = vadd.f32 %v1236_v41, %v1228_v31  ;;  %v1272_v28 = vstv %s4915_s30  ;;  %v1284_v50 = vstv %s4919_s4  ;;  %s5095_s30 = sld [smem:[#allocation6 + $0x47]] }
 0x17f   :  { %v1253_v38 = vrot.slane %v1249_v5, 1  ;;  %v1254_v58 = vrot.slane %v1250_v1, 1  ;;  %v1265_v7 = vrot.slane %v1261_v52, 2  ;;  %v1266_v23 = vrot.slane %v1262_v43, 2  ;;  %s5099_s4 = sld [smem:[#allocation6 + $0x50]] }
 0x180   :  { %v1273_v24 = vmul.f32 %v1272_v28, %v4437_v18  ;;  %v1274_v15 = vmul.f32 %v1272_v28, %v4411_v53  ;;  %v1285_v25 = vmul.f32 %v1284_v50, %v4437_v18  ;;  %v1286_v54 = vmul.f32 %v1284_v50, %v4411_v53 }
 0x181   :  { %v1257_v26 = vadd.f32 %v1253_v38, %v1245_v35  ;;  %v1258_v34 = vadd.f32 %v1254_v58, %v1246_v61  ;;  %v1290_v63 = vstv %s4929_s5  ;;  %v1302_v60 = vstv %s4933_s6  ;;  %s5111_s5 = sld [smem:[#allocation6 + $0x59]] }
 0x182   :  { %v1277_v0 = vrot.slane %v1273_v24, 3  ;;  %v1278_v21 = vrot.slane %v1274_v15, 3  ;;  %v1287_v20 = vadd.f32 %v1285_v25, %v4897_v2  ;;  %v1288_v56 = vadd.f32 %v1286_v54, %v4899_v40  ;;  %s5117_s6 = sld [smem:[#allocation6 + $0x62]] }
 0x183   :  { %v1269_v47 = vadd.f32 %v1265_v7, %v1257_v26  ;;  %v1270_v9 = vadd.f32 %v1266_v23, %v1258_v34  ;;  %v1291_v6 = vmul.f32 %v1290_v63, %v4437_v18  ;;  %v1292_v41 = vmul.f32 %v1290_v63, %v4411_v53 }
 0x184   :  { %v1303_v10 = vmul.f32 %v1302_v60, %v4437_v18  ;;  %v1304_v4 = vmul.f32 %v1302_v60, %v4411_v53  ;;  %v1314_v11 = vstv %s4939_s7  ;;  %v1338_v31 = vstv %s4943_s8  ;;  %s5123_s7 = sld [smem:[#allocation6 + $0x6b]] }
 0x185   :  { %v4977_v35 = vadd.f32 %v1277_v0, %v1269_v47  ;;  %v4979_v2 = vadd.f32 %v1278_v21, %v1270_v9  ;;  %v1295_v40 = vrot.slane %v1291_v6, 1  ;;  %v1296_v61 = vrot.slane %v1292_v41, 1  ;;  %s5127_s8 = sld [smem:[#allocation6 + $0x74]] }
 0x186   :  { %v1307_v5 = vrot.slane %v1303_v10, 2  ;;  %v1308_v1 = vrot.slane %v1304_v4, 2  ;;  %v1315_v52 = vmul.f32 %v1314_v11, %v4437_v18  ;;  %v1316_v43 = vmul.f32 %v1314_v11, %v4411_v53 }
 0x187   :  { %v1299_v28 = vadd.f32 %v1295_v40, %v1287_v20  ;;  %v1300_v50 = vadd.f32 %v1296_v61, %v1288_v56  ;;  %v1339_v38 = vmul.f32 %v1338_v31, %v4450_v62  ;;  %v1340_v58 = vmul.f32 %v1338_v31, %v4440_v51 }
 0x188   :  { %v1319_v7 = vrot.slane %v1315_v52, 3  ;;  %v1320_v23 = vrot.slane %v1316_v43, 3  ;;  %v1344_v24 = vstv %s4955_s9  ;;  %v1356_v15 = vstv %s4961_s10  ;;  %s5137_s9 = sld [smem:[#allocation6 + $0x7d]] }
 0x189   :  { %v1311_v25 = vadd.f32 %v1307_v5, %v1299_v28  ;;  %v1312_v18 = vadd.f32 %v1308_v1, %v1300_v50  ;;  %v1341_v53 = vadd.f32 %v1339_v38, %v4925_v57  ;;  %v1342_v54 = vadd.f32 %v1340_v58, %v4927_v19  ;;  %s5141_s10 = sld [smem:[#allocation6 + $0x86]] }
 0x18a   :  { %v1345_v26 = vmul.f32 %v1344_v24, %v4450_v62  ;;  %v1346_v34 = vmul.f32 %v1344_v24, %v4440_v51  ;;  %v1357_v63 = vmul.f32 %v1356_v15, %v4450_v62  ;;  %v1358_v60 = vmul.f32 %v1356_v15, %v4440_v51 }
 0x18b   :  { %v5001_v0 = vadd.f32 %v1319_v7, %v1311_v25  ;;  %v5003_v21 = vadd.f32 %v1320_v23, %v1312_v18  ;;  %v1368_v20 = vstv %s4971_s12  ;;  %v1380_v57 = vstv %s4967_s11  ;;  %s5149_s11 = sld [smem:[#allocation6 + $0x8f]] }
 0x18c   :  { %v1349_v56 = vrot.slane %v1345_v26, 1  ;;  %v1350_v19 = vrot.slane %v1346_v34, 1  ;;  %v1361_v47 = vrot.slane %v1357_v63, 2  ;;  %v1362_v9 = vrot.slane %v1358_v60, 2  ;;  %s5161_s12 = sld [smem:[#allocation6 + $0x2]] }
 0x18d   :  { %v1369_v6 = vmul.f32 %v1368_v20, %v4450_v62  ;;  %v1370_v41 = vmul.f32 %v1368_v20, %v4440_v51  ;;  %v1381_v10 = vmul.f32 %v1380_v57, %v4450_v62  ;;  %v1382_v4 = vmul.f32 %v1380_v57, %v4440_v51 }
 0x18e   :  { %v1353_v11 = vadd.f32 %v1349_v56, %v1341_v53  ;;  %v1354_v31 = vadd.f32 %v1350_v19, %v1342_v54  ;;  %v1386_v40 = vstv %s4981_s13  ;;  %v1398_v61 = vstv %s4985_s14  ;;  %s5165_s13 = sld [smem:[#allocation6 + $0xb]] }
 0x18f   :  { %v1373_v5 = vrot.slane %v1369_v6, 3  ;;  %v1374_v1 = vrot.slane %v1370_v41, 3  ;;  %v1383_v52 = vadd.f32 %v1381_v10, %v4949_v48  ;;  %v1384_v43 = vadd.f32 %v1382_v4, %v4951_v37  ;;  %s5169_s14 = sld [smem:[#allocation6 + $0x14]] }
 0x190   :  { %v1365_v28 = vadd.f32 %v1361_v47, %v1353_v11  ;;  %v1366_v50 = vadd.f32 %v1362_v9, %v1354_v31  ;;  %v1387_v38 = vmul.f32 %v1386_v40, %v4450_v62  ;;  %v1388_v58 = vmul.f32 %v1386_v40, %v4440_v51 }
 0x191   :  { %v1399_v7 = vmul.f32 %v1398_v61, %v4450_v62  ;;  %v1400_v23 = vmul.f32 %v1398_v61, %v4440_v51  ;;  %v1410_v24 = vstv %s4991_s15  ;;  %v1422_v15 = vstv %s4995_s16  ;;  %s5177_s15 = sld [smem:[#allocation6 + $0x1d]] }
 0x192   :  { %v5029_v25 = vadd.f32 %v1373_v5, %v1365_v28  ;;  %v5031_v48 = vadd.f32 %v1374_v1, %v1366_v50  ;;  %v1391_v37 = vrot.slane %v1387_v38, 1  ;;  %v1392_v18 = vrot.slane %v1388_v58, 1  ;;  %s5181_s16 = sld [smem:[#allocation6 + $0x26]] }
 0x193   :  { %v1403_v53 = vrot.slane %v1399_v7, 2  ;;  %v1404_v54 = vrot.slane %v1400_v23, 2  ;;  %v1411_v26 = vmul.f32 %v1410_v24, %v4450_v62  ;;  %v1412_v34 = vmul.f32 %v1410_v24, %v4440_v51 }
 0x194   :  { %v1395_v63 = vadd.f32 %v1391_v37, %v1383_v52  ;;  %v1396_v60 = vadd.f32 %v1392_v18, %v1384_v43  ;;  %v1423_v20 = vmul.f32 %v1422_v15, %v4450_v62  ;;  %v1424_v57 = vmul.f32 %v1422_v15, %v4440_v51 }
 0x195   :  { %v1415_v56 = vrot.slane %v1411_v26, 3  ;;  %v1416_v19 = vrot.slane %v1412_v34, 3  ;;  %v1428_v47 = vstv %s5007_s17  ;;  %v1440_v9 = vstv %s5013_s18  ;;  %s5185_s17 = sld [smem:[#allocation6 + $0x2f]] }
 0x196   :  { %v1407_v6 = vadd.f32 %v1403_v53, %v1395_v63  ;;  %v1408_v41 = vadd.f32 %v1404_v54, %v1396_v60  ;;  %v1425_v10 = vadd.f32 %v1423_v20, %v4977_v35  ;;  %v1426_v4 = vadd.f32 %v1424_v57, %v4979_v2  ;;  %s5197_s18 = sld [smem:[#allocation6 + $0x38]] }
 0x197   :  { %v1429_v11 = vmul.f32 %v1428_v47, %v4450_v62  ;;  %v1430_v31 = vmul.f32 %v1428_v47, %v4440_v51  ;;  %v1441_v40 = vmul.f32 %v1440_v9, %v4450_v62  ;;  %v1442_v61 = vmul.f32 %v1440_v9, %v4440_v51 }
 0x198   :  { %v5053_v5 = vadd.f32 %v1415_v56, %v1407_v6  ;;  %v5055_v1 = vadd.f32 %v1416_v19, %v1408_v41  ;;  %v1452_v52 = vstv %s5019_s19  ;;  %v1464_v35 = vstv %s5023_s22  ;;  %s5203_s19 = sld [smem:[#allocation6 + $0x41]] }
 0x199   :  { %v1433_v43 = vrot.slane %v1429_v11, 1  ;;  %v1434_v2 = vrot.slane %v1430_v31, 1  ;;  %v1445_v28 = vrot.slane %v1441_v40, 2  ;;  %v1446_v50 = vrot.slane %v1442_v61, 2  ;;  %s5214_s22 = sld [smem:[#allocation6 + $0x4a]] }
 0x19a   :  { %v1453_v38 = vmul.f32 %v1452_v52, %v4450_v62  ;;  %v1454_v58 = vmul.f32 %v1452_v52, %v4440_v51  ;;  %v1465_v7 = vmul.f32 %v1464_v35, %v4450_v62  ;;  %v1466_v23 = vmul.f32 %v1464_v35, %v4440_v51 }
 0x19b   :  { %v1437_v24 = vadd.f32 %v1433_v43, %v1425_v10  ;;  %v1438_v15 = vadd.f32 %v1434_v2, %v1426_v4  ;;  %v1470_v37 = vstv %s5033_s23  ;;  %v1482_v18 = vstv %s5037_s24  ;;  %s5217_s23 = sld [smem:[#allocation6 + $0x53]] }
 0x19c   :  { %v1457_v53 = vrot.slane %v1453_v38, 3  ;;  %v1458_v54 = vrot.slane %v1454_v58, 3  ;;  %v1467_v26 = vadd.f32 %v1465_v7, %v5001_v0  ;;  %v1468_v34 = vadd.f32 %v1466_v23, %v5003_v21  ;;  %s5226_s24 = sld [smem:[#allocation6 + $0x5c]] }
 0x19d   :  { %v1449_v63 = vadd.f32 %v1445_v28, %v1437_v24  ;;  %v1450_v60 = vadd.f32 %v1446_v50, %v1438_v15  ;;  %v1471_v20 = vmul.f32 %v1470_v37, %v4450_v62  ;;  %v1472_v57 = vmul.f32 %v1470_v37, %v4440_v51 }
 0x19e   :  { %v1483_v56 = vmul.f32 %v1482_v18, %v4450_v62  ;;  %v1484_v19 = vmul.f32 %v1482_v18, %v4440_v51  ;;  %v1494_v47 = vstv %s5043_s0  ;;  %v1520_v9 = vstv %s5047_s25  ;;  %s5230_s0 = sld [smem:[#allocation6 + $0x65]] }
 0x19f   :  { %v5081_v6 = vadd.f32 %v1457_v53, %v1449_v63  ;;  %v5083_v0 = vadd.f32 %v1458_v54, %v1450_v60  ;;  %v1475_v21 = vrot.slane %v1471_v20, 1  ;;  %v1476_v41 = vrot.slane %v1472_v57, 1  ;;  %s5242_s25 = sld [smem:[#allocation6 + $0x6e]] }
 0x1a0   :  { %v1487_v10 = vrot.slane %v1483_v56, 2  ;;  %v1488_v4 = vrot.slane %v1484_v19, 2  ;;  %v1495_v11 = vmul.f32 %v1494_v47, %v4450_v62  ;;  %v1496_v31 = vmul.f32 %v1494_v47, %v4440_v51 }
 0x1a1   :  { %v1479_v40 = vadd.f32 %v1475_v21, %v1467_v26  ;;  %v1480_v61 = vadd.f32 %v1476_v41, %v1468_v34  ;;  %v1521_v52 = vmul.f32 %v1520_v9, %v4511_v14  ;;  %v1522_v35 = vmul.f32 %v1520_v9, %v4508_v42 }
 0x1a2   :  { %v1499_v43 = vrot.slane %v1495_v11, 3  ;;  %v1500_v2 = vrot.slane %v1496_v31, 3  ;;  %v1526_v28 = vstv %s5059_s26  ;;  %v1538_v50 = vstv %s5065_s27  ;;  %s5248_s26 = sld [smem:[#allocation6 + $0x77]] }
 0x1a3   :  { %v1491_v38 = vadd.f32 %v1487_v10, %v1479_v40  ;;  %v1492_v62 = vadd.f32 %v1488_v4, %v1480_v61  ;;  %v1523_v51 = vadd.f32 %v1521_v52, %v5029_v25  ;;  %v1524_v58 = vadd.f32 %v1522_v35, %v5031_v48  ;;  %s5252_s27 = sld [smem:[#allocation6 + $0x80]] }
 0x1a4   :  { %v1527_v7 = vmul.f32 %v1526_v28, %v4511_v14  ;;  %v1528_v23 = vmul.f32 %v1526_v28, %v4508_v42  ;;  %v1539_v24 = vmul.f32 %v1538_v50, %v4511_v14  ;;  %v1540_v15 = vmul.f32 %v1538_v50, %v4508_v42 }
 0x1a5   :  { %v5105_v37 = vadd.f32 %v1499_v43, %v1491_v38  ;;  %v5107_v18 = vadd.f32 %v1500_v2, %v1492_v62  ;;  %v1550_v53 = vstv %s5071_s28  ;;  %v1562_v25 = vstv %s5075_s1  ;;  %s5258_s28 = sld [smem:[#allocation6 + $0x89]] }
 0x1a6   :  { %v1531_v54 = vrot.slane %v1527_v7, 1  ;;  %v1532_v48 = vrot.slane %v1528_v23, 1  ;;  %v1543_v26 = vrot.slane %v1539_v24, 2  ;;  %v1544_v34 = vrot.slane %v1540_v15, 2  ;;  %s5264_s1 = sld [smem:[#allocation6 + $0x3]] }
 0x1a7   :  { %v1551_v63 = vmul.f32 %v1550_v53, %v4511_v14  ;;  %v1552_v60 = vmul.f32 %v1550_v53, %v4508_v42  ;;  %v1563_v20 = vmul.f32 %v1562_v25, %v4511_v14  ;;  %v1564_v57 = vmul.f32 %v1562_v25, %v4508_v42 }
 0x1a8   :  { %v1535_v56 = vadd.f32 %v1531_v54, %v1523_v51  ;;  %v1536_v19 = vadd.f32 %v1532_v48, %v1524_v58  ;;  %v1568_v47 = vstv %s5085_s2  ;;  %v1580_v9 = vstv %s5089_s29  ;;  %s5272_s2 = sld [smem:[#allocation6 + $0xc]] }
 0x1a9   :  { %v1555_v21 = vrot.slane %v1551_v63, 3  ;;  %v1556_v41 = vrot.slane %v1552_v60, 3  ;;  %v1565_v10 = vadd.f32 %v1563_v20, %v5053_v5  ;;  %v1566_v4 = vadd.f32 %v1564_v57, %v5055_v1  ;;  %s5278_s29 = sld [smem:[#allocation6 + $0x15]] }
 0x1aa   :  { %v1547_v11 = vadd.f32 %v1543_v26, %v1535_v56  ;;  %v1548_v31 = vadd.f32 %v1544_v34, %v1536_v19  ;;  %v1569_v40 = vmul.f32 %v1568_v47, %v4511_v14  ;;  %v1570_v61 = vmul.f32 %v1568_v47, %v4508_v42 }
 0x1ab   :  { %v1581_v52 = vmul.f32 %v1580_v9, %v4511_v14  ;;  %v1582_v35 = vmul.f32 %v1580_v9, %v4508_v42  ;;  %v1592_v43 = vstv %s5095_s30  ;;  %v1604_v2 = vstv %s5099_s4  ;;  %s5282_s30 = sld [smem:[#allocation6 + $0x1e]] }
 0x1ac   :  { %v5133_v28 = vadd.f32 %v1555_v21, %v1547_v11  ;;  %v5135_v5 = vadd.f32 %v1556_v41, %v1548_v31  ;;  %v1573_v1 = vrot.slane %v1569_v40, 1  ;;  %v1574_v50 = vrot.slane %v1570_v61, 1  ;;  %s5294_s4 = sld [smem:[#allocation6 + $0x27]] }
 0x1ad   :  { %v1585_v38 = vrot.slane %v1581_v52, 2  ;;  %v1586_v62 = vrot.slane %v1582_v35, 2  ;;  %v1593_v51 = vmul.f32 %v1592_v43, %v4511_v14  ;;  %v1594_v58 = vmul.f32 %v1592_v43, %v4508_v42 }
 0x1ae   :  { %v1577_v7 = vadd.f32 %v1573_v1, %v1565_v10  ;;  %v1578_v23 = vadd.f32 %v1574_v50, %v1566_v4  ;;  %v1605_v24 = vmul.f32 %v1604_v2, %v4511_v14  ;;  %v1606_v15 = vmul.f32 %v1604_v2, %v4508_v42 }
 0x1af   :  { %v1597_v53 = vrot.slane %v1593_v51, 3  ;;  %v1598_v25 = vrot.slane %v1594_v58, 3  ;;  %v1610_v54 = vstv %s5111_s5  ;;  %v1622_v48 = vstv %s5117_s6  ;;  %s5300_s5 = sld [smem:[#allocation6 + $0x30]] }
 0x1b0   :  { %v1589_v26 = vadd.f32 %v1585_v38, %v1577_v7  ;;  %v1590_v34 = vadd.f32 %v1586_v62, %v1578_v23  ;;  %v1607_v63 = vadd.f32 %v1605_v24, %v5081_v6  ;;  %v1608_v60 = vadd.f32 %v1606_v15, %v5083_v0  ;;  %s5304_s6 = sld [smem:[#allocation6 + $0x39]] }
 0x1b1   :  { %v1611_v20 = vmul.f32 %v1610_v54, %v4511_v14  ;;  %v1612_v57 = vmul.f32 %v1610_v54, %v4508_v42  ;;  %v1623_v56 = vmul.f32 %v1622_v48, %v4511_v14  ;;  %v1624_v19 = vmul.f32 %v1622_v48, %v4508_v42 }
 0x1b2   :  { %v1601_v47 = vadd.f32 %v1597_v53, %v1589_v26  ;;  %v1602_v9 = vadd.f32 %v1598_v25, %v1590_v34  ;;  %v1634_v21 = vstv %s5123_s7  ;;  %v1646_v41 = vstv %s5127_s8  ;;  %s5310_s7 = sld [smem:[#allocation6 + $0x42]] }
 0x1b3   :  { %v1615_v10 = vrot.slane %v1611_v20, 1  ;;  %v1616_v6 = vrot.slane %v1612_v57, 1  ;;  %v1627_v4 = vrot.slane %v1623_v56, 2  ;;  %v1628_v0 = vrot.slane %v1624_v19, 2  ;;  %s5316_s8 = sld [smem:[#allocation6 + $0x4b]] }
 0x1b4   :  { %v1635_v11 = vmul.f32 %v1634_v21, %v4511_v14  ;;  %v1636_v31 = vmul.f32 %v1634_v21, %v4508_v42  ;;  %v1647_v40 = vmul.f32 %v1646_v41, %v4511_v14  ;;  %v1648_v61 = vmul.f32 %v1646_v41, %v4508_v42 }
 0x1b5   :  { %v1619_v52 = vadd.f32 %v1615_v10, %v1607_v63  ;;  %v1620_v35 = vadd.f32 %v1616_v6, %v1608_v60  ;;  %v1652_v43 = vstv %s5137_s9  ;;  %v1664_v2 = vstv %s5141_s10  ;;  %s5324_s9 = sld [smem:[#allocation6 + $0x54]] }
 0x1b6   :  { %v1639_v1 = vrot.slane %v1635_v11, 3  ;;  %v1640_v50 = vrot.slane %v1636_v31, 3  ;;  %v1649_v38 = vadd.f32 %v1647_v40, %v5105_v37  ;;  %v1650_v62 = vadd.f32 %v1648_v61, %v5107_v18  ;;  %s5330_s10 = sld [smem:[#allocation6 + $0x5d]] }
 0x1b7   :  { %v1631_v51 = vadd.f32 %v1627_v4, %v1619_v52  ;;  %v1632_v58 = vadd.f32 %v1628_v0, %v1620_v35  ;;  %v1653_v7 = vmul.f32 %v1652_v43, %v4511_v14  ;;  %v1654_v23 = vmul.f32 %v1652_v43, %v4508_v42 }
 0x1b8   :  { %v1665_v24 = vmul.f32 %v1664_v2, %v4511_v14  ;;  %v1666_v15 = vmul.f32 %v1664_v2, %v4508_v42  ;;  %v1676_v53 = vstv %s5149_s11  ;;  %v1689_v25 = vrot.slane %v5135_v5, 7  ;;  %s5334_s11 = sld [smem:[#allocation6 + $0x66]] }
 0x1b9   :  { %v1643_v54 = vadd.f32 %v1639_v1, %v1631_v51  ;;  %v1644_v48 = vadd.f32 %v1640_v50, %v1632_v58  ;;  %v1657_v37 = vrot.slane %v1653_v7, 1  ;;  %v1658_v26 = vrot.slane %v1654_v23, 1 }
 0x1ba   :  { %v1669_v18 = vrot.slane %v1665_v24, 2  ;;  %v1670_v34 = vrot.slane %v1666_v15, 2  ;;  %v1677_v63 = vmul.f32 %v1676_v53, %v4511_v14  ;;  %v1678_v60 = vmul.f32 %v1676_v53, %v4508_v42 }
 0x1bb   :  { %v1661_v20 = vadd.f32 %v1657_v37, %v1649_v38  ;;  %v1662_v57 = vadd.f32 %v1658_v26, %v1650_v62  ;;  %v1693_v56 = vlaneseq  ;;  %v1691_v21 = vsel %vm1690_vm8, %v5133_v28, %v1689_v25 }
 0x1bc   :  { %v1681_v5 = vrot.slane %v1677_v63, 3  ;;  %v1682_v19 = vrot.slane %v1678_v60, 3  ;;  %v1700_v41 = vrot.slane %v1602_v9, 7  ;;  %v1707_v6 = vrot.slane %v1644_v48, 7 }
 0x1bd   :  { %v1673_v14 = vadd.f32 %v1669_v18, %v1661_v20  ;;  %v1674_v10 = vadd.f32 %v1670_v34, %v1662_v57  ;;  %vm5187_vm9 = vcmp.lt.s32.totalorder %v1693_v56, 256  ;;  %v2108_v0 = vstv %s5161_s12  ;;  %s5346_s12 = sld [smem:[#allocation6 + $0x6f]] }
 0x1be   :  { %1697 = vst.msk [vmem:[#allocation9] ss:$4 sm:$0x3] %vm5187_vm9, %v1691_v21  ;;  %v1701_v4 = vsel %vm1690_vm8, %v1601_v47, %v1700_v41  ;;  %v2114_v11 = vstv %s5165_s13  ;;  %v2126_v31 = vstv %s5169_s14  ;;  %v1708_v40 = vsel %vm1690_vm8, %v1643_v54, %v1707_v6  ;;  %s5352_s13 = sld [smem:[#allocation6 + $0x78]] }
 0x1bf   :  { %v1685_v28 = vadd.f32 %v1681_v5, %v1673_v14  ;;  %v1686_v9 = vadd.f32 %v1682_v19, %v1674_v10  ;;  %1704 = vst.msk [vmem:[#allocation9 + $0x1] ss:$4 sm:$0x3] %vm5187_vm9, %v1701_v4  ;;  %v2109_v61 = vmul.f32 %v2108_v0, %v4378_v22  ;;  %v2110_v47 = vmul.f32 %v2108_v0, %v4388_v45  ;;  %s5356_s14 = sld [smem:[#allocation6 + $0x81]] }
 0x1c0   :  { %1711 = vst.msk [vmem:[#allocation9 + $0x2] ss:$4 sm:$0x3] %vm5187_vm9, %v1708_v40  ;;  %v2115_v52 = vmul.f32 %v2114_v11, %v4378_v22  ;;  %v2116_v35 = vmul.f32 %v2114_v11, %v4388_v45  ;;  %v2127_v43 = vmul.f32 %v2126_v31, %v4378_v22  ;;  %v2128_v50 = vmul.f32 %v2126_v31, %v4388_v45 }
 0x1c1   :  { %v1714_v2 = vrot.slane %v1686_v9, 7  ;;  %v2111_v1 = vadd.f32 %v2109_v61, %v4275_v33  ;;  %v2138_v38 = vstv %s5177_s15  ;;  %v2112_v62 = vadd.f32 %v2110_v47, %v4350_v59  ;;  %s5362_s15 = sld [smem:[#allocation6 + $0x8a]] }
 0x1c2   :  { %v2119_v51 = vrot.slane %v2115_v52, 1  ;;  %v2120_v58 = vrot.slane %v2116_v35, 1  ;;  %v2131_v7 = vrot.slane %v2127_v43, 2  ;;  %v2132_v24 = vrot.slane %v2128_v50, 2 }
 0x1c3   :  { %v1715_v23 = vsel %vm1690_vm8, %v1685_v28, %v1714_v2  ;;  %v2139_v15 = vmul.f32 %v2138_v38, %v4378_v22  ;;  %v2140_v33 = vmul.f32 %v2138_v38, %v4388_v45  ;;  %v2150_v59 = vstv %s5181_s16  ;;  %s5368_s16 = sld [smem:[#allocation6 + $0x4]] }
 0x1c4   :  { %1718 = vst.msk [vmem:[#allocation9 + $0x3] ss:$4 sm:$0x3] %vm5187_vm9, %v1715_v23  ;;  %v2123_v53 = vadd.f32 %v2119_v51, %v2111_v1  ;;  %v2124_v25 = vadd.f32 %v2120_v58, %v2112_v62  ;;  %v2156_v54 = vstv %s5185_s17  ;;  %v2151_v26 = vmul.f32 %v2150_v59, %v4378_v22  ;;  %s5376_s17 = sld [smem:[#allocation6 + $0xd]] }
 0x1c5   :  { %v2143_v48 = vrot.slane %v2139_v15, 3  ;;  %v2144_v37 = vrot.slane %v2140_v33, 3  ;;  %v2152_v18 = vmul.f32 %v2150_v59, %v4388_v45  ;;  %v2157_v60 = vmul.f32 %v2156_v54, %v4378_v22 }
 0x1c6   :  { %v2135_v34 = vadd.f32 %v2131_v7, %v2123_v53  ;;  %v2136_v63 = vadd.f32 %v2132_v24, %v2124_v25  ;;  %v2158_v20 = vmul.f32 %v2156_v54, %v4388_v45  ;;  %v2153_v57 = vadd.f32 %v2151_v26, %v4284_v27 }
 0x1c7   :  { %v2154_v56 = vadd.f32 %v2152_v18, %v4355_v16  ;;  %v2168_v5 = vstv %s5197_s18  ;;  %v2180_v19 = vstv %s5203_s19  ;;  %v2161_v14 = vrot.slane %v2157_v60, 1  ;;  %s5380_s18 = sld [smem:[#allocation6 + $0x16]] }
 0x1c8   :  { %v5238_v21 = vadd.f32 %v2143_v48, %v2135_v34  ;;  %v5240_v41 = vadd.f32 %v2144_v37, %v2136_v63  ;;  %v2162_v10 = vrot.slane %v2158_v20, 1  ;;  %v2169_v6 = vmul.f32 %v2168_v5, %v4378_v22  ;;  %s5384_s19 = sld [smem:[#allocation6 + $0x1f]] }
 0x1c9   :  { %v2170_v4 = vmul.f32 %v2168_v5, %v4388_v45  ;;  %v2181_v27 = vmul.f32 %v2180_v19, %v4378_v22  ;;  %v2182_v0 = vmul.f32 %v2180_v19, %v4388_v45  ;;  %v2165_v16 = vadd.f32 %v2161_v14, %v2153_v57 }
 0x1ca   :  { %v2166_v11 = vadd.f32 %v2162_v10, %v2154_v56  ;;  %v2192_v31 = vstv %s5214_s22  ;;  %v2198_v28 = vstv %s5217_s23  ;;  %v2173_v9 = vrot.slane %v2169_v6, 2  ;;  %s5390_s22 = sld [smem:[#allocation6 + $0x28]] }
 0x1cb   :  { %v2174_v40 = vrot.slane %v2170_v4, 2  ;;  %v2185_v61 = vrot.slane %v2181_v27, 3  ;;  %v2186_v47 = vrot.slane %v2182_v0, 3  ;;  %v2193_v52 = vmul.f32 %v2192_v31, %v4378_v22  ;;  %s5396_s23 = sld [smem:[#allocation6 + $0x31]] }
 0x1cc   :  { %v2194_v35 = vmul.f32 %v2192_v31, %v4388_v45  ;;  %v2199_v43 = vmul.f32 %v2198_v28, %v4378_v22  ;;  %v2200_v2 = vmul.f32 %v2198_v28, %v4388_v45  ;;  %v2177_v1 = vadd.f32 %v2173_v9, %v2165_v16 }
 0x1cd   :  { %v2178_v50 = vadd.f32 %v2174_v40, %v2166_v11  ;;  %v2210_v38 = vstv %s5226_s24  ;;  %v2222_v62 = vstv %s5230_s0  ;;  %v2195_v51 = vadd.f32 %v2193_v52, %v4298_v30  ;;  %s5402_s24 = sld [smem:[#allocation6 + $0x3a]] }
 0x1ce   :  { %v2196_v58 = vadd.f32 %v2194_v35, %v4375_v39  ;;  %v2203_v7 = vrot.slane %v2199_v43, 1  ;;  %v2204_v23 = vrot.slane %v2200_v2, 1  ;;  %v5266_v24 = vadd.f32 %v2185_v61, %v2177_v1  ;;  %s5408_s0 = sld [smem:[#allocation6 + $0x43]] }
 0x1cf   :  { %v5268_v15 = vadd.f32 %v2186_v47, %v2178_v50  ;;  %v2211_v33 = vmul.f32 %v2210_v38, %v4378_v22  ;;  %v2212_v53 = vmul.f32 %v2210_v38, %v4388_v45  ;;  %v2223_v59 = vmul.f32 %v2222_v62, %v4378_v22 }
 0x1d0   :  { %v2207_v25 = vadd.f32 %v2203_v7, %v2195_v51  ;;  %v2208_v30 = vadd.f32 %v2204_v23, %v2196_v58  ;;  %v2224_v39 = vmul.f32 %v2222_v62, %v4388_v45  ;;  %v2234_v37 = vstv %s5242_s25  ;;  %s5412_s25 = sld [smem:[#allocation6 + $0x4c]] }
 0x1d1   :  { %v2215_v54 = vrot.slane %v2211_v33, 2  ;;  %v2216_v48 = vrot.slane %v2212_v53, 2  ;;  %v2240_v26 = vstv %s5248_s26  ;;  %v2227_v18 = vrot.slane %v2223_v59, 3  ;;  %s5414_s26 = sld [smem:[#allocation6 + $0x55]] }
 0x1d2   :  { %v2228_v34 = vrot.slane %v2224_v39, 3  ;;  %v2235_v63 = vmul.f32 %v2234_v37, %v4378_v22  ;;  %v2236_v60 = vmul.f32 %v2234_v37, %v4388_v45  ;;  %v2241_v56 = vmul.f32 %v2240_v26, %v4378_v22 }
 0x1d3   :  { %v2219_v20 = vadd.f32 %v2215_v54, %v2207_v25  ;;  %v2220_v57 = vadd.f32 %v2216_v48, %v2208_v30  ;;  %v2242_v5 = vmul.f32 %v2240_v26, %v4388_v45  ;;  %v2252_v10 = vstv %s5252_s27  ;;  %s5426_s27 = sld [smem:[#allocation6 + $0x5e]] }
 0x1d4   :  { %v2237_v19 = vadd.f32 %v2235_v63, %v4312_v46  ;;  %v2238_v14 = vadd.f32 %v2236_v60, %v4399_v29  ;;  %v2264_v6 = vstv %s5258_s28  ;;  %v2245_v0 = vrot.slane %v2241_v56, 1  ;;  %s5430_s28 = sld [smem:[#allocation6 + $0x67]] }
 0x1d5   :  { %v5290_v4 = vadd.f32 %v2227_v18, %v2219_v20  ;;  %v5292_v27 = vadd.f32 %v2228_v34, %v2220_v57  ;;  %v2246_v16 = vrot.slane %v2242_v5, 1  ;;  %v2253_v11 = vmul.f32 %v2252_v10, %v4378_v22 }
 0x1d6   :  { %v2254_v31 = vmul.f32 %v2252_v10, %v4388_v45  ;;  %v2265_v46 = vmul.f32 %v2264_v6, %v4378_v22  ;;  %v2266_v28 = vmul.f32 %v2264_v6, %v4388_v45  ;;  %v2249_v29 = vadd.f32 %v2245_v0, %v2237_v19 }
 0x1d7   :  { %v2250_v9 = vadd.f32 %v2246_v16, %v2238_v14  ;;  %v2289_v40 = vstv %s5264_s1  ;;  %v2295_v61 = vstv %s5272_s2  ;;  %v2257_v47 = vrot.slane %v2253_v11, 2  ;;  %s5438_s1 = sld [smem:[#allocation6 + $0x70]] }
 0x1d8   :  { %v2258_v52 = vrot.slane %v2254_v31, 2  ;;  %v2269_v35 = vrot.slane %v2265_v46, 3  ;;  %v2270_v43 = vrot.slane %v2266_v28, 3  ;;  %v2290_v2 = vmul.f32 %v2289_v40, %v4391_v36  ;;  %s5444_s2 = sld [smem:[#allocation6 + $0x79]] }
 0x1d9   :  { %v2291_v22 = vmul.f32 %v2289_v40, %v4394_v32  ;;  %v2296_v45 = vmul.f32 %v2295_v61, %v4391_v36  ;;  %v2297_v1 = vmul.f32 %v2295_v61, %v4394_v32  ;;  %v2261_v50 = vadd.f32 %v2257_v47, %v2249_v29 }
 0x1da   :  { %v2262_v38 = vadd.f32 %v2258_v52, %v2250_v9  ;;  %v2307_v62 = vstv %s5278_s29  ;;  %v2319_v51 = vstv %s5282_s30  ;;  %v2292_v58 = vadd.f32 %v2290_v2, %v5238_v21  ;;  %s5446_s29 = sld [smem:[#allocation6 + $0x82]] }
 0x1db   :  { %v2293_v7 = vadd.f32 %v2291_v22, %v5240_v41  ;;  %v2300_v23 = vrot.slane %v2296_v45, 1  ;;  %v2301_v33 = vrot.slane %v2297_v1, 1  ;;  %v5318_v53 = vadd.f32 %v2269_v35, %v2261_v50  ;;  %s5454_s30 = sld [smem:[#allocation6 + $0x8b]] }
 0x1dc   :  { %v5320_v25 = vadd.f32 %v2270_v43, %v2262_v38  ;;  %v2308_v30 = vmul.f32 %v2307_v62, %v4391_v36  ;;  %v2309_v59 = vmul.f32 %v2307_v62, %v4394_v32  ;;  %v2320_v54 = vmul.f32 %v2319_v51, %v4391_v36 }
 0x1dd   :  { %v2304_v39 = vadd.f32 %v2300_v23, %v2292_v58  ;;  %v2305_v21 = vadd.f32 %v2301_v33, %v2293_v7  ;;  %v2321_v41 = vmul.f32 %v2319_v51, %v4394_v32  ;;  %v2331_v26 = vstv %s5294_s4  ;;  %s5460_s4 = sld [smem:[#allocation6 + $0x5]] }
 0x1de   :  { %v2312_v48 = vrot.slane %v2308_v30, 2  ;;  %v2313_v37 = vrot.slane %v2309_v59, 2  ;;  %v2337_v18 = vstv %s5300_s5  ;;  %v2324_v34 = vrot.slane %v2320_v54, 3  ;;  %s5462_s5 = sld [smem:[#allocation6 + $0xe]] }
 0x1df   :  { %v2325_v63 = vrot.slane %v2321_v41, 3  ;;  %v2332_v60 = vmul.f32 %v2331_v26, %v4391_v36  ;;  %v2333_v20 = vmul.f32 %v2331_v26, %v4394_v32  ;;  %v2338_v5 = vmul.f32 %v2337_v18, %v4391_v36 }
 0x1e0   :  { %v2316_v57 = vadd.f32 %v2312_v48, %v2304_v39  ;;  %v2317_v56 = vadd.f32 %v2313_v37, %v2305_v21  ;;  %v2339_v19 = vmul.f32 %v2337_v18, %v4394_v32  ;;  %v2349_v6 = vstv %s5304_s6  ;;  %s5466_s6 = sld [smem:[#allocation6 + $0x17]] }
 0x1e1   :  { %v2334_v14 = vadd.f32 %v2332_v60, %v5266_v24  ;;  %v2335_v10 = vadd.f32 %v2333_v20, %v5268_v15  ;;  %v2361_v0 = vstv %s5310_s7  ;;  %v2342_v31 = vrot.slane %v2338_v5, 1  ;;  %s5472_s7 = sld [smem:[#allocation6 + $0x20]] }
 0x1e2   :  { %v5342_v16 = vadd.f32 %v2324_v34, %v2316_v57  ;;  %v5344_v11 = vadd.f32 %v2325_v63, %v2317_v56  ;;  %v2343_v46 = vrot.slane %v2339_v19, 1  ;;  %v2350_v28 = vmul.f32 %v2349_v6, %v4391_v36 }
 0x1e3   :  { %v2351_v29 = vmul.f32 %v2349_v6, %v4394_v32  ;;  %v2362_v24 = vmul.f32 %v2361_v0, %v4391_v36  ;;  %v2363_v9 = vmul.f32 %v2361_v0, %v4394_v32  ;;  %v2346_v15 = vadd.f32 %v2342_v31, %v2334_v14 }
 0x1e4   :  { %v2347_v40 = vadd.f32 %v2343_v46, %v2335_v10  ;;  %v2373_v61 = vstv %s5316_s8  ;;  %v2379_v47 = vstv %s5324_s9  ;;  %v2354_v52 = vrot.slane %v2350_v28, 2  ;;  %s5484_s8 = sld [smem:[#allocation6 + $0x29]] }
 0x1e5   :  { %v2355_v35 = vrot.slane %v2351_v29, 2  ;;  %v2366_v43 = vrot.slane %v2362_v24, 3  ;;  %v2367_v2 = vrot.slane %v2363_v9, 3  ;;  %v2374_v22 = vmul.f32 %v2373_v61, %v4391_v36  ;;  %s5490_s9 = sld [smem:[#allocation6 + $0x32]] }
 0x1e6   :  { %v2375_v45 = vmul.f32 %v2373_v61, %v4394_v32  ;;  %v2380_v1 = vmul.f32 %v2379_v47, %v4391_v36  ;;  %v2381_v50 = vmul.f32 %v2379_v47, %v4394_v32  ;;  %v2358_v38 = vadd.f32 %v2354_v52, %v2346_v15 }
 0x1e7   :  { %v2359_v62 = vadd.f32 %v2355_v35, %v2347_v40  ;;  %v2391_v51 = vstv %s5330_s10  ;;  %v2403_v58 = vstv %s5334_s11  ;;  %v2376_v7 = vadd.f32 %v2374_v22, %v5290_v4  ;;  %s5498_s10 = sld [smem:[#allocation6 + $0x3b]] }
 0x1e8   :  { %v2377_v23 = vadd.f32 %v2375_v45, %v5292_v27  ;;  %v2384_v33 = vrot.slane %v2380_v1, 1  ;;  %v2385_v30 = vrot.slane %v2381_v50, 1  ;;  %v5370_v59 = vadd.f32 %v2366_v43, %v2358_v38  ;;  %v6012_v45 = vld [vmem:[#allocation15_spill] sm:$0xff]  ;;  %s5502_s11 = sld [smem:[#allocation6 + $0x44]] }
 0x1e9   :  { %v5372_v39 = vadd.f32 %v2367_v2, %v2359_v62  ;;  %v2392_v21 = vmul.f32 %v2391_v51, %v4391_v36  ;;  %v2393_v54 = vmul.f32 %v2391_v51, %v4394_v32  ;;  %v2404_v27 = vmul.f32 %v2403_v58, %v4391_v36 }
 0x1ea   :  { %v2388_v41 = vadd.f32 %v2384_v33, %v2376_v7  ;;  %v2389_v4 = vadd.f32 %v2385_v30, %v2377_v23  ;;  %v2405_v48 = vmul.f32 %v2403_v58, %v4394_v32  ;;  %v2415_v18 = vstv %s5346_s12  ;;  %s5510_s12 = sld [smem:[#allocation6 + $0x4d]] }
 0x1eb   :  { %v2396_v37 = vrot.slane %v2392_v21, 2  ;;  %v2397_v26 = vrot.slane %v2393_v54, 2  ;;  %v2421_v34 = vstv %s5352_s13  ;;  %v2408_v63 = vrot.slane %v2404_v27, 3  ;;  %s5512_s13 = sld [smem:[#allocation6 + $0x56]] }
 0x1ec   :  { %v2409_v60 = vrot.slane %v2405_v48, 3  ;;  %v2416_v20 = vmul.f32 %v2415_v18, %v4391_v36  ;;  %v2417_v57 = vmul.f32 %v2415_v18, %v4394_v32  ;;  %v2422_v19 = vmul.f32 %v2421_v34, %v4391_v36 }
 0x1ed   :  { %v2400_v56 = vadd.f32 %v2396_v37, %v2388_v41  ;;  %v2401_v5 = vadd.f32 %v2397_v26, %v2389_v4  ;;  %v2423_v14 = vmul.f32 %v2421_v34, %v4394_v32  ;;  %v2433_v0 = vstv %s5356_s14  ;;  %s5522_s14 = sld [smem:[#allocation6 + $0x5f]] }
 0x1ee   :  { %v2418_v10 = vadd.f32 %v2416_v20, %v5318_v53  ;;  %v2419_v6 = vadd.f32 %v2417_v57, %v5320_v25  ;;  %v2445_v31 = vstv %s5362_s15  ;;  %v2426_v29 = vrot.slane %v2422_v19, 1  ;;  %s5526_s15 = sld [smem:[#allocation6 + $0x68]] }
 0x1ef   :  { %v5398_v46 = vadd.f32 %v2408_v63, %v2400_v56  ;;  %v5400_v28 = vadd.f32 %v2409_v60, %v2401_v5  ;;  %v2427_v24 = vrot.slane %v2423_v14, 1  ;;  %v2434_v9 = vmul.f32 %v2433_v0, %v4391_v36 }
 0x1f0   :  { %v2435_v53 = vmul.f32 %v2433_v0, %v4394_v32  ;;  %v2446_v25 = vmul.f32 %v2445_v31, %v4391_v36  ;;  %v2447_v15 = vmul.f32 %v2445_v31, %v4394_v32  ;;  %v2430_v40 = vadd.f32 %v2426_v29, %v2418_v10 }
 0x1f1   :  { %v2431_v61 = vadd.f32 %v2427_v24, %v2419_v6  ;;  %v2457_v47 = vstv %s5368_s16  ;;  %v2467_v52 = vstv %s5376_s17  ;;  %v2438_v35 = vrot.slane %v2434_v9, 2  ;;  %s5538_s16 = sld [smem:[#allocation6 + $0x71]] }
 0x1f2   :  { %v2439_v43 = vrot.slane %v2435_v53, 2  ;;  %v2450_v2 = vrot.slane %v2446_v25, 3  ;;  %v2451_v22 = vrot.slane %v2447_v15, 3  ;;  %v2458_v1 = vmul.f32 %v2457_v47, %v6012_v45  ;;  %s5544_s17 = sld [smem:[#allocation6 + $0x7a]] }
 0x1f3   :  { %v2468_v36 = vmul.f32 %v2467_v52, %v6012_v45  ;;  %v2477_v50 = vstv %s5380_s18  ;;  %v2487_v32 = vstv %s5384_s19  ;;  %v2442_v38 = vadd.f32 %v2438_v35, %v2430_v40  ;;  %s5548_s18 = sld [smem:[#allocation6 + $0x83]] }
 0x1f4   :  { %v2443_v62 = vadd.f32 %v2439_v43, %v2431_v61  ;;  %v2478_v51 = vmul.f32 %v2477_v50, %v6012_v45  ;;  %v2488_v58 = vmul.f32 %v2487_v32, %v6012_v45  ;;  %v2460_v7 = vperm.slane %v2458_v1, 0  ;;  %s5554_s19 = sld [smem:[#allocation6 + $0x8c]] }
 0x1f5   :  { %v2461_v23 = vperm.slane %v2458_v1, 4  ;;  %v2470_v33 = vperm.slane %v2468_v36, 1  ;;  %v2471_v30 = vperm.slane %v2468_v36, 5  ;;  %v5422_v21 = vadd.f32 %v2450_v2, %v2442_v38 }
 0x1f6   :  { %v5424_v54 = vadd.f32 %v2451_v22, %v2443_v62  ;;  %v2480_v41 = vperm.slane %v2478_v51, 2  ;;  %v2481_v4 = vperm.slane %v2478_v51, 6  ;;  %v2464_v27 = vadd.f32 %v2460_v7, %v5342_v16 }
 0x1f7   :  { %v2465_v48 = vadd.f32 %v2461_v23, %v5344_v11  ;;  %v2490_v37 = vperm.slane %v2488_v58, 3  ;;  %v2491_v26 = vperm.slane %v2488_v58, 7  ;;  %v2497_v18 = vstv %s5390_s22  ;;  %s5560_s22 = sld [smem:[#allocation6 + $0x6]] }
 0x1f8   :  { %v2507_v34 = vstv %s5396_s23  ;;  %v2517_v63 = vstv %s5402_s24  ;;  %v2527_v60 = vstv %s5408_s0  ;;  %v2474_v20 = vadd.f32 %v2470_v33, %v2464_v27  ;;  %s5568_s23 = sld [smem:[#allocation6 + $0xf]] }
 0x1f9   :  { %v2475_v57 = vadd.f32 %v2471_v30, %v2465_v48  ;;  %v2498_v56 = vmul.f32 %v2497_v18, %v6012_v45  ;;  %v2508_v5 = vmul.f32 %v2507_v34, %v6012_v45  ;;  %v2518_v16 = vmul.f32 %v2517_v63, %v6012_v45  ;;  %s5574_s24 = sld [smem:[#allocation6 + $0x18]] }
 0x1fa   :  { %v2528_v11 = vmul.f32 %v2527_v60, %v6012_v45  ;;  %v2537_v19 = vstv %s5412_s25  ;;  %v2547_v14 = vstv %s5414_s26  ;;  %v2484_v10 = vadd.f32 %v2480_v41, %v2474_v20  ;;  %s5578_s0 = sld [smem:[#allocation6 + $0x21]] }
 0x1fb   :  { %v2485_v6 = vadd.f32 %v2481_v4, %v2475_v57  ;;  %v2500_v0 = vperm.slane %v2498_v56, 0  ;;  %v2501_v31 = vperm.slane %v2498_v56, 4  ;;  %v2510_v29 = vperm.slane %v2508_v5, 1  ;;  %s5590_s25 = sld [smem:[#allocation6 + $0x2a]] }
 0x1fc   :  { %v2511_v24 = vperm.slane %v2508_v5, 5  ;;  %v2520_v9 = vperm.slane %v2518_v16, 2  ;;  %v2521_v53 = vperm.slane %v2518_v16, 6  ;;  %v5448_v25 = vadd.f32 %v2490_v37, %v2484_v10  ;;  %s5596_s26 = sld [smem:[#allocation6 + $0x33]] }
 0x1fd   :  { %v5450_v15 = vadd.f32 %v2491_v26, %v2485_v6  ;;  %v2504_v40 = vadd.f32 %v2500_v0, %v5370_v59  ;;  %v2505_v61 = vadd.f32 %v2501_v31, %v5372_v39  ;;  %v2530_v47 = vperm.slane %v2528_v11, 3 }
 0x1fe   :  { %v2531_v52 = vperm.slane %v2528_v11, 7  ;;  %v2538_v35 = vmul.f32 %v2537_v19, %v6012_v45  ;;  %v2548_v43 = vmul.f32 %v2547_v14, %v6012_v45  ;;  %v2557_v1 = vstv %s5426_s27  ;;  %s5600_s27 = sld [smem:[#allocation6 + $0x3c]] }
 0x1ff   :  { %v2514_v2 = vadd.f32 %v2510_v29, %v2504_v40  ;;  %v2515_v22 = vadd.f32 %v2511_v24, %v2505_v61  ;;  %v2567_v36 = vstv %s5430_s28  ;;  %v2558_v51 = vmul.f32 %v2557_v1, %v6012_v45  ;;  %s5606_s28 = sld [smem:[#allocation6 + $0x45]] }
 0x200   :  { %v2540_v50 = vperm.slane %v2538_v35, 0  ;;  %v2541_v59 = vperm.slane %v2538_v35, 4  ;;  %v2550_v32 = vperm.slane %v2548_v43, 1  ;;  %v2551_v39 = vperm.slane %v2548_v43, 5 }
 0x201   :  { %v2524_v38 = vadd.f32 %v2520_v9, %v2514_v2  ;;  %v2525_v62 = vadd.f32 %v2521_v53, %v2515_v22  ;;  %v2568_v58 = vmul.f32 %v2567_v36, %v6012_v45  ;;  %v2577_v33 = vstv %s5438_s1  ;;  %s5612_s1 = sld [smem:[#allocation6 + $0x4e]] }
 0x202   :  { %v2544_v7 = vadd.f32 %v2540_v50, %v5398_v46  ;;  %v2545_v23 = vadd.f32 %v2541_v59, %v5400_v28  ;;  %v2587_v30 = vstv %s5444_s2  ;;  %v2560_v27 = vperm.slane %v2558_v51, 2  ;;  %s5620_s2 = sld [smem:[#allocation6 + $0x57]] }
 0x203   :  { %v5474_v41 = vadd.f32 %v2530_v47, %v2524_v38  ;;  %v5476_v4 = vadd.f32 %v2531_v52, %v2525_v62  ;;  %v2561_v48 = vperm.slane %v2558_v51, 6  ;;  %v2570_v18 = vperm.slane %v2568_v58, 3 }
 0x204   :  { %v2554_v37 = vadd.f32 %v2550_v32, %v2544_v7  ;;  %v2555_v26 = vadd.f32 %v2551_v39, %v2545_v23  ;;  %v2571_v34 = vperm.slane %v2568_v58, 7  ;;  %v2578_v63 = vmul.f32 %v2577_v33, %v6012_v45 }
 0x205   :  { %v2588_v46 = vmul.f32 %v2587_v30, %v6012_v45  ;;  %v2597_v60 = vstv %s5446_s29  ;;  %v2607_v28 = vstv %s5454_s30  ;;  %v2630_v53 = vstv %s5460_s4  ;;  %s5626_s29 = sld [smem:[#allocation6 + $0x60]] }
 0x206   :  { %v2564_v20 = vadd.f32 %v2560_v27, %v2554_v37  ;;  %v2565_v57 = vadd.f32 %v2561_v48, %v2555_v26  ;;  %v2598_v56 = vmul.f32 %v2597_v60, %v6012_v45  ;;  %v2608_v5 = vmul.f32 %v2607_v28, %v6012_v45  ;;  %s5630_s30 = sld [smem:[#allocation6 + $0x69]] }
 0x207   :  { %v2580_v16 = vperm.slane %v2578_v63, 0  ;;  %v2581_v11 = vperm.slane %v2578_v63, 4  ;;  %v2590_v19 = vperm.slane %v2588_v46, 1  ;;  %v2591_v14 = vperm.slane %v2588_v46, 5  ;;  %s5642_s4 = sld [smem:[#allocation6 + $0x72]] }
 0x208   :  { %v5486_v10 = vadd.f32 %v2570_v18, %v2564_v20  ;;  %v5488_v6 = vadd.f32 %v2571_v34, %v2565_v57  ;;  %v2600_v0 = vperm.slane %v2598_v56, 2  ;;  %v2601_v31 = vperm.slane %v2598_v56, 6 }
 0x209   :  { %v2584_v29 = vadd.f32 %v2580_v16, %v5422_v21  ;;  %v2585_v45 = vadd.f32 %v2581_v11, %v5424_v54  ;;  %v2610_v24 = vperm.slane %v2608_v5, 3  ;;  %v2611_v9 = vperm.slane %v2608_v5, 7 }
 0x20a   :  { %v2636_v40 = vstv %s5462_s5  ;;  %v2648_v61 = vstv %s5466_s6  ;;  %v2660_v47 = vstv %s5472_s7  ;;  %v2631_v43 = vmul.f32 %v2630_v53, %v4465_v44  ;;  %s5648_s5 = sld [smem:[#allocation6 + $0x7b]] }
 0x20b   :  { %v2594_v52 = vadd.f32 %v2590_v19, %v2584_v29  ;;  %v2595_v35 = vadd.f32 %v2591_v14, %v2585_v45  ;;  %v2632_v2 = vmul.f32 %v2630_v53, %v4434_v55  ;;  %v2637_v21 = vmul.f32 %v2636_v40, %v4465_v44  ;;  %s5652_s6 = sld [smem:[#allocation6 + $0x84]] }
 0x20c   :  { %v2638_v54 = vmul.f32 %v2636_v40, %v4434_v55  ;;  %v2649_v22 = vmul.f32 %v2648_v61, %v4465_v44  ;;  %v2650_v1 = vmul.f32 %v2648_v61, %v4434_v55  ;;  %v2633_v59 = vadd.f32 %v2631_v43, %v5448_v25  ;;  %s5658_s7 = sld [smem:[#allocation6 + $0x8d]] }
 0x20d   :  { %v2604_v36 = vadd.f32 %v2600_v0, %v2594_v52  ;;  %v2605_v50 = vadd.f32 %v2601_v31, %v2595_v35  ;;  %v2634_v32 = vadd.f32 %v2632_v2, %v5450_v15  ;;  %v2641_v39 = vrot.slane %v2637_v21, 1 }
 0x20e   :  { %v2642_v38 = vrot.slane %v2638_v54, 1  ;;  %v2653_v62 = vrot.slane %v2649_v22, 2  ;;  %v2654_v51 = vrot.slane %v2650_v1, 2  ;;  %v2661_v23 = vmul.f32 %v2660_v47, %v4465_v44 }
 0x20f   :  { %v5514_v58 = vadd.f32 %v2610_v24, %v2604_v36  ;;  %v5516_v7 = vadd.f32 %v2611_v9, %v2605_v50  ;;  %v2662_v33 = vmul.f32 %v2660_v47, %v4434_v55  ;;  %v2645_v30 = vadd.f32 %v2641_v39, %v2633_v59 }
 0x210   :  { %v2646_v25 = vadd.f32 %v2642_v38, %v2634_v32  ;;  %v2672_v15 = vstv %s5484_s8  ;;  %v2678_v27 = vstv %s5490_s9  ;;  %v2665_v48 = vrot.slane %v2661_v23, 3  ;;  %s5664_s8 = sld [smem:[#allocation6 + $0x7]] }
 0x211   :  { %v2666_v37 = vrot.slane %v2662_v33, 3  ;;  %v2673_v26 = vmul.f32 %v2672_v15, %v4465_v44  ;;  %v2674_v18 = vmul.f32 %v2672_v15, %v4434_v55  ;;  %v2657_v34 = vadd.f32 %v2653_v62, %v2645_v30  ;;  %s5672_s9 = sld [smem:[#allocation6 + $0x10]] }
 0x212   :  { %v2658_v63 = vadd.f32 %v2654_v51, %v2646_v25  ;;  %v2679_v46 = vmul.f32 %v2678_v27, %v4465_v44  ;;  %v2680_v60 = vmul.f32 %v2678_v27, %v4434_v55  ;;  %v2690_v57 = vstv %s5498_s10  ;;  %s5678_s10 = sld [smem:[#allocation6 + $0x19]] }
 0x213   :  { %v2675_v28 = vadd.f32 %v2673_v26, %v5474_v41  ;;  %v2676_v20 = vadd.f32 %v2674_v18, %v5476_v4  ;;  %v2702_v56 = vstv %s5502_s11  ;;  %v5534_v5 = vadd.f32 %v2665_v48, %v2657_v34  ;;  %s5682_s11 = sld [smem:[#allocation6 + $0x22]] }
 0x214   :  { %v5536_v16 = vadd.f32 %v2666_v37, %v2658_v63  ;;  %v2683_v11 = vrot.slane %v2679_v46, 1  ;;  %v2684_v19 = vrot.slane %v2680_v60, 1  ;;  %v2691_v14 = vmul.f32 %v2690_v57, %v4465_v44 }
 0x215   :  { %v2692_v0 = vmul.f32 %v2690_v57, %v4434_v55  ;;  %v2703_v41 = vmul.f32 %v2702_v56, %v4465_v44  ;;  %v2704_v31 = vmul.f32 %v2702_v56, %v4434_v55  ;;  %v2714_v45 = vstv %s5510_s12  ;;  %s5694_s12 = sld [smem:[#allocation6 + $0x2b]] }
 0x216   :  { %v2687_v4 = vadd.f32 %v2683_v11, %v2675_v28  ;;  %v2688_v29 = vadd.f32 %v2684_v19, %v2676_v20  ;;  %v2720_v24 = vstv %s5512_s13  ;;  %v2695_v9 = vrot.slane %v2691_v14, 2  ;;  %s5700_s13 = sld [smem:[#allocation6 + $0x34]] }
 0x217   :  { %v2696_v53 = vrot.slane %v2692_v0, 2  ;;  %v2707_v40 = vrot.slane %v2703_v41, 3  ;;  %v2708_v61 = vrot.slane %v2704_v31, 3  ;;  %v2715_v47 = vmul.f32 %v2714_v45, %v4465_v44 }
 0x218   :  { %v2716_v52 = vmul.f32 %v2714_v45, %v4434_v55  ;;  %v2721_v35 = vmul.f32 %v2720_v24, %v4465_v44  ;;  %v2722_v43 = vmul.f32 %v2720_v24, %v4434_v55  ;;  %v2699_v2 = vadd.f32 %v2695_v9, %v2687_v4 }
 0x219   :  { %v2700_v21 = vadd.f32 %v2696_v53, %v2688_v29  ;;  %v2732_v54 = vstv %s5522_s14  ;;  %v2744_v22 = vstv %s5526_s15  ;;  %v2717_v1 = vadd.f32 %v2715_v47, %v5486_v10  ;;  %s5704_s14 = sld [smem:[#allocation6 + $0x3d]] }
 0x21a   :  { %v2718_v36 = vadd.f32 %v2716_v52, %v5488_v6  ;;  %v2725_v50 = vrot.slane %v2721_v35, 1  ;;  %v2726_v59 = vrot.slane %v2722_v43, 1  ;;  %v5562_v32 = vadd.f32 %v2707_v40, %v2699_v2  ;;  %s5710_s15 = sld [smem:[#allocation6 + $0x46]] }
 0x21b   :  { %v5564_v39 = vadd.f32 %v2708_v61, %v2700_v21  ;;  %v2733_v38 = vmul.f32 %v2732_v54, %v4465_v44  ;;  %v2734_v62 = vmul.f32 %v2732_v54, %v4434_v55  ;;  %v2745_v23 = vmul.f32 %v2744_v22, %v4465_v44 }
 0x21c   :  { %v2729_v51 = vadd.f32 %v2725_v50, %v2717_v1  ;;  %v2730_v10 = vadd.f32 %v2726_v59, %v2718_v36  ;;  %v2746_v6 = vmul.f32 %v2744_v22, %v4434_v55  ;;  %v2756_v25 = vstv %s5538_s16  ;;  %s5716_s16 = sld [smem:[#allocation6 + $0x4f]] }
 0x21d   :  { %v2737_v33 = vrot.slane %v2733_v38, 2  ;;  %v2738_v30 = vrot.slane %v2734_v62, 2  ;;  %v2762_v15 = vstv %s5544_s17  ;;  %v2749_v27 = vrot.slane %v2745_v23, 3  ;;  %s5724_s17 = sld [smem:[#allocation6 + $0x58]] }
 0x21e   :  { %v2750_v48 = vrot.slane %v2746_v6, 3  ;;  %v2757_v37 = vmul.f32 %v2756_v25, %v4465_v44  ;;  %v2758_v26 = vmul.f32 %v2756_v25, %v4434_v55  ;;  %v2763_v63 = vmul.f32 %v2762_v15, %v4465_v44 }
 0x21f   :  { %v2741_v18 = vadd.f32 %v2737_v33, %v2729_v51  ;;  %v2742_v34 = vadd.f32 %v2738_v30, %v2730_v10  ;;  %v2764_v46 = vmul.f32 %v2762_v15, %v4434_v55  ;;  %v2774_v20 = vstv %s5548_s18  ;;  %s5730_s18 = sld [smem:[#allocation6 + $0x61]] }
 0x220   :  { %v2759_v60 = vadd.f32 %v2757_v37, %v5514_v58  ;;  %v2760_v28 = vadd.f32 %v2758_v26, %v5516_v7  ;;  %v2786_v57 = vstv %s5554_s19  ;;  %v2767_v19 = vrot.slane %v2763_v63, 1  ;;  %s5734_s19 = sld [smem:[#allocation6 + $0x6a]] }
 0x221   :  { %v5586_v56 = vadd.f32 %v2749_v27, %v2741_v18  ;;  %v5588_v11 = vadd.f32 %v2750_v48, %v2742_v34  ;;  %v2768_v14 = vrot.slane %v2764_v46, 1  ;;  %v2775_v0 = vmul.f32 %v2774_v20, %v4465_v44 }
 0x222   :  { %v2776_v41 = vmul.f32 %v2774_v20, %v4434_v55  ;;  %v2787_v58 = vmul.f32 %v2786_v57, %v4465_v44  ;;  %v2788_v31 = vmul.f32 %v2786_v57, %v4434_v55  ;;  %v2771_v7 = vadd.f32 %v2767_v19, %v2759_v60 }
 0x223   :  { %v2772_v4 = vadd.f32 %v2768_v14, %v2760_v28  ;;  %v2811_v29 = vstv %s5560_s22  ;;  %v2817_v45 = vstv %s5568_s23  ;;  %v2779_v24 = vrot.slane %v2775_v0, 2  ;;  %s5746_s22 = sld [smem:[#allocation6 + $0x73]] }
 0x224   :  { %v2780_v9 = vrot.slane %v2776_v41, 2  ;;  %v2791_v53 = vrot.slane %v2787_v58, 3  ;;  %v2792_v40 = vrot.slane %v2788_v31, 3  ;;  %v2812_v61 = vmul.f32 %v2811_v29, %v4447_v8  ;;  %s5752_s23 = sld [smem:[#allocation6 + $0x7c]] }
 0x225   :  { %v2813_v44 = vmul.f32 %v2811_v29, %v4425_v13  ;;  %v2818_v55 = vmul.f32 %v2817_v45, %v4447_v8  ;;  %v2819_v47 = vmul.f32 %v2817_v45, %v4425_v13  ;;  %v2783_v52 = vadd.f32 %v2779_v24, %v2771_v7 }
 0x226   :  { %v2784_v35 = vadd.f32 %v2780_v9, %v2772_v4  ;;  %v2829_v43 = vstv %s5574_s24  ;;  %v2841_v2 = vstv %s5578_s0  ;;  %v2814_v21 = vadd.f32 %v2812_v61, %v5534_v5  ;;  %s5756_s24 = sld [smem:[#allocation6 + $0x85]] }
 0x227   :  { %v2815_v54 = vadd.f32 %v2813_v44, %v5536_v16  ;;  %v2822_v22 = vrot.slane %v2818_v55, 1  ;;  %v2823_v1 = vrot.slane %v2819_v47, 1  ;;  %v5614_v36 = vadd.f32 %v2791_v53, %v2783_v52  ;;  %s5762_s0 = sld [smem:[#allocation6 + $0x8e]] }
 0x228   :  { %v5616_v50 = vadd.f32 %v2792_v40, %v2784_v35  ;;  %v2830_v59 = vmul.f32 %v2829_v43, %v4447_v8  ;;  %v2831_v38 = vmul.f32 %v2829_v43, %v4425_v13  ;;  %v2842_v51 = vmul.f32 %v2841_v2, %v4447_v8 }
 0x229   :  { %v2826_v62 = vadd.f32 %v2822_v22, %v2814_v21  ;;  %v2827_v5 = vadd.f32 %v2823_v1, %v2815_v54  ;;  %v2843_v16 = vmul.f32 %v2841_v2, %v4425_v13  ;;  %v2853_v6 = vstv %s5590_s25  ;;  %s5768_s25 = sld [smem:[#allocation6 + $0x8]] }
 0x22a   :  { %v2834_v10 = vrot.slane %v2830_v59, 2  ;;  %v2835_v23 = vrot.slane %v2831_v38, 2  ;;  %v2859_v33 = vstv %s5596_s26  ;;  %v2846_v30 = vrot.slane %v2842_v51, 3  ;;  %s5776_s26 = sld [smem:[#allocation6 + $0x11]] }
 0x22b   :  { %v2847_v25 = vrot.slane %v2843_v16, 3  ;;  %v2854_v15 = vmul.f32 %v2853_v6, %v4447_v8  ;;  %v2855_v27 = vmul.f32 %v2853_v6, %v4425_v13  ;;  %v2860_v26 = vmul.f32 %v2859_v33, %v4447_v8 }
 0x22c   :  { %v2838_v48 = vadd.f32 %v2834_v10, %v2826_v62  ;;  %v2839_v37 = vadd.f32 %v2835_v23, %v2827_v5  ;;  %v2861_v18 = vmul.f32 %v2859_v33, %v4425_v13  ;;  %v2871_v46 = vstv %s5600_s27  ;;  %s5782_s27 = sld [smem:[#allocation6 + $0x1a]] }
 0x22d   :  { %v2856_v34 = vadd.f32 %v2854_v15, %v5562_v32  ;;  %v2857_v63 = vadd.f32 %v2855_v27, %v5564_v39  ;;  %v2883_v60 = vstv %s5606_s28  ;;  %v2864_v57 = vrot.slane %v2860_v26, 1  ;;  %s5786_s28 = sld [smem:[#allocation6 + $0x23]] }
 0x22e   :  { %v5638_v28 = vadd.f32 %v2846_v30, %v2838_v48  ;;  %v5640_v20 = vadd.f32 %v2847_v25, %v2839_v37  ;;  %v2865_v19 = vrot.slane %v2861_v18, 1  ;;  %v2872_v14 = vmul.f32 %v2871_v46, %v4447_v8 }
 0x22f   :  { %v2873_v0 = vmul.f32 %v2871_v46, %v4425_v13  ;;  %v2884_v32 = vmul.f32 %v2883_v60, %v4447_v8  ;;  %v2885_v41 = vmul.f32 %v2883_v60, %v4425_v13  ;;  %v2868_v39 = vadd.f32 %v2864_v57, %v2856_v34 }
 0x230   :  { %v2869_v58 = vadd.f32 %v2865_v19, %v2857_v63  ;;  %v2895_v31 = vstv %s5612_s1  ;;  %v2901_v7 = vstv %s5620_s2  ;;  %v2876_v4 = vrot.slane %v2872_v14, 2  ;;  %s5798_s1 = sld [smem:[#allocation6 + $0x2c]] }
 0x231   :  { %v2877_v29 = vrot.slane %v2873_v0, 2  ;;  %v2888_v45 = vrot.slane %v2884_v32, 3  ;;  %v2889_v24 = vrot.slane %v2885_v41, 3  ;;  %v2896_v9 = vmul.f32 %v2895_v31, %v4447_v8  ;;  %s5804_s2 = sld [smem:[#allocation6 + $0x35]] }
 0x232   :  { %v2897_v53 = vmul.f32 %v2895_v31, %v4425_v13  ;;  %v2902_v40 = vmul.f32 %v2901_v7, %v4447_v8  ;;  %v2903_v61 = vmul.f32 %v2901_v7, %v4425_v13  ;;  %v2880_v44 = vadd.f32 %v2876_v4, %v2868_v39 }
 0x233   :  { %v2881_v55 = vadd.f32 %v2877_v29, %v2869_v58  ;;  %v2913_v47 = vstv %s5626_s29  ;;  %v2925_v52 = vstv %s5630_s30  ;;  %v2898_v35 = vadd.f32 %v2896_v9, %v5586_v56  ;;  %s5808_s29 = sld [smem:[#allocation6 + $0x3e]] }
 0x234   :  { %v2899_v43 = vadd.f32 %v2897_v53, %v5588_v11  ;;  %v2906_v2 = vrot.slane %v2902_v40, 1  ;;  %v2907_v21 = vrot.slane %v2903_v61, 1  ;;  %v5666_v54 = vadd.f32 %v2888_v45, %v2880_v44  ;;  %s5814_s30 = sld [smem:[#allocation6 + $0x47]] }
 0x235   :  { %v5668_v22 = vadd.f32 %v2889_v24, %v2881_v55  ;;  %v2914_v1 = vmul.f32 %v2913_v47, %v4447_v8  ;;  %v2915_v59 = vmul.f32 %v2913_v47, %v4425_v13  ;;  %v2926_v62 = vmul.f32 %v2925_v52, %v4447_v8 }
 0x236   :  { %v2910_v38 = vadd.f32 %v2906_v2, %v2898_v35  ;;  %v2911_v56 = vadd.f32 %v2907_v21, %v2899_v43  ;;  %v2927_v11 = vmul.f32 %v2925_v52, %v4425_v13  ;;  %v2937_v16 = vstv %s5642_s4  ;;  %s5820_s4 = sld [smem:[#allocation6 + $0x50]] }
 0x237   :  { %v2918_v5 = vrot.slane %v2914_v1, 2  ;;  %v2919_v51 = vrot.slane %v2915_v59, 2  ;;  %v2943_v10 = vstv %s5648_s5  ;;  %v2930_v23 = vrot.slane %v2926_v62, 3  ;;  %s5828_s5 = sld [smem:[#allocation6 + $0x59]] }
 0x238   :  { %v2931_v6 = vrot.slane %v2927_v11, 3  ;;  %v2938_v33 = vmul.f32 %v2937_v16, %v4447_v8  ;;  %v2939_v30 = vmul.f32 %v2937_v16, %v4425_v13  ;;  %v2944_v27 = vmul.f32 %v2943_v10, %v4447_v8 }
 0x239   :  { %v2922_v25 = vadd.f32 %v2918_v5, %v2910_v38  ;;  %v2923_v15 = vadd.f32 %v2919_v51, %v2911_v56  ;;  %v2945_v48 = vmul.f32 %v2943_v10, %v4425_v13  ;;  %v2955_v18 = vstv %s5652_s6  ;;  %s5834_s6 = sld [smem:[#allocation6 + $0x62]] }
 0x23a   :  { %v2940_v37 = vadd.f32 %v2938_v33, %v5614_v36  ;;  %v2941_v26 = vadd.f32 %v2939_v30, %v5616_v50  ;;  %v2967_v34 = vstv %s5658_s7  ;;  %v2948_v60 = vrot.slane %v2944_v27, 1  ;;  %s5838_s7 = sld [smem:[#allocation6 + $0x6b]] }
 0x23b   :  { %v5690_v63 = vadd.f32 %v2930_v23, %v2922_v25  ;;  %v5692_v46 = vadd.f32 %v2931_v6, %v2923_v15  ;;  %v2949_v57 = vrot.slane %v2945_v48, 1  ;;  %v2956_v19 = vmul.f32 %v2955_v18, %v4447_v8 }
 0x23c   :  { %v2957_v14 = vmul.f32 %v2955_v18, %v4425_v13  ;;  %v2968_v36 = vmul.f32 %v2967_v34, %v4447_v8  ;;  %v2969_v0 = vmul.f32 %v2967_v34, %v4425_v13  ;;  %v2952_v50 = vadd.f32 %v2948_v60, %v2940_v37 }
 0x23d   :  { %v2953_v32 = vadd.f32 %v2949_v57, %v2941_v26  ;;  %v2990_v41 = vstv %s5664_s8  ;;  %v2996_v39 = vstv %s5672_s9  ;;  %v2960_v58 = vrot.slane %v2956_v19, 2  ;;  %s5850_s8 = sld [smem:[#allocation6 + $0x74]] }
 0x23e   :  { %v2961_v31 = vrot.slane %v2957_v14, 2  ;;  %v2972_v7 = vrot.slane %v2968_v36, 3  ;;  %v2973_v4 = vrot.slane %v2969_v0, 3  ;;  %v2991_v29 = vmul.f32 %v2990_v41, %v4537_v12  ;;  %s5856_s9 = sld [smem:[#allocation6 + $0x7d]] }
 0x23f   :  { %v2992_v8 = vmul.f32 %v2990_v41, %v4540_v17  ;;  %v2997_v13 = vmul.f32 %v2996_v39, %v4537_v12  ;;  %v2998_v45 = vmul.f32 %v2996_v39, %v4540_v17  ;;  %v2964_v24 = vadd.f32 %v2960_v58, %v2952_v50 }
 0x240   :  { %v2965_v9 = vadd.f32 %v2961_v31, %v2953_v32  ;;  %v3008_v53 = vstv %s5678_s10  ;;  %v3020_v40 = vstv %s5682_s11  ;;  %v2993_v61 = vadd.f32 %v2991_v29, %v5638_v28  ;;  %s5860_s10 = sld [smem:[#allocation6 + $0x86]] }
 0x241   :  { %v2994_v44 = vadd.f32 %v2992_v8, %v5640_v20  ;;  %v3001_v55 = vrot.slane %v2997_v13, 1  ;;  %v3002_v47 = vrot.slane %v2998_v45, 1  ;;  %v5718_v52 = vadd.f32 %v2972_v7, %v2964_v24  ;;  %s5866_s11 = sld [smem:[#allocation6 + $0x8f]] }
 0x242   :  { %v5720_v35 = vadd.f32 %v2973_v4, %v2965_v9  ;;  %v3009_v43 = vmul.f32 %v3008_v53, %v4537_v12  ;;  %v3010_v2 = vmul.f32 %v3008_v53, %v4540_v17  ;;  %v3021_v1 = vmul.f32 %v3020_v40, %v4537_v12 }
 0x243   :  { %v3005_v21 = vadd.f32 %v3001_v55, %v2993_v61  ;;  %v3006_v28 = vadd.f32 %v3002_v47, %v2994_v44  ;;  %v3022_v20 = vmul.f32 %v3020_v40, %v4540_v17  ;;  %v3032_v56 = vstv %s5694_s12  ;;  %s3799_s12 = smov [#allocation9]  }
 0x244   :  { %v3013_v59 = vrot.slane %v3009_v43, 2  ;;  %v3014_v38 = vrot.slane %v3010_v2, 2  ;;  %v3038_v62 = vstv %s5700_s13  ;;  %v3025_v11 = vrot.slane %v3021_v1, 3  ;;  %s3370_s13 = sshll.u32 %s3799_s12, 4  ;;  %s3371_s13 = int_to_ptr.vmem [resolvable:$true] %s3370_s13 }
 0x245   :  { %v3026_v5 = vrot.slane %v3022_v20, 3  ;;  %v3033_v51 = vmul.f32 %v3032_v56, %v4537_v12  ;;  %v3034_v16 = vmul.f32 %v3032_v56, %v4540_v17  ;;  %v3039_v6 = vmul.f32 %v3038_v62, %v4537_v12 }
 0x246   :  { %v3017_v10 = vadd.f32 %v3013_v59, %v3005_v21  ;;  %v3018_v23 = vadd.f32 %v3014_v38, %v3006_v28  ;;  %v3040_v33 = vmul.f32 %v3038_v62, %v4540_v17  ;;  %v3050_v15 = vstv %s5704_s14 }
 0x247   :  { %v3035_v30 = vadd.f32 %v3033_v51, %v5666_v54  ;;  %v3036_v25 = vadd.f32 %v3034_v16, %v5668_v22  ;;  %v3062_v27 = vstv %s5710_s15  ;;  %v3043_v26 = vrot.slane %v3039_v6, 1 }
 0x248   :  { %v5742_v48 = vadd.f32 %v3025_v11, %v3017_v10  ;;  %v5744_v37 = vadd.f32 %v3026_v5, %v3018_v23  ;;  %v3044_v18 = vrot.slane %v3040_v33, 1  ;;  %v3051_v34 = vmul.f32 %v3050_v15, %v4537_v12 }
 0x249   :  { %v3052_v60 = vmul.f32 %v3050_v15, %v4540_v17  ;;  %v3063_v54 = vmul.f32 %v3062_v27, %v4537_v12  ;;  %v3064_v57 = vmul.f32 %v3062_v27, %v4540_v17  ;;  %v3047_v22 = vadd.f32 %v3043_v26, %v3035_v30 }
 0x24a   :  { %v3048_v19 = vadd.f32 %v3044_v18, %v3036_v25  ;;  %v3074_v14 = vstv %s5716_s16  ;;  %v3080_v36 = vstv %s5724_s17  ;;  %v3055_v0 = vrot.slane %v3051_v34, 2  ;;  %s3372_s16 = sshll.u32 %s5913_s3, 4  ;;  %s3373_s16 = int_to_ptr.hbm [resolvable:$true] %s3372_s16 }
 0x24b   :  { %v3056_v50 = vrot.slane %v3052_v60, 2  ;;  %v3067_v32 = vrot.slane %v3063_v54, 3  ;;  %v3068_v41 = vrot.slane %v3064_v57, 3  ;;  %v3075_v39 = vmul.f32 %v3074_v14, %v4537_v12 }
 0x24c   :  { %v3076_v58 = vmul.f32 %v3074_v14, %v4540_v17  ;;  %v3081_v31 = vmul.f32 %v3080_v36, %v4537_v12  ;;  %v3082_v7 = vmul.f32 %v3080_v36, %v4540_v17  ;;  %v3059_v4 = vadd.f32 %v3055_v0, %v3047_v22 }
 0x24d   :  { %v3060_v29 = vadd.f32 %v3056_v50, %v3048_v19  ;;  %v3092_v8 = vstv %s5730_s18  ;;  %v3104_v13 = vstv %s5734_s19  ;;  %v3077_v45 = vadd.f32 %v3075_v39, %v5690_v63 }
 0x24e   :  { %v3078_v24 = vadd.f32 %v3076_v58, %v5692_v46  ;;  %v3085_v9 = vrot.slane %v3081_v31, 1  ;;  %v3086_v53 = vrot.slane %v3082_v7, 1  ;;  %v5770_v40 = vadd.f32 %v3067_v32, %v3059_v4 }
 0x24f   :  { %v5772_v61 = vadd.f32 %v3068_v41, %v3060_v29  ;;  %v3093_v44 = vmul.f32 %v3092_v8, %v4537_v12  ;;  %v3094_v55 = vmul.f32 %v3092_v8, %v4540_v17  ;;  %v3105_v43 = vmul.f32 %v3104_v13, %v4537_v12 }
 0x250   :  { %v3089_v47 = vadd.f32 %v3085_v9, %v3077_v45  ;;  %v3090_v63 = vadd.f32 %v3086_v53, %v3078_v24  ;;  %v3106_v46 = vmul.f32 %v3104_v13, %v4540_v17  ;;  %v3116_v28 = vstv %s5746_s22 }
 0x251   :  { %v3097_v2 = vrot.slane %v3093_v44, 2  ;;  %v3098_v21 = vrot.slane %v3094_v55, 2  ;;  %v3122_v1 = vstv %s5752_s23  ;;  %v3109_v20 = vrot.slane %v3105_v43, 3 }
 0x252   :  { %v3110_v59 = vrot.slane %v3106_v46, 3  ;;  %v3117_v38 = vmul.f32 %v3116_v28, %v4537_v12  ;;  %v3118_v56 = vmul.f32 %v3116_v28, %v4540_v17  ;;  %v3123_v5 = vmul.f32 %v3122_v1, %v4537_v12 }
 0x253   :  { %v3101_v62 = vadd.f32 %v3097_v2, %v3089_v47  ;;  %v3102_v11 = vadd.f32 %v3098_v21, %v3090_v63  ;;  %v3124_v51 = vmul.f32 %v3122_v1, %v4540_v17  ;;  %v3134_v23 = vstv %s5756_s24 }
 0x254   :  { %v3119_v16 = vadd.f32 %v3117_v38, %v5718_v52  ;;  %v3120_v10 = vadd.f32 %v3118_v56, %v5720_v35  ;;  %v3146_v6 = vstv %s5762_s0  ;;  %v3127_v25 = vrot.slane %v3123_v5, 1 }
 0x255   :  { %v5794_v33 = vadd.f32 %v3109_v20, %v3101_v62  ;;  %v5796_v30 = vadd.f32 %v3110_v59, %v3102_v11  ;;  %v3128_v15 = vrot.slane %v3124_v51, 1  ;;  %v3135_v27 = vmul.f32 %v3134_v23, %v4537_v12 }
 0x256   :  { %v3136_v26 = vmul.f32 %v3134_v23, %v4540_v17  ;;  %v3147_v52 = vmul.f32 %v3146_v6, %v4537_v12  ;;  %v3148_v18 = vmul.f32 %v3146_v6, %v4540_v17  ;;  %v3131_v35 = vadd.f32 %v3127_v25, %v3119_v16 }
 0x257   :  { %v3132_v34 = vadd.f32 %v3128_v15, %v3120_v10  ;;  %v3171_v60 = vstv %s5768_s25  ;;  %v3177_v54 = vstv %s5776_s26  ;;  %v3139_v57 = vrot.slane %v3135_v27, 2 }
 0x258   :  { %v3140_v22 = vrot.slane %v3136_v26, 2  ;;  %v3151_v19 = vrot.slane %v3147_v52, 3  ;;  %v3152_v14 = vrot.slane %v3148_v18, 3  ;;  %v3172_v36 = vmul.f32 %v3171_v60, %v4580_v49 }
 0x259   :  { %v3173_v12 = vmul.f32 %v3171_v60, %v4492_v3  ;;  %v3178_v17 = vmul.f32 %v3177_v54, %v4580_v49  ;;  %v3179_v0 = vmul.f32 %v3177_v54, %v4492_v3  ;;  %v3143_v50 = vadd.f32 %v3139_v57, %v3131_v35 }
 0x25a   :  { %v3144_v32 = vadd.f32 %v3140_v22, %v3132_v34  ;;  %v3189_v41 = vstv %s5782_s27  ;;  %v3201_v39 = vstv %s5786_s28  ;;  %v3174_v58 = vadd.f32 %v3172_v36, %v5742_v48 }
 0x25b   :  { %v3175_v31 = vadd.f32 %v3173_v12, %v5744_v37  ;;  %v3182_v7 = vrot.slane %v3178_v17, 1  ;;  %v3183_v4 = vrot.slane %v3179_v0, 1  ;;  %v5822_v29 = vadd.f32 %v3151_v19, %v3143_v50 }
 0x25c   :  { %v5824_v8 = vadd.f32 %v3152_v14, %v3144_v32  ;;  %v3190_v13 = vmul.f32 %v3189_v41, %v4580_v49  ;;  %v3191_v45 = vmul.f32 %v3189_v41, %v4492_v3  ;;  %v3202_v9 = vmul.f32 %v3201_v39, %v4580_v49 }
 0x25d   :  { %v3186_v24 = vadd.f32 %v3182_v7, %v3174_v58  ;;  %v3187_v48 = vadd.f32 %v3183_v4, %v3175_v31  ;;  %v3203_v37 = vmul.f32 %v3201_v39, %v4492_v3  ;;  %v3213_v55 = vstv %s5798_s1 }
 0x25e   :  { %v3194_v53 = vrot.slane %v3190_v13, 2  ;;  %v3195_v44 = vrot.slane %v3191_v45, 2  ;;  %v3219_v47 = vstv %s5804_s2  ;;  %v3206_v63 = vrot.slane %v3202_v9, 3 }
 0x25f   :  { %v3207_v43 = vrot.slane %v3203_v37, 3  ;;  %v3214_v46 = vmul.f32 %v3213_v55, %v4580_v49  ;;  %v3215_v2 = vmul.f32 %v3213_v55, %v4492_v3  ;;  %v3220_v1 = vmul.f32 %v3219_v47, %v4580_v49 }
 0x260   :  { %v3198_v21 = vadd.f32 %v3194_v53, %v3186_v24  ;;  %v3199_v28 = vadd.f32 %v3195_v44, %v3187_v48  ;;  %v3221_v20 = vmul.f32 %v3219_v47, %v4492_v3  ;;  %v3231_v56 = vstv %s5808_s29 }
 0x261   :  { %v3216_v59 = vadd.f32 %v3214_v46, %v5770_v40  ;;  %v3217_v38 = vadd.f32 %v3215_v2, %v5772_v61  ;;  %v3243_v62 = vstv %s5814_s30  ;;  %v3224_v51 = vrot.slane %v3220_v1, 1 }
 0x262   :  { %v5846_v11 = vadd.f32 %v3206_v63, %v3198_v21  ;;  %v5848_v5 = vadd.f32 %v3207_v43, %v3199_v28  ;;  %v3225_v16 = vrot.slane %v3221_v20, 1  ;;  %v3232_v10 = vmul.f32 %v3231_v56, %v4580_v49 }
 0x263   :  { %v3233_v23 = vmul.f32 %v3231_v56, %v4492_v3  ;;  %v3244_v40 = vmul.f32 %v3243_v62, %v4580_v49  ;;  %v3245_v6 = vmul.f32 %v3243_v62, %v4492_v3  ;;  %v3228_v61 = vadd.f32 %v3224_v51, %v3216_v59 }
 0x264   :  { %v3229_v25 = vadd.f32 %v3225_v16, %v3217_v38  ;;  %v3255_v15 = vstv %s5820_s4  ;;  %v3261_v27 = vstv %s5828_s5  ;;  %v3236_v26 = vrot.slane %v3232_v10, 2 }
 0x265   :  { %v3237_v52 = vrot.slane %v3233_v23, 2  ;;  %v3248_v18 = vrot.slane %v3244_v40, 3  ;;  %v3249_v35 = vrot.slane %v3245_v6, 3  ;;  %v3256_v34 = vmul.f32 %v3255_v15, %v4580_v49 }
 0x266   :  { %v3257_v60 = vmul.f32 %v3255_v15, %v4492_v3  ;;  %v3262_v54 = vmul.f32 %v3261_v27, %v4580_v49  ;;  %v3263_v57 = vmul.f32 %v3261_v27, %v4492_v3  ;;  %v3240_v22 = vadd.f32 %v3236_v26, %v3228_v61 }
 0x267   :  { %v3241_v19 = vadd.f32 %v3237_v52, %v3229_v25  ;;  %v3273_v14 = vstv %s5834_s6  ;;  %v3285_v36 = vstv %s5838_s7  ;;  %v3258_v12 = vadd.f32 %v3256_v34, %v5794_v33 }
 0x268   :  { %v3259_v17 = vadd.f32 %v3257_v60, %v5796_v30  ;;  %v3266_v0 = vrot.slane %v3262_v54, 1  ;;  %v3267_v50 = vrot.slane %v3263_v57, 1  ;;  %v3252_v32 = vadd.f32 %v3248_v18, %v3240_v22 }
 0x269   :  { %v3253_v41 = vadd.f32 %v3249_v35, %v3241_v19  ;;  %v3274_v39 = vmul.f32 %v3273_v14, %v4580_v49  ;;  %v3275_v58 = vmul.f32 %v3273_v14, %v4492_v3  ;;  %v3286_v4 = vmul.f32 %v3285_v36, %v4580_v49 }
 0x26a   :  { %v3270_v31 = vadd.f32 %v3266_v0, %v3258_v12  ;;  %v3271_v7 = vadd.f32 %v3267_v50, %v3259_v17  ;;  %v3287_v13 = vmul.f32 %v3285_v36, %v4492_v3  ;;  %v3297_v24 = vstv %s5850_s8 }
 0x26b   :  { %v3278_v45 = vrot.slane %v3274_v39, 2  ;;  %v3279_v33 = vrot.slane %v3275_v58, 2  ;;  %v3303_v30 = vstv %s5856_s9  ;;  %v3290_v48 = vrot.slane %v3286_v4, 3 }
 0x26c   :  { %v3291_v9 = vrot.slane %v3287_v13, 3  ;;  %v3298_v37 = vmul.f32 %v3297_v24, %v4580_v49  ;;  %v3299_v53 = vmul.f32 %v3297_v24, %v4492_v3  ;;  %v3304_v47 = vmul.f32 %v3303_v30, %v4580_v49 }
 0x26d   :  { %v3282_v44 = vadd.f32 %v3278_v45, %v3270_v31  ;;  %v3283_v55 = vadd.f32 %v3279_v33, %v3271_v7  ;;  %v3305_v63 = vmul.f32 %v3303_v30, %v4492_v3  ;;  %v3315_v2 = vstv %s5860_s10 }
 0x26e   :  { %v3300_v43 = vadd.f32 %v3298_v37, %v5822_v29  ;;  %v3301_v46 = vadd.f32 %v3299_v53, %v5824_v8  ;;  %v3327_v21 = vstv %s5866_s11  ;;  %v3308_v20 = vrot.slane %v3304_v47, 1 }
 0x26f   :  { %v3294_v28 = vadd.f32 %v3290_v48, %v3282_v44  ;;  %v3295_v1 = vadd.f32 %v3291_v9, %v3283_v55  ;;  %v3309_v59 = vrot.slane %v3305_v63, 1  ;;  %v3316_v38 = vmul.f32 %v3315_v2, %v4580_v49 }
 0x270   :  { %v3317_v56 = vmul.f32 %v3315_v2, %v4492_v3  ;;  %v3328_v62 = vmul.f32 %v3327_v21, %v4580_v49  ;;  %v3329_v51 = vmul.f32 %v3327_v21, %v4492_v3  ;;  %v3312_v16 = vadd.f32 %v3308_v20, %v3300_v43 }
 0x271   :  { %v3313_v10 = vadd.f32 %v3309_v59, %v3301_v46  ;;  %v3340_v29 = vrot.slane %v5848_v5, 7  ;;  %v3347_v23 = vrot.slane %v3253_v41, 7  ;;  %v3320_v8 = vrot.slane %v3316_v38, 2 }
 0x272   :  { %v3321_v40 = vrot.slane %v3317_v56, 2  ;;  %v3354_v25 = vrot.slane %v3295_v1, 7  ;;  %v3332_v26 = vrot.slane %v3328_v62, 3  ;;  %v3333_v52 = vrot.slane %v3329_v51, 3 }
 0x273   :  { %v3341_v6 = vsel %vm1690_vm8, %v5846_v11, %v3340_v29  ;;  %v3348_v61 = vsel %vm1690_vm8, %v3252_v32, %v3347_v23  ;;  %v3324_v15 = vadd.f32 %v3320_v8, %v3312_v16 }
 0x274   :  { %v3325_v27 = vadd.f32 %v3321_v40, %v3313_v10  ;;  %3344 = vst.msk [vmem:[#allocation9 + $0x8] ss:$4 sm:$0x3] %vm5187_vm9, %v3341_v6  ;;  %v3355_v3 = vsel %vm1690_vm8, %v3294_v28, %v3354_v25 }
 0x275   :  { %3351 = vst.msk [vmem:[#allocation9 + $0x9] ss:$4 sm:$0x3] %vm5187_vm9, %v3348_v61  ;;  %v3336_v49 = vadd.f32 %v3332_v26, %v3324_v15 }
 0x276   :  { %v3337_v5 = vadd.f32 %v3333_v52, %v3325_v27  ;;  %3358 = vst.msk [vmem:[#allocation9 + $0xa] ss:$4 sm:$0x3] %vm5187_vm9, %v3355_v3 }
 0x278   :  { %v3361_v11 = vrot.slane %v3337_v5, 7 }
 0x27a   :  { %v3362_v18 = vsel %vm1690_vm8, %v3336_v49, %v3361_v11 }
 0x27b   :  { %3365 = vst.msk [vmem:[#allocation9 + $0xb] ss:$4 sm:$0x3] %vm5187_vm9, %v3362_v18 }
 0x27c   :  { %3378 = dma.vmem_to_hbm [thread:$0]  %s3371_s13, 256, %s3373_s16, [#allocation4], %s3785_s20, %s3785_s20, %s3786_s21  }
 0x27d   :  { %3782 = dma.done.wait [#allocation4], 256  }
 0x27e   :  { %3783 = vsyncadd [#allocation4], 4294967040 }
 0x27f   :  { %3383 = vsyncpa [#allocation3], 1 }
 0x280   :  { %3384 = vsyncpa [#allocation8], 1 }
 0x281   :  { %3385 = vsyncpa [#allocation4], 1 }
 0x282   :  { %3386 = vsyncpa [#allocation5], 1 }

</bundles_post_ra>
